<compile_context>
chip_gen: v7x
topology: tpu7x:2x2x1
jax: 0.10.0
libtpu: 0.0.40
codegen_flags: <defaults>
</compile_context>

<pallas_src>
import functools

import numpy as np
import jax
import jax.numpy as jnp
from jax import lax
from jax.experimental import pallas as pl
from jax.experimental.pallas import tpu as pltpu

CIN = 8                     # input channels (see TODO above)
COUT = 16                   # per-branch conv channels (as in the reference module)
NUM_CLASSES = 4
H_IN, W_IN = 10, 14
BN_SCALE = float(1.0 / np.sqrt(1.0 + 1e-5))   # eval BN: mean=0, var=1, gamma=1, beta=0
# x_time -> (B,16,3,1), x_freq -> (B,16,1,1), x_tf -> (B,16,1,1); after the
# attention broadcast every branch contributes (B,16,3,3) features.
FLATTEN = 3 * COUT * 3 * 3  # = 432


# ----------------------------------------------------------------------------
# The single fused Pallas kernel
# ----------------------------------------------------------------------------
def _ampcnet_kernel(
        B,
        col_t_ref, wt1_ref, bt1_ref,
        s_tu1_ref, w_tu1_ref, b_tu1_ref,
        s_tu2_ref, w_tu2_ref, b_tu2_ref,
        pool_t_ref, bcast_t_ref, se_t_w1_ref, se_t_w2_ref,
        col_f_ref, wf1_ref, bf1_ref, se_f_w1_ref, se_f_w2_ref,
        col_q_ref, wq1_ref, bq1_ref,
        s_q1a_ref, w_q1a_ref, b_q1a_ref,
        s_q1b_ref, w_q1b_ref, b_q1b_ref,
        s_q2a_ref, w_q2a_ref, b_q2a_ref,
        s_q2b_ref, w_q2b_ref, b_q2b_ref,
        wg_ref, bg_ref, wc_ref, bc_ref,
        pi_ref, pj_ref, pf_ref, gsum_ref,
        w1_ref, b1_ref, w2_ref, b2_ref,
        out_ref):
    f32 = jnp.float32

    def mm(a, b):
        return jnp.dot(a, b, preferred_element_type=f32)

    # conv as tap-sum over host-built 0/1 selector matrices:
    #   out[(b,ho,wo), co] = sum_t (S_t @ X) @ W_t  (+ folded bias / BN / ReLU)
    def conv_taps(x, s_ref, w_ref, b_ref, relu):
        ntap = s_ref.shape[0]
        acc = mm(mm(s_ref[0], x), w_ref[0])
        for t in range(1, ntap):
            acc = acc + mm(mm(s_ref[t], x), w_ref[t])
        acc = acc + b_ref[...]
        return jnp.maximum(acc, 0.0) if relu else acc

    # SEBlock gate on the VPU/EUP only (hidden width is 1): no MXU dots.
    def se_gate(pooled, w1r, w2r):
        h = jnp.maximum(jnp.sum(pooled * w1r[...], axis=1, keepdims=True), 0.0)
        return 1.0 / (1.0 + jnp.exp(-h * w2r[...]))     # (B, C)

    # ---- time branch ------------------------------------------------------
    xt = mm(col_t_ref[...], wt1_ref[...]) + bt1_ref[...]              # (B*50,16)
    xt = conv_taps(xt, s_tu1_ref, w_tu1_ref, b_tu1_ref, True)         # (B*15,16)
    xt = conv_taps(xt, s_tu2_ref, w_tu2_ref, b_tu2_ref, True)         # (B*3, 16)
    gate_t = se_gate(mm(pool_t_ref[...], xt), se_t_w1_ref, se_t_w2_ref)
    x_time = xt * mm(bcast_t_ref[...], gate_t)                        # (B*3, 16)

    # ---- freq branch ------------------------------------------------------
    xf = jnp.maximum(mm(col_f_ref[...], wf1_ref[...]) + bf1_ref[...], 0.0)  # (B,16)
    x_freq = xf * se_gate(xf, se_f_w1_ref, se_f_w2_ref)               # (B, 16)

    # ---- tf branch --------------------------------------------------------
    xq = mm(col_q_ref[...], wq1_ref[...]) + bq1_ref[...]              # (B*140,16)
    xq = conv_taps(xq, s_q1a_ref, w_q1a_ref, b_q1a_ref, False)        # (B*5, 16)
    xq = conv_taps(xq, s_q1b_ref, w_q1b_ref, b_q1b_ref, True)         # (B*3, 16)
    xq = conv_taps(xq, s_q2a_ref, w_q2a_ref, b_q2a_ref, False)        # (B*2, 16)
    xq = conv_taps(xq, s_q2b_ref, w_q2b_ref, b_q2b_ref, True)         # (B,   16)
    # PSA: grouped 1x1 conv and the per-group kxk convs (on 1x1 spatial only the
    # centre tap is live) are both block-diagonal 16x16 matmuls.
    g = mm(xq, wg_ref[...]) + bg_ref[...]
    c = mm(g, wc_ref[...]) + bc_ref[...]
    # TODO(synk): PSA's SEBlock(4, reduction=16) has hidden width 4 // 16 == 0 in
    # PyTorch, so its gate is exactly sigmoid(0) = 0.5; reproduced as a constant.
    x_tf = 0.5 * g * c                                                # (B, 16)

    # ---- fused attention: rows ordered (i, j, b), columns = channel --------
    vi = mm(pi_ref[...], x_time)          # v_i
    vj = mm(pj_ref[...], x_time)          # v_j
    ff = mm(pf_ref[...], x_freq)          # f
    qq = mm(pf_ref[...], x_tf)            # q
    s_att = vi * vj + ff * ff + qq * qq
    s_att = s_att - jnp.max(s_att, axis=0, keepdims=True)   # constant over j -> exact
    e = jnp.exp(s_att)
    att = e / mm(gsum_ref[...], e)        # softmax over j (sum+broadcast via matmul)
    ot = vi * att                         # x_time * att
    of = ff * att                         # x_freq * att
    oq = qq * att                         # x_tf   * att

    # ---- classifier (feature order = branch, channel, i, j = torch flatten) ---
    nh = b1_ref.shape[-1]
    h = jnp.zeros((B, nh), f32)
    for br, o in enumerate((ot, of, oq)):
        for ij in range(9):
            h = h + mm(o[ij * B:(ij + 1) * B, :], w1_ref[br * 9 + ij])
    h = jnp.maximum(h + b1_ref[...], 0.0)
    out_ref[...] = mm(h, w2_ref[...]) + b2_ref[...]


# ----------------------------------------------------------------------------
# Host-side glue: im2col for the three first convs (raw input only)
# ----------------------------------------------------------------------------
def _im2col(x, kh, kw, sh, sw, ph, pw):
    B, C, H, W = x.shape
    Ho = (H + 2 * ph - kh) // sh + 1
    Wo = (W + 2 * pw - kw) // sw + 1
    xp = jnp.pad(x, ((0, 0), (0, 0), (ph, ph), (pw, pw)))
    cols = []
    for i in range(kh):
        for j in range(kw):
            cols.append(xp[:, :, i:i + sh * (Ho - 1) + 1:sh,
                           j:j + sw * (Wo - 1) + 1:sw])
    col = jnp.stack(cols, axis=2)                        # (B, C, kh*kw, Ho, Wo)
    return col.transpose(0, 3, 4, 1, 2).reshape(B * Ho * Wo, C * kh * kw)


def ampcnet_forward(prep, x):
    B = x.shape[0]
    col_t = _im2col(x, 1, 10, 1, 1, 0, 0)    # (B*50, 80)
    col_f = _im2col(x, 10, 1, 2, 15, 0, 0)   # (B,    80)
    col_q = _im2col(x, 5, 5, 1, 1, 2, 2)     # (B*140, 200)

    inputs = [
        col_t, prep['wt1'], prep['bt1'],
        prep['s_tu1'], prep['w_tu1'], prep['b_tu1'],
        prep['s_tu2'], prep['w_tu2'], prep['b_tu2'],
        prep['pool_t'], prep['bcast_t'], prep['se_t_w1'], prep['se_t_w2'],
        col_f, prep['wf1'], prep['bf1'], prep['se_f_w1'], prep['se_f_w2'],
        col_q, prep['wq1'], prep['bq1'],
        prep['s_q1a'], prep['w_q1a'], prep['b_q1a'],
        prep['s_q1b'], prep['w_q1b'], prep['b_q1b'],
        prep['s_q2a'], prep['w_q2a'], prep['b_q2a'],
        prep['s_q2b'], prep['w_q2b'], prep['b_q2b'],
        prep['wg_bd'], prep['bg'], prep['wc_bd'], prep['bc'],
        prep['p_i'], prep['p_j'], prep['p_f'], prep['g_sum'],
        prep['w1_blk'], prep['b1'], prep['w2'], prep['b2'],
    ]
    kern = functools.partial(_ampcnet_kernel, B)
    return pl.pallas_call(
        kern,
        grid=(1,),
        in_specs=[pl.BlockSpec(a.shape, lambda i, _n=a.ndim: (0,) * _n)
                  for a in inputs],
        out_specs=pl.BlockSpec((B, NUM_CLASSES), lambda i: (0, 0)),
        out_shape=jax.ShapeDtypeStruct((B, NUM_CLASSES), jnp.float32),
        compiler_params=pltpu.CompilerParams(dimension_semantics=("arbitrary",)),
    )(*inputs)


# ----------------------------------------------------------------------------
# Host-side parameter preparation (BN folding, tap selectors, layout plumbing)
# ----------------------------------------------------------------------------
def _tap_selectors(Bn, Hin, Win, kh, kw, sh, sw, ph, pw):
    Ho = (Hin + 2 * ph - kh) // sh + 1
    Wo = (Win + 2 * pw - kw) // sw + 1
    S = np.zeros((kh * kw, Bn * Ho * Wo, Bn * Hin * Win), np.float32)
    for i in range(kh):
        for j in range(kw):
            t = i * kw + j
            for b in range(Bn):
                for ho in range(Ho):
                    for wo in range(Wo):
                        hi = ho * sh + i - ph
                        wi = wo * sw + j - pw
                        if 0 <= hi < Hin and 0 <= wi < Win:
                            S[t, b * Ho * Wo + ho * Wo + wo,
                              b * Hin * Win + hi * Win + wi] = 1.0
    return S, Ho, Wo


def prepare_inputs(params, B):
    C = COUT
    s = BN_SCALE

    def fold_gemm(w, b, bn):
        sc = s if bn else 1.0
        wm = (jnp.asarray(w, jnp.float32) * sc)
        return wm.reshape(wm.shape[0], -1).T, \
            (jnp.asarray(b, jnp.float32) * sc).reshape(1, -1)

    def fold_taps(w, b, bn):
        sc = s if bn else 1.0
        we = jnp.asarray(w, jnp.float32) * sc
        co, ci, kh, kw = we.shape
        ws = jnp.transpose(we, (2, 3, 1, 0)).reshape(kh * kw, ci, co)
        return ws, (jnp.asarray(b, jnp.float32) * sc).reshape(1, -1)

    pt, pfq, pq, pc = params['time'], params['freq'], params['tf'], params['cls']
    prep = {}

    # time branch
    prep['wt1'], prep['bt1'] = fold_gemm(pt['c1_w'], pt['c1_b'], False)
    s_tu1, h, w_ = _tap_selectors(B, 10, 5, 1, 3, 2, 1, 0, 0)
    prep['s_tu1'] = s_tu1
    prep['w_tu1'], prep['b_tu1'] = fold_taps(pt['u1_w'], pt['u1_b'], True)
    s_tu2, h, w_ = _tap_selectors(B, h, w_, 1, 3, 2, 1, 0, 0)
    prep['s_tu2'] = s_tu2
    prep['w_tu2'], prep['b_tu2'] = fold_taps(pt['u2_w'], pt['u2_b'], True)
    hw_t = h * w_                                  # = 3
    pool = np.zeros((B, B * hw_t), np.float32)
    bcast = np.zeros((B * hw_t, B), np.float32)
    for b in range(B):
        pool[b, b * hw_t:(b + 1) * hw_t] = 1.0 / hw_t
        bcast[b * hw_t:(b + 1) * hw_t, b] = 1.0
    prep['pool_t'], prep['bcast_t'] = pool, bcast
    prep['se_t_w1'] = jnp.asarray(pt['se_w1'], jnp.float32)       # (1, C)
    prep['se_t_w2'] = jnp.asarray(pt['se_w2'], jnp.float32).T     # (1, C)

    # freq branch
    prep['wf1'], prep['bf1'] = fold_gemm(pfq['c1_w'], pfq['c1_b'], True)
    prep['se_f_w1'] = jnp.asarray(pfq['se_w1'], jnp.float32)
    prep['se_f_w2'] = jnp.asarray(pfq['se_w2'], jnp.float32).T

    # tf branch
    prep['wq1'], prep['bq1'] = fold_gemm(pq['c1_w'], pq['c1_b'], False)
    s_q1a, h, w_ = _tap_selectors(B, 10, 14, 3, 3, 2, 15, 1, 1)
    prep['s_q1a'] = s_q1a
    prep['w_q1a'], prep['b_q1a'] = fold_taps(pq['u1a_w'], pq['u1a_b'], False)
    s_q1b, h, w_ = _tap_selectors(B, h, w_, 3, 3, 2, 15, 1, 1)
    prep['s_q1b'] = s_q1b
    prep['w_q1b'], prep['b_q1b'] = fold_taps(pq['u1b_w'], pq['u1b_b'], True)
    s_q2a, h, w_ = _tap_selectors(B, h, w_, 3, 3, 2, 15, 1, 1)
    prep['s_q2a'] = s_q2a
    prep['w_q2a'], prep['b_q2a'] = fold_taps(pq['u2a_w'], pq['u2a_b'], False)
    s_q2b, h, w_ = _tap_selectors(B, h, w_, 3, 3, 2, 15, 1, 1)
    prep['s_q2b'] = s_q2b
    prep['w_q2b'], prep['b_q2b'] = fold_taps(pq['u2b_w'], pq['u2b_b'], True)
    assert h == 1 and w_ == 1

    # PSA: block-diagonal grouped 1x1 conv and centre taps of the kxk convs
    psa = pq['psa']
    gw = np.asarray(psa['gw'], np.float32)         # (16, 4, 1, 1)
    wg_bd = np.zeros((C, C), np.float32)
    for co in range(C):
        grp = co // 4
        wg_bd[grp * 4:(grp + 1) * 4, co] = gw[co, :, 0, 0]
    prep['wg_bd'] = wg_bd
    prep['bg'] = jnp.asarray(psa['gb'], jnp.float32).reshape(1, -1)
    wc_bd = np.zeros((C, C), np.float32)
    bc = np.zeros((1, C), np.float32)
    for gi, kk in enumerate((3, 5, 7, 9)):
        wci = np.asarray(psa[f'c{gi}_w'], np.float32)
        wc_bd[gi * 4:(gi + 1) * 4, gi * 4:(gi + 1) * 4] = wci[:, :, kk // 2, kk // 2].T
        bc[0, gi * 4:(gi + 1) * 4] = np.asarray(psa[f'c{gi}_b'], np.float32)
    prep['wc_bd'], prep['bc'] = wc_bd, bc

    # attention constants; epilogue rows ordered (i, j, b)
    nt = hw_t                                      # = 3
    p_i = np.zeros((nt * nt * B, nt * B), np.float32)
    p_j = np.zeros((nt * nt * B, nt * B), np.float32)
    p_f = np.zeros((nt * nt * B, B), np.float32)
    g_sum = np.zeros((nt * nt * B, nt * nt * B), np.float32)
    for i in range(nt):
        for j in range(nt):
            for b in range(B):
                r = (i * nt + j) * B + b
                p_i[r, b * nt + i] = 1.0
                p_j[r, b * nt + j] = 1.0
                p_f[r, b] = 1.0
                for j2 in range(nt):
                    g_sum[r, (i * nt + j2) * B + b] = 1.0
    prep['p_i'], prep['p_j'], prep['p_f'], prep['g_sum'] = p_i, p_j, p_f, g_sum

    # classifier weight, pre-permuted to (branch*9 + i*3 + j, channel, hidden)
    w1 = jnp.asarray(pc['w1'], jnp.float32).reshape(3, C, nt * nt, -1)
    prep['w1_blk'] = jnp.transpose(w1, (0, 2, 1, 3)).reshape(3 * nt * nt, C, -1)
    prep['b1'] = jnp.asarray(pc['b1'], jnp.float32).reshape(1, -1)
    prep['w2'] = jnp.asarray(pc['w2'], jnp.float32)
    prep['b2'] = jnp.asarray(pc['b2'], jnp.float32).reshape(1, -1)
    return prep


# ----------------------------------------------------------------------------
# Pure-JAX reference (mirrors the PyTorch forward in eval mode)
# ----------------------------------------------------------------------------
def _conv_ref(x, w, b, stride=(1, 1), padding=(0, 0), groups=1):
    out = lax.conv_general_dilated(
        x, w, window_strides=stride,
        padding=((padding[0], padding[0]), (padding[1], padding[1])),
        dimension_numbers=('NCHW', 'OIHW', 'NCHW'),
        feature_group_count=groups)
    return out + b.reshape(1, -1, 1, 1)


def _se_ref(x, w1, w2):
    pooled = x.mean(axis=(2, 3))                          # (B, C)
    y = jnp.maximum(pooled @ w1.T, 0.0) @ w2.T
    y = 1.0 / (1.0 + jnp.exp(-y))
    return x * y[:, :, None, None]


def ampcnet_reference(params, x):
    s = BN_SCALE
    p = params['time']
    t = _conv_ref(x, p['c1_w'], p['c1_b'])
    t = jnp.maximum(_conv_ref(t, p['u1_w'], p['u1_b'], stride=(2, 1)) * s, 0.0)
    t = jnp.maximum(_conv_ref(t, p['u2_w'], p['u2_b'], stride=(2, 1)) * s, 0.0)
    x_time = _se_ref(t, p['se_w1'], p['se_w2'])

    p = params['freq']
    f = jnp.maximum(_conv_ref(x, p['c1_w'], p['c1_b'], stride=(2, 15)) * s, 0.0)
    x_freq = _se_ref(f, p['se_w1'], p['se_w2'])

    p = params['tf']
    q = _conv_ref(x, p['c1_w'], p['c1_b'], padding=(2, 2))
    q = _conv_ref(q, p['u1a_w'], p['u1a_b'], stride=(2, 15), padding=(1, 1))
    q = jnp.maximum(_conv_ref(q, p['u1b_w'], p['u1b_b'], stride=(2, 15), padding=(1, 1)) * s, 0.0)
    q = _conv_ref(q, p['u2a_w'], p['u2a_b'], stride=(2, 15), padding=(1, 1))
    q = jnp.maximum(_conv_ref(q, p['u2b_w'], p['u2b_b'], stride=(2, 15), padding=(1, 1)) * s, 0.0)
    ps = p['psa']
    g = _conv_ref(q, ps['gw'], ps['gb'], groups=4)
    outs = []
    for gi, k in enumerate((3, 5, 7, 9)):
        g_i = g[:, gi * 4:(gi + 1) * 4]
        c_i = _conv_ref(g_i, ps[f'c{gi}_w'], ps[f'c{gi}_b'], padding=(k // 2, k // 2))
        outs.append(g_i * (0.5 * c_i))      # degenerate SEBlock(4, reduction=16) gate
    x_tf = jnp.concatenate(outs, axis=1)

    att = (jnp.matmul(x_time, jnp.swapaxes(x_time, -1, -2))
           + jnp.matmul(x_freq, jnp.swapaxes(x_freq, -1, -2))
           + jnp.matmul(x_tf, jnp.swapaxes(x_tf, -1, -2)))
    att = jax.nn.softmax(att, axis=-1)
    Bn = x.shape[0]
    feats = jnp.concatenate([(x_time * att).reshape(Bn, -1),
                             (x_freq * att).reshape(Bn, -1),
                             (x_tf * att).reshape(Bn, -1)], axis=1)
    c = params['cls']
    h = jnp.maximum(feats @ c['w1'] + c['b1'], 0.0)
    return h @ c['w2'] + c['b2']


# ----------------------------------------------------------------------------
# Deterministic parameter initialization (synthetic; no checkpoint)
# ----------------------------------------------------------------------------
def init_params(key, num_classes=NUM_CLASSES):
    ks = iter(jax.random.split(key, 64))

    def w(shape, s=0.1):
        return (s * jax.random.normal(next(ks), shape)).astype(jnp.float32)

    C = COUT
    time = dict(
        c1_w=w((C, CIN, 1, 10)), c1_b=w((C,), 0.02),
        u1_w=w((C, C, 1, 3)), u1_b=w((C,), 0.02),
        u2_w=w((C, C, 1, 3)), u2_b=w((C,), 0.02),
        se_w1=w((1, C)), se_w2=w((C, 1)),
    )
    freq = dict(
        c1_w=w((C, CIN, 10, 1)), c1_b=w((C,), 0.02),
        se_w1=w((1, C)), se_w2=w((C, 1)),
    )
    psa = dict(gw=w((C, C // 4, 1, 1)), gb=w((C,), 0.02))
    for i, k in enumerate((3, 5, 7, 9)):
        psa[f'c{i}_w'] = w((C // 4, C // 4, k, k))
        psa[f'c{i}_b'] = w((C // 4,), 0.02)
    tf_p = dict(
        c1_w=w((C, CIN, 5, 5)), c1_b=w((C,), 0.02),
        u1a_w=w((C, C, 3, 3)), u1a_b=w((C,), 0.02),
        u1b_w=w((C, C, 3, 3)), u1b_b=w((C,), 0.02),
        u2a_w=w((C, C, 3, 3)), u2a_b=w((C,), 0.02),
        u2b_w=w((C, C, 3, 3)), u2b_b=w((C,), 0.02),
        psa=psa,
    )
    cls = dict(
        w1=w((FLATTEN, 128), 0.05), b1=w((128,), 0.02),
        w2=w((128, num_classes), 0.05), b2=w((num_classes,), 0.02),
    )
    return dict(time=time, freq=freq, tf=tf_p, cls=cls)


if __name__ == "__main__":
    key = jax.random.PRNGKey(0)
    pkey, xkey = jax.random.split(key)
    params = init_params(pkey)
    # layout: NCHW input, (batch=2, channels=8, H=10, W=14)
    x = jax.random.normal(xkey, (2, CIN, H_IN, W_IN), dtype=jnp.float32)

    prep = prepare_inputs(params, x.shape[0])
    fwd = jax.jit(ampcnet_forward)
    out = fwd(prep, x)
    jax.block_until_ready(out)
    assert out.shape == (2, NUM_CLASSES)

    ref = ampcnet_reference(params, x)
    np.testing.assert_allclose(np.asarray(out), np.asarray(ref),
                               rtol=2e-2, atol=2e-2)
    print("KERNEL_OK")
</pallas_src>

<mosaic_0001>
module attributes {stable_mosaic.version = 11 : i64} {
  func.func @_ampcnet_kernel(%arg0: i32, %arg1: memref<100x80xf32, #tpu.memory_space<vmem>>, %arg2: memref<80x16xf32, #tpu.memory_space<vmem>>, %arg3: memref<1x16xf32, #tpu.memory_space<vmem>>, %arg4: memref<3x30x100xf32, #tpu.memory_space<vmem>>, %arg5: memref<3x16x16xf32, #tpu.memory_space<vmem>>, %arg6: memref<1x16xf32, #tpu.memory_space<vmem>>, %arg7: memref<3x6x30xf32, #tpu.memory_space<vmem>>, %arg8: memref<3x16x16xf32, #tpu.memory_space<vmem>>, %arg9: memref<1x16xf32, #tpu.memory_space<vmem>>, %arg10: memref<2x6xf32, #tpu.memory_space<vmem>>, %arg11: memref<6x2xf32, #tpu.memory_space<vmem>>, %arg12: memref<1x16xf32, #tpu.memory_space<vmem>>, %arg13: memref<1x16xf32, #tpu.memory_space<vmem>>, %arg14: memref<2x80xf32, #tpu.memory_space<vmem>>, %arg15: memref<80x16xf32, #tpu.memory_space<vmem>>, %arg16: memref<1x16xf32, #tpu.memory_space<vmem>>, %arg17: memref<1x16xf32, #tpu.memory_space<vmem>>, %arg18: memref<1x16xf32, #tpu.memory_space<vmem>>, %arg19: memref<280x200xf32, #tpu.memory_space<vmem>>, %arg20: memref<200x16xf32, #tpu.memory_space<vmem>>, %arg21: memref<1x16xf32, #tpu.memory_space<vmem>>, %arg22: memref<9x10x280xf32, #tpu.memory_space<vmem>>, %arg23: memref<9x16x16xf32, #tpu.memory_space<vmem>>, %arg24: memref<1x16xf32, #tpu.memory_space<vmem>>, %arg25: memref<9x6x10xf32, #tpu.memory_space<vmem>>, %arg26: memref<9x16x16xf32, #tpu.memory_space<vmem>>, %arg27: memref<1x16xf32, #tpu.memory_space<vmem>>, %arg28: memref<9x4x6xf32, #tpu.memory_space<vmem>>, %arg29: memref<9x16x16xf32, #tpu.memory_space<vmem>>, %arg30: memref<1x16xf32, #tpu.memory_space<vmem>>, %arg31: memref<9x2x4xf32, #tpu.memory_space<vmem>>, %arg32: memref<9x16x16xf32, #tpu.memory_space<vmem>>, %arg33: memref<1x16xf32, #tpu.memory_space<vmem>>, %arg34: memref<16x16xf32, #tpu.memory_space<vmem>>, %arg35: memref<1x16xf32, #tpu.memory_space<vmem>>, %arg36: memref<16x16xf32, #tpu.memory_space<vmem>>, %arg37: memref<1x16xf32, #tpu.memory_space<vmem>>, %arg38: memref<18x6xf32, #tpu.memory_space<vmem>>, %arg39: memref<18x6xf32, #tpu.memory_space<vmem>>, %arg40: memref<18x2xf32, #tpu.memory_space<vmem>>, %arg41: memref<18x18xf32, #tpu.memory_space<vmem>>, %arg42: memref<27x16x128xf32, #tpu.memory_space<vmem>>, %arg43: memref<1x128xf32, #tpu.memory_space<vmem>>, %arg44: memref<128x4xf32, #tpu.memory_space<vmem>>, %arg45: memref<1x4xf32, #tpu.memory_space<vmem>>, %arg46: memref<2x4xf32, #tpu.memory_space<vmem>>) attributes {dimension_semantics = [#tpu.dimension_semantics<arbitrary>], iteration_bounds = array<i64: 1>, scalar_prefetch = 0 : i64, scratch_operands = 0 : i64, tpu.core_type = #tpu.core_type<tc>, window_params = [{pipeline_mode = #tpu.pipeline_mode<synchronous>, transform_indices = @transform_0, window_bounds = array<i64: 100, 80>}, {pipeline_mode = #tpu.pipeline_mode<synchronous>, transform_indices = @transform_1, window_bounds = array<i64: 80, 16>}, {pipeline_mode = #tpu.pipeline_mode<synchronous>, transform_indices = @transform_2, window_bounds = array<i64: 1, 16>}, {pipeline_mode = #tpu.pipeline_mode<synchronous>, transform_indices = @transform_3, window_bounds = array<i64: 3, 30, 100>}, {pipeline_mode = #tpu.pipeline_mode<synchronous>, transform_indices = @transform_4, window_bounds = array<i64: 3, 16, 16>}, {pipeline_mode = #tpu.pipeline_mode<synchronous>, transform_indices = @transform_5, window_bounds = array<i64: 1, 16>}, {pipeline_mode = #tpu.pipeline_mode<synchronous>, transform_indices = @transform_6, window_bounds = array<i64: 3, 6, 30>}, {pipeline_mode = #tpu.pipeline_mode<synchronous>, transform_indices = @transform_7, window_bounds = array<i64: 3, 16, 16>}, {pipeline_mode = #tpu.pipeline_mode<synchronous>, transform_indices = @transform_8, window_bounds = array<i64: 1, 16>}, {pipeline_mode = #tpu.pipeline_mode<synchronous>, transform_indices = @transform_9, window_bounds = array<i64: 2, 6>}, {pipeline_mode = #tpu.pipeline_mode<synchronous>, transform_indices = @transform_10, window_bounds = array<i64: 6, 2>}, {pipeline_mode = #tpu.pipeline_mode<synchronous>, transform_indices = @transform_11, window_bounds = array<i64: 1, 16>}, {pipeline_mode = #tpu.pipeline_mode<synchronous>, transform_indices = @transform_12, window_bounds = array<i64: 1, 16>}, {pipeline_mode = #tpu.pipeline_mode<synchronous>, transform_indices = @transform_13, window_bounds = array<i64: 2, 80>}, {pipeline_mode = #tpu.pipeline_mode<synchronous>, transform_indices = @transform_14, window_bounds = array<i64: 80, 16>}, {pipeline_mode = #tpu.pipeline_mode<synchronous>, transform_indices = @transform_15, window_bounds = array<i64: 1, 16>}, {pipeline_mode = #tpu.pipeline_mode<synchronous>, transform_indices = @transform_16, window_bounds = array<i64: 1, 16>}, {pipeline_mode = #tpu.pipeline_mode<synchronous>, transform_indices = @transform_17, window_bounds = array<i64: 1, 16>}, {pipeline_mode = #tpu.pipeline_mode<synchronous>, transform_indices = @transform_18, window_bounds = array<i64: 280, 200>}, {pipeline_mode = #tpu.pipeline_mode<synchronous>, transform_indices = @transform_19, window_bounds = array<i64: 200, 16>}, {pipeline_mode = #tpu.pipeline_mode<synchronous>, transform_indices = @transform_20, window_bounds = array<i64: 1, 16>}, {pipeline_mode = #tpu.pipeline_mode<synchronous>, transform_indices = @transform_21, window_bounds = array<i64: 9, 10, 280>}, {pipeline_mode = #tpu.pipeline_mode<synchronous>, transform_indices = @transform_22, window_bounds = array<i64: 9, 16, 16>}, {pipeline_mode = #tpu.pipeline_mode<synchronous>, transform_indices = @transform_23, window_bounds = array<i64: 1, 16>}, {pipeline_mode = #tpu.pipeline_mode<synchronous>, transform_indices = @transform_24, window_bounds = array<i64: 9, 6, 10>}, {pipeline_mode = #tpu.pipeline_mode<synchronous>, transform_indices = @transform_25, window_bounds = array<i64: 9, 16, 16>}, {pipeline_mode = #tpu.pipeline_mode<synchronous>, transform_indices = @transform_26, window_bounds = array<i64: 1, 16>}, {pipeline_mode = #tpu.pipeline_mode<synchronous>, transform_indices = @transform_27, window_bounds = array<i64: 9, 4, 6>}, {pipeline_mode = #tpu.pipeline_mode<synchronous>, transform_indices = @transform_28, window_bounds = array<i64: 9, 16, 16>}, {pipeline_mode = #tpu.pipeline_mode<synchronous>, transform_indices = @transform_29, window_bounds = array<i64: 1, 16>}, {pipeline_mode = #tpu.pipeline_mode<synchronous>, transform_indices = @transform_30, window_bounds = array<i64: 9, 2, 4>}, {pipeline_mode = #tpu.pipeline_mode<synchronous>, transform_indices = @transform_31, window_bounds = array<i64: 9, 16, 16>}, {pipeline_mode = #tpu.pipeline_mode<synchronous>, transform_indices = @transform_32, window_bounds = array<i64: 1, 16>}, {pipeline_mode = #tpu.pipeline_mode<synchronous>, transform_indices = @transform_33, window_bounds = array<i64: 16, 16>}, {pipeline_mode = #tpu.pipeline_mode<synchronous>, transform_indices = @transform_34, window_bounds = array<i64: 1, 16>}, {pipeline_mode = #tpu.pipeline_mode<synchronous>, transform_indices = @transform_35, window_bounds = array<i64: 16, 16>}, {pipeline_mode = #tpu.pipeline_mode<synchronous>, transform_indices = @transform_36, window_bounds = array<i64: 1, 16>}, {pipeline_mode = #tpu.pipeline_mode<synchronous>, transform_indices = @transform_37, window_bounds = array<i64: 18, 6>}, {pipeline_mode = #tpu.pipeline_mode<synchronous>, transform_indices = @transform_38, window_bounds = array<i64: 18, 6>}, {pipeline_mode = #tpu.pipeline_mode<synchronous>, transform_indices = @transform_39, window_bounds = array<i64: 18, 2>}, {pipeline_mode = #tpu.pipeline_mode<synchronous>, transform_indices = @transform_40, window_bounds = array<i64: 18, 18>}, {pipeline_mode = #tpu.pipeline_mode<synchronous>, transform_indices = @transform_41, window_bounds = array<i64: 27, 16, 128>}, {pipeline_mode = #tpu.pipeline_mode<synchronous>, transform_indices = @transform_42, window_bounds = array<i64: 1, 128>}, {pipeline_mode = #tpu.pipeline_mode<synchronous>, transform_indices = @transform_43, window_bounds = array<i64: 128, 4>}, {pipeline_mode = #tpu.pipeline_mode<synchronous>, transform_indices = @transform_44, window_bounds = array<i64: 1, 4>}, {pipeline_mode = #tpu.pipeline_mode<synchronous>, transform_indices = @transform_45, window_bounds = array<i64: 2, 4>}]} {
    %c0 = arith.constant 0 : index
    %c0_0 = arith.constant 0 : index
    %0 = vector.load %arg1[%c0, %c0_0] : memref<100x80xf32, #tpu.memory_space<vmem>>, vector<100x80xf32>
    %c0_1 = arith.constant 0 : index
    %c0_2 = arith.constant 0 : index
    %1 = vector.load %arg2[%c0_1, %c0_2] : memref<80x16xf32, #tpu.memory_space<vmem>>, vector<80x16xf32>
    %cst = arith.constant dense<0.000000e+00> : vector<100x16xf32>
    %2 = tpu.matmul %0, %1, %cst {dimension_numbers = #tpu.dot_dimension_numbers<[1], [0], [0], [1], [0, 0, 1, 1], [], []>} : vector<100x80xf32>, vector<80x16xf32>, vector<100x16xf32> -> vector<100x16xf32>
    %c0_3 = arith.constant 0 : index
    %c0_4 = arith.constant 0 : index
    %3 = vector.load %arg3[%c0_3, %c0_4] : memref<1x16xf32, #tpu.memory_space<vmem>>, vector<1x16xf32>
    %4 = vector.broadcast %3 : vector<1x16xf32> to vector<100x16xf32>
    %5 = arith.addf %2, %4 : vector<100x16xf32>
    %c0_5 = arith.constant 0 : index
    %c0_6 = arith.constant 0 : index
    %c0_7 = arith.constant 0 : index
    %6 = vector.load %arg4[%c0_5, %c0_6, %c0_7] : memref<3x30x100xf32, #tpu.memory_space<vmem>>, vector<1x30x100xf32>
    %7 = vector.shape_cast %6 : vector<1x30x100xf32> to vector<30x100xf32>
    %cst_8 = arith.constant dense<0.000000e+00> : vector<30x16xf32>
    %8 = tpu.matmul %7, %5, %cst_8 {dimension_numbers = #tpu.dot_dimension_numbers<[1], [0], [0], [1], [0, 0, 1, 1], [], []>} : vector<30x100xf32>, vector<100x16xf32>, vector<30x16xf32> -> vector<30x16xf32>
    %c0_9 = arith.constant 0 : index
    %c0_10 = arith.constant 0 : index
    %c0_11 = arith.constant 0 : index
    %9 = vector.load %arg5[%c0_9, %c0_10, %c0_11] : memref<3x16x16xf32, #tpu.memory_space<vmem>>, vector<1x16x16xf32>
    %10 = vector.shape_cast %9 : vector<1x16x16xf32> to vector<16x16xf32>
    %cst_12 = arith.constant dense<0.000000e+00> : vector<30x16xf32>
    %11 = tpu.matmul %8, %10, %cst_12 {dimension_numbers = #tpu.dot_dimension_numbers<[1], [0], [0], [1], [0, 0, 1, 1], [], []>} : vector<30x16xf32>, vector<16x16xf32>, vector<30x16xf32> -> vector<30x16xf32>
    %c1 = arith.constant 1 : index
    %c0_13 = arith.constant 0 : index
    %c0_14 = arith.constant 0 : index
    %12 = vector.load %arg4[%c1, %c0_13, %c0_14] : memref<3x30x100xf32, #tpu.memory_space<vmem>>, vector<1x30x100xf32>
    %13 = vector.shape_cast %12 : vector<1x30x100xf32> to vector<30x100xf32>
    %cst_15 = arith.constant dense<0.000000e+00> : vector<30x16xf32>
    %14 = tpu.matmul %13, %5, %cst_15 {dimension_numbers = #tpu.dot_dimension_numbers<[1], [0], [0], [1], [0, 0, 1, 1], [], []>} : vector<30x100xf32>, vector<100x16xf32>, vector<30x16xf32> -> vector<30x16xf32>
    %c1_16 = arith.constant 1 : index
    %c0_17 = arith.constant 0 : index
    %c0_18 = arith.constant 0 : index
    %15 = vector.load %arg5[%c1_16, %c0_17, %c0_18] : memref<3x16x16xf32, #tpu.memory_space<vmem>>, vector<1x16x16xf32>
    %16 = vector.shape_cast %15 : vector<1x16x16xf32> to vector<16x16xf32>
    %cst_19 = arith.constant dense<0.000000e+00> : vector<30x16xf32>
    %17 = tpu.matmul %14, %16, %cst_19 {dimension_numbers = #tpu.dot_dimension_numbers<[1], [0], [0], [1], [0, 0, 1, 1], [], []>} : vector<30x16xf32>, vector<16x16xf32>, vector<30x16xf32> -> vector<30x16xf32>
    %18 = arith.addf %11, %17 : vector<30x16xf32>
    %c2 = arith.constant 2 : index
    %c0_20 = arith.constant 0 : index
    %c0_21 = arith.constant 0 : index
    %19 = vector.load %arg4[%c2, %c0_20, %c0_21] : memref<3x30x100xf32, #tpu.memory_space<vmem>>, vector<1x30x100xf32>
    %20 = vector.shape_cast %19 : vector<1x30x100xf32> to vector<30x100xf32>
    %cst_22 = arith.constant dense<0.000000e+00> : vector<30x16xf32>
    %21 = tpu.matmul %20, %5, %cst_22 {dimension_numbers = #tpu.dot_dimension_numbers<[1], [0], [0], [1], [0, 0, 1, 1], [], []>} : vector<30x100xf32>, vector<100x16xf32>, vector<30x16xf32> -> vector<30x16xf32>
    %c2_23 = arith.constant 2 : index
    %c0_24 = arith.constant 0 : index
    %c0_25 = arith.constant 0 : index
    %22 = vector.load %arg5[%c2_23, %c0_24, %c0_25] : memref<3x16x16xf32, #tpu.memory_space<vmem>>, vector<1x16x16xf32>
    %23 = vector.shape_cast %22 : vector<1x16x16xf32> to vector<16x16xf32>
    %cst_26 = arith.constant dense<0.000000e+00> : vector<30x16xf32>
    %24 = tpu.matmul %21, %23, %cst_26 {dimension_numbers = #tpu.dot_dimension_numbers<[1], [0], [0], [1], [0, 0, 1, 1], [], []>} : vector<30x16xf32>, vector<16x16xf32>, vector<30x16xf32> -> vector<30x16xf32>
    %25 = arith.addf %18, %24 : vector<30x16xf32>
    %c0_27 = arith.constant 0 : index
    %c0_28 = arith.constant 0 : index
    %26 = vector.load %arg6[%c0_27, %c0_28] : memref<1x16xf32, #tpu.memory_space<vmem>>, vector<1x16xf32>
    %27 = vector.broadcast %26 : vector<1x16xf32> to vector<30x16xf32>
    %28 = arith.addf %25, %27 : vector<30x16xf32>
    %cst_29 = arith.constant 0.000000e+00 : f32
    %29 = vector.broadcast %cst_29 : f32 to vector<30x16xf32>
    %30 = arith.maximumf %28, %29 : vector<30x16xf32>
    %c0_30 = arith.constant 0 : index
    %c0_31 = arith.constant 0 : index
    %c0_32 = arith.constant 0 : index
    %31 = vector.load %arg7[%c0_30, %c0_31, %c0_32] : memref<3x6x30xf32, #tpu.memory_space<vmem>>, vector<1x6x30xf32>
    %32 = vector.shape_cast %31 : vector<1x6x30xf32> to vector<6x30xf32>
    %cst_33 = arith.constant dense<0.000000e+00> : vector<6x16xf32>
    %33 = tpu.matmul %32, %30, %cst_33 {dimension_numbers = #tpu.dot_dimension_numbers<[1], [0], [0], [1], [0, 0, 1, 1], [], []>} : vector<6x30xf32>, vector<30x16xf32>, vector<6x16xf32> -> vector<6x16xf32>
    %c0_34 = arith.constant 0 : index
    %c0_35 = arith.constant 0 : index
    %c0_36 = arith.constant 0 : index
    %34 = vector.load %arg8[%c0_34, %c0_35, %c0_36] : memref<3x16x16xf32, #tpu.memory_space<vmem>>, vector<1x16x16xf32>
    %35 = vector.shape_cast %34 : vector<1x16x16xf32> to vector<16x16xf32>
    %cst_37 = arith.constant dense<0.000000e+00> : vector<6x16xf32>
    %36 = tpu.matmul %33, %35, %cst_37 {dimension_numbers = #tpu.dot_dimension_numbers<[1], [0], [0], [1], [0, 0, 1, 1], [], []>} : vector<6x16xf32>, vector<16x16xf32>, vector<6x16xf32> -> vector<6x16xf32>
    %c1_38 = arith.constant 1 : index
    %c0_39 = arith.constant 0 : index
    %c0_40 = arith.constant 0 : index
    %37 = vector.load %arg7[%c1_38, %c0_39, %c0_40] : memref<3x6x30xf32, #tpu.memory_space<vmem>>, vector<1x6x30xf32>
    %38 = vector.shape_cast %37 : vector<1x6x30xf32> to vector<6x30xf32>
    %cst_41 = arith.constant dense<0.000000e+00> : vector<6x16xf32>
    %39 = tpu.matmul %38, %30, %cst_41 {dimension_numbers = #tpu.dot_dimension_numbers<[1], [0], [0], [1], [0, 0, 1, 1], [], []>} : vector<6x30xf32>, vector<30x16xf32>, vector<6x16xf32> -> vector<6x16xf32>
    %c1_42 = arith.constant 1 : index
    %c0_43 = arith.constant 0 : index
    %c0_44 = arith.constant 0 : index
    %40 = vector.load %arg8[%c1_42, %c0_43, %c0_44] : memref<3x16x16xf32, #tpu.memory_space<vmem>>, vector<1x16x16xf32>
    %41 = vector.shape_cast %40 : vector<1x16x16xf32> to vector<16x16xf32>
    %cst_45 = arith.constant dense<0.000000e+00> : vector<6x16xf32>
    %42 = tpu.matmul %39, %41, %cst_45 {dimension_numbers = #tpu.dot_dimension_numbers<[1], [0], [0], [1], [0, 0, 1, 1], [], []>} : vector<6x16xf32>, vector<16x16xf32>, vector<6x16xf32> -> vector<6x16xf32>
    %43 = arith.addf %36, %42 : vector<6x16xf32>
    %c2_46 = arith.constant 2 : index
    %c0_47 = arith.constant 0 : index
    %c0_48 = arith.constant 0 : index
    %44 = vector.load %arg7[%c2_46, %c0_47, %c0_48] : memref<3x6x30xf32, #tpu.memory_space<vmem>>, vector<1x6x30xf32>
    %45 = vector.shape_cast %44 : vector<1x6x30xf32> to vector<6x30xf32>
    %cst_49 = arith.constant dense<0.000000e+00> : vector<6x16xf32>
    %46 = tpu.matmul %45, %30, %cst_49 {dimension_numbers = #tpu.dot_dimension_numbers<[1], [0], [0], [1], [0, 0, 1, 1], [], []>} : vector<6x30xf32>, vector<30x16xf32>, vector<6x16xf32> -> vector<6x16xf32>
    %c2_50 = arith.constant 2 : index
    %c0_51 = arith.constant 0 : index
    %c0_52 = arith.constant 0 : index
    %47 = vector.load %arg8[%c2_50, %c0_51, %c0_52] : memref<3x16x16xf32, #tpu.memory_space<vmem>>, vector<1x16x16xf32>
    %48 = vector.shape_cast %47 : vector<1x16x16xf32> to vector<16x16xf32>
    %cst_53 = arith.constant dense<0.000000e+00> : vector<6x16xf32>
    %49 = tpu.matmul %46, %48, %cst_53 {dimension_numbers = #tpu.dot_dimension_numbers<[1], [0], [0], [1], [0, 0, 1, 1], [], []>} : vector<6x16xf32>, vector<16x16xf32>, vector<6x16xf32> -> vector<6x16xf32>
    %50 = arith.addf %43, %49 : vector<6x16xf32>
    %c0_54 = arith.constant 0 : index
    %c0_55 = arith.constant 0 : index
    %51 = vector.load %arg9[%c0_54, %c0_55] : memref<1x16xf32, #tpu.memory_space<vmem>>, vector<1x16xf32>
    %52 = vector.broadcast %51 : vector<1x16xf32> to vector<6x16xf32>
    %53 = arith.addf %50, %52 : vector<6x16xf32>
    %cst_56 = arith.constant 0.000000e+00 : f32
    %54 = vector.broadcast %cst_56 : f32 to vector<6x16xf32>
    %55 = arith.maximumf %53, %54 : vector<6x16xf32>
    %c0_57 = arith.constant 0 : index
    %c0_58 = arith.constant 0 : index
    %56 = vector.load %arg10[%c0_57, %c0_58] : memref<2x6xf32, #tpu.memory_space<vmem>>, vector<2x6xf32>
    %cst_59 = arith.constant dense<0.000000e+00> : vector<2x16xf32>
    %57 = tpu.matmul %56, %55, %cst_59 {dimension_numbers = #tpu.dot_dimension_numbers<[1], [0], [0], [1], [0, 0, 1, 1], [], []>} : vector<2x6xf32>, vector<6x16xf32>, vector<2x16xf32> -> vector<2x16xf32>
    %c0_60 = arith.constant 0 : index
    %c0_61 = arith.constant 0 : index
    %58 = vector.load %arg12[%c0_60, %c0_61] : memref<1x16xf32, #tpu.memory_space<vmem>>, vector<1x16xf32>
    %59 = vector.broadcast %58 : vector<1x16xf32> to vector<2x16xf32>
    %60 = arith.mulf %57, %59 : vector<2x16xf32>
    %cst_62 = arith.constant dense<0.000000e+00> : vector<2xf32>
    %61 = vector.multi_reduction <add>, %60, %cst_62 [1] : vector<2x16xf32> to vector<2xf32>
    %62 = vector.shape_cast %61 : vector<2xf32> to vector<2x1xf32>
    %cst_63 = arith.constant 0.000000e+00 : f32
    %63 = vector.broadcast %cst_63 : f32 to vector<2x1xf32>
    %64 = arith.maximumf %62, %63 : vector<2x1xf32>
    %cst_64 = arith.constant 0.000000e+00 : f32
    %65 = vector.broadcast %cst_64 : f32 to vector<2x1xf32>
    %66 = arith.subf %65, %64 : vector<2x1xf32>
    %c0_65 = arith.constant 0 : index
    %c0_66 = arith.constant 0 : index
    %67 = vector.load %arg13[%c0_65, %c0_66] : memref<1x16xf32, #tpu.memory_space<vmem>>, vector<1x16xf32>
    %68 = vector.broadcast %66 : vector<2x1xf32> to vector<2x16xf32>
    %69 = vector.broadcast %67 : vector<1x16xf32> to vector<2x16xf32>
    %70 = arith.mulf %68, %69 : vector<2x16xf32>
    %71 = math.exp %70 : vector<2x16xf32>
    %cst_67 = arith.constant 1.000000e+00 : f32
    %72 = vector.broadcast %cst_67 : f32 to vector<2x16xf32>
    %73 = arith.addf %72, %71 : vector<2x16xf32>
    %cst_68 = arith.constant 1.000000e+00 : f32
    %74 = vector.broadcast %cst_68 : f32 to vector<2x16xf32>
    %75 = arith.divf %74, %73 : vector<2x16xf32>
    %c0_69 = arith.constant 0 : index
    %c0_70 = arith.constant 0 : index
    %76 = vector.load %arg11[%c0_69, %c0_70] : memref<6x2xf32, #tpu.memory_space<vmem>>, vector<6x2xf32>
    %cst_71 = arith.constant dense<0.000000e+00> : vector<6x16xf32>
    %77 = tpu.matmul %76, %75, %cst_71 {dimension_numbers = #tpu.dot_dimension_numbers<[1], [0], [0], [1], [0, 0, 1, 1], [], []>} : vector<6x2xf32>, vector<2x16xf32>, vector<6x16xf32> -> vector<6x16xf32>
    %78 = arith.mulf %55, %77 : vector<6x16xf32>
    %c0_72 = arith.constant 0 : index
    %c0_73 = arith.constant 0 : index
    %79 = vector.load %arg14[%c0_72, %c0_73] : memref<2x80xf32, #tpu.memory_space<vmem>>, vector<2x80xf32>
    %c0_74 = arith.constant 0 : index
    %c0_75 = arith.constant 0 : index
    %80 = vector.load %arg15[%c0_74, %c0_75] : memref<80x16xf32, #tpu.memory_space<vmem>>, vector<80x16xf32>
    %cst_76 = arith.constant dense<0.000000e+00> : vector<2x16xf32>
    %81 = tpu.matmul %79, %80, %cst_76 {dimension_numbers = #tpu.dot_dimension_numbers<[1], [0], [0], [1], [0, 0, 1, 1], [], []>} : vector<2x80xf32>, vector<80x16xf32>, vector<2x16xf32> -> vector<2x16xf32>
    %c0_77 = arith.constant 0 : index
    %c0_78 = arith.constant 0 : index
    %82 = vector.load %arg16[%c0_77, %c0_78] : memref<1x16xf32, #tpu.memory_space<vmem>>, vector<1x16xf32>
    %83 = vector.broadcast %82 : vector<1x16xf32> to vector<2x16xf32>
    %84 = arith.addf %81, %83 : vector<2x16xf32>
    %cst_79 = arith.constant 0.000000e+00 : f32
    %85 = vector.broadcast %cst_79 : f32 to vector<2x16xf32>
    %86 = arith.maximumf %84, %85 : vector<2x16xf32>
    %c0_80 = arith.constant 0 : index
    %c0_81 = arith.constant 0 : index
    %87 = vector.load %arg17[%c0_80, %c0_81] : memref<1x16xf32, #tpu.memory_space<vmem>>, vector<1x16xf32>
    %88 = vector.broadcast %87 : vector<1x16xf32> to vector<2x16xf32>
    %89 = arith.mulf %86, %88 : vector<2x16xf32>
    %cst_82 = arith.constant dense<0.000000e+00> : vector<2xf32>
    %90 = vector.multi_reduction <add>, %89, %cst_82 [1] : vector<2x16xf32> to vector<2xf32>
    %91 = vector.shape_cast %90 : vector<2xf32> to vector<2x1xf32>
    %cst_83 = arith.constant 0.000000e+00 : f32
    %92 = vector.broadcast %cst_83 : f32 to vector<2x1xf32>
    %93 = arith.maximumf %91, %92 : vector<2x1xf32>
    %cst_84 = arith.constant 0.000000e+00 : f32
    %94 = vector.broadcast %cst_84 : f32 to vector<2x1xf32>
    %95 = arith.subf %94, %93 : vector<2x1xf32>
    %c0_85 = arith.constant 0 : index
    %c0_86 = arith.constant 0 : index
    %96 = vector.load %arg18[%c0_85, %c0_86] : memref<1x16xf32, #tpu.memory_space<vmem>>, vector<1x16xf32>
    %97 = vector.broadcast %95 : vector<2x1xf32> to vector<2x16xf32>
    %98 = vector.broadcast %96 : vector<1x16xf32> to vector<2x16xf32>
    %99 = arith.mulf %97, %98 : vector<2x16xf32>
    %100 = math.exp %99 : vector<2x16xf32>
    %cst_87 = arith.constant 1.000000e+00 : f32
    %101 = vector.broadcast %cst_87 : f32 to vector<2x16xf32>
    %102 = arith.addf %101, %100 : vector<2x16xf32>
    %cst_88 = arith.constant 1.000000e+00 : f32
    %103 = vector.broadcast %cst_88 : f32 to vector<2x16xf32>
    %104 = arith.divf %103, %102 : vector<2x16xf32>
    %105 = arith.mulf %86, %104 : vector<2x16xf32>
    %c0_89 = arith.constant 0 : index
    %c0_90 = arith.constant 0 : index
    %106 = vector.load %arg19[%c0_89, %c0_90] : memref<280x200xf32, #tpu.memory_space<vmem>>, vector<280x200xf32>
    %c0_91 = arith.constant 0 : index
    %c0_92 = arith.constant 0 : index
    %107 = vector.load %arg20[%c0_91, %c0_92] : memref<200x16xf32, #tpu.memory_space<vmem>>, vector<200x16xf32>
    %cst_93 = arith.constant dense<0.000000e+00> : vector<280x16xf32>
    %108 = tpu.matmul %106, %107, %cst_93 {dimension_numbers = #tpu.dot_dimension_numbers<[1], [0], [0], [1], [0, 0, 1, 1], [], []>} : vector<280x200xf32>, vector<200x16xf32>, vector<280x16xf32> -> vector<280x16xf32>
    %c0_94 = arith.constant 0 : index
    %c0_95 = arith.constant 0 : index
    %109 = vector.load %arg21[%c0_94, %c0_95] : memref<1x16xf32, #tpu.memory_space<vmem>>, vector<1x16xf32>
    %110 = vector.broadcast %109 : vector<1x16xf32> to vector<280x16xf32>
    %111 = arith.addf %108, %110 : vector<280x16xf32>
    %c0_96 = arith.constant 0 : index
    %c0_97 = arith.constant 0 : index
    %c0_98 = arith.constant 0 : index
    %112 = vector.load %arg22[%c0_96, %c0_97, %c0_98] : memref<9x10x280xf32, #tpu.memory_space<vmem>>, vector<1x10x280xf32>
    %113 = vector.shape_cast %112 : vector<1x10x280xf32> to vector<10x280xf32>
    %cst_99 = arith.constant dense<0.000000e+00> : vector<10x16xf32>
    %114 = tpu.matmul %113, %111, %cst_99 {dimension_numbers = #tpu.dot_dimension_numbers<[1], [0], [0], [1], [0, 0, 1, 1], [], []>} : vector<10x280xf32>, vector<280x16xf32>, vector<10x16xf32> -> vector<10x16xf32>
    %c0_100 = arith.constant 0 : index
    %c0_101 = arith.constant 0 : index
    %c0_102 = arith.constant 0 : index
    %115 = vector.load %arg23[%c0_100, %c0_101, %c0_102] : memref<9x16x16xf32, #tpu.memory_space<vmem>>, vector<1x16x16xf32>
    %116 = vector.shape_cast %115 : vector<1x16x16xf32> to vector<16x16xf32>
    %cst_103 = arith.constant dense<0.000000e+00> : vector<10x16xf32>
    %117 = tpu.matmul %114, %116, %cst_103 {dimension_numbers = #tpu.dot_dimension_numbers<[1], [0], [0], [1], [0, 0, 1, 1], [], []>} : vector<10x16xf32>, vector<16x16xf32>, vector<10x16xf32> -> vector<10x16xf32>
    %c1_104 = arith.constant 1 : index
    %c0_105 = arith.constant 0 : index
    %c0_106 = arith.constant 0 : index
    %118 = vector.load %arg22[%c1_104, %c0_105, %c0_106] : memref<9x10x280xf32, #tpu.memory_space<vmem>>, vector<1x10x280xf32>
    %119 = vector.shape_cast %118 : vector<1x10x280xf32> to vector<10x280xf32>
    %cst_107 = arith.constant dense<0.000000e+00> : vector<10x16xf32>
    %120 = tpu.matmul %119, %111, %cst_107 {dimension_numbers = #tpu.dot_dimension_numbers<[1], [0], [0], [1], [0, 0, 1, 1], [], []>} : vector<10x280xf32>, vector<280x16xf32>, vector<10x16xf32> -> vector<10x16xf32>
    %c1_108 = arith.constant 1 : index
    %c0_109 = arith.constant 0 : index
    %c0_110 = arith.constant 0 : index
    %121 = vector.load %arg23[%c1_108, %c0_109, %c0_110] : memref<9x16x16xf32, #tpu.memory_space<vmem>>, vector<1x16x16xf32>
    %122 = vector.shape_cast %121 : vector<1x16x16xf32> to vector<16x16xf32>
    %cst_111 = arith.constant dense<0.000000e+00> : vector<10x16xf32>
    %123 = tpu.matmul %120, %122, %cst_111 {dimension_numbers = #tpu.dot_dimension_numbers<[1], [0], [0], [1], [0, 0, 1, 1], [], []>} : vector<10x16xf32>, vector<16x16xf32>, vector<10x16xf32> -> vector<10x16xf32>
    %124 = arith.addf %117, %123 : vector<10x16xf32>
    %c2_112 = arith.constant 2 : index
    %c0_113 = arith.constant 0 : index
    %c0_114 = arith.constant 0 : index
    %125 = vector.load %arg22[%c2_112, %c0_113, %c0_114] : memref<9x10x280xf32, #tpu.memory_space<vmem>>, vector<1x10x280xf32>
    %126 = vector.shape_cast %125 : vector<1x10x280xf32> to vector<10x280xf32>
    %cst_115 = arith.constant dense<0.000000e+00> : vector<10x16xf32>
    %127 = tpu.matmul %126, %111, %cst_115 {dimension_numbers = #tpu.dot_dimension_numbers<[1], [0], [0], [1], [0, 0, 1, 1], [], []>} : vector<10x280xf32>, vector<280x16xf32>, vector<10x16xf32> -> vector<10x16xf32>
    %c2_116 = arith.constant 2 : index
    %c0_117 = arith.constant 0 : index
    %c0_118 = arith.constant 0 : index
    %128 = vector.load %arg23[%c2_116, %c0_117, %c0_118] : memref<9x16x16xf32, #tpu.memory_space<vmem>>, vector<1x16x16xf32>
    %129 = vector.shape_cast %128 : vector<1x16x16xf32> to vector<16x16xf32>
    %cst_119 = arith.constant dense<0.000000e+00> : vector<10x16xf32>
    %130 = tpu.matmul %127, %129, %cst_119 {dimension_numbers = #tpu.dot_dimension_numbers<[1], [0], [0], [1], [0, 0, 1, 1], [], []>} : vector<10x16xf32>, vector<16x16xf32>, vector<10x16xf32> -> vector<10x16xf32>
    %131 = arith.addf %124, %130 : vector<10x16xf32>
    %c3 = arith.constant 3 : index
    %c0_120 = arith.constant 0 : index
    %c0_121 = arith.constant 0 : index
    %132 = vector.load %arg22[%c3, %c0_120, %c0_121] : memref<9x10x280xf32, #tpu.memory_space<vmem>>, vector<1x10x280xf32>
    %133 = vector.shape_cast %132 : vector<1x10x280xf32> to vector<10x280xf32>
    %cst_122 = arith.constant dense<0.000000e+00> : vector<10x16xf32>
    %134 = tpu.matmul %133, %111, %cst_122 {dimension_numbers = #tpu.dot_dimension_numbers<[1], [0], [0], [1], [0, 0, 1, 1], [], []>} : vector<10x280xf32>, vector<280x16xf32>, vector<10x16xf32> -> vector<10x16xf32>
    %c3_123 = arith.constant 3 : index
    %c0_124 = arith.constant 0 : index
    %c0_125 = arith.constant 0 : index
    %135 = vector.load %arg23[%c3_123, %c0_124, %c0_125] : memref<9x16x16xf32, #tpu.memory_space<vmem>>, vector<1x16x16xf32>
    %136 = vector.shape_cast %135 : vector<1x16x16xf32> to vector<16x16xf32>
    %cst_126 = arith.constant dense<0.000000e+00> : vector<10x16xf32>
    %137 = tpu.matmul %134, %136, %cst_126 {dimension_numbers = #tpu.dot_dimension_numbers<[1], [0], [0], [1], [0, 0, 1, 1], [], []>} : vector<10x16xf32>, vector<16x16xf32>, vector<10x16xf32> -> vector<10x16xf32>
    %138 = arith.addf %131, %137 : vector<10x16xf32>
    %c4 = arith.constant 4 : index
    %c0_127 = arith.constant 0 : index
    %c0_128 = arith.constant 0 : index
    %139 = vector.load %arg22[%c4, %c0_127, %c0_128] : memref<9x10x280xf32, #tpu.memory_space<vmem>>, vector<1x10x280xf32>
    %140 = vector.shape_cast %139 : vector<1x10x280xf32> to vector<10x280xf32>
    %cst_129 = arith.constant dense<0.000000e+00> : vector<10x16xf32>
    %141 = tpu.matmul %140, %111, %cst_129 {dimension_numbers = #tpu.dot_dimension_numbers<[1], [0], [0], [1], [0, 0, 1, 1], [], []>} : vector<10x280xf32>, vector<280x16xf32>, vector<10x16xf32> -> vector<10x16xf32>
    %c4_130 = arith.constant 4 : index
    %c0_131 = arith.constant 0 : index
    %c0_132 = arith.constant 0 : index
    %142 = vector.load %arg23[%c4_130, %c0_131, %c0_132] : memref<9x16x16xf32, #tpu.memory_space<vmem>>, vector<1x16x16xf32>
    %143 = vector.shape_cast %142 : vector<1x16x16xf32> to vector<16x16xf32>
    %cst_133 = arith.constant dense<0.000000e+00> : vector<10x16xf32>
    %144 = tpu.matmul %141, %143, %cst_133 {dimension_numbers = #tpu.dot_dimension_numbers<[1], [0], [0], [1], [0, 0, 1, 1], [], []>} : vector<10x16xf32>, vector<16x16xf32>, vector<10x16xf32> -> vector<10x16xf32>
    %145 = arith.addf %138, %144 : vector<10x16xf32>
    %c5 = arith.constant 5 : index
    %c0_134 = arith.constant 0 : index
    %c0_135 = arith.constant 0 : index
    %146 = vector.load %arg22[%c5, %c0_134, %c0_135] : memref<9x10x280xf32, #tpu.memory_space<vmem>>, vector<1x10x280xf32>
    %147 = vector.shape_cast %146 : vector<1x10x280xf32> to vector<10x280xf32>
    %cst_136 = arith.constant dense<0.000000e+00> : vector<10x16xf32>
    %148 = tpu.matmul %147, %111, %cst_136 {dimension_numbers = #tpu.dot_dimension_numbers<[1], [0], [0], [1], [0, 0, 1, 1], [], []>} : vector<10x280xf32>, vector<280x16xf32>, vector<10x16xf32> -> vector<10x16xf32>
    %c5_137 = arith.constant 5 : index
    %c0_138 = arith.constant 0 : index
    %c0_139 = arith.constant 0 : index
    %149 = vector.load %arg23[%c5_137, %c0_138, %c0_139] : memref<9x16x16xf32, #tpu.memory_space<vmem>>, vector<1x16x16xf32>
    %150 = vector.shape_cast %149 : vector<1x16x16xf32> to vector<16x16xf32>
    %cst_140 = arith.constant dense<0.000000e+00> : vector<10x16xf32>
    %151 = tpu.matmul %148, %150, %cst_140 {dimension_numbers = #tpu.dot_dimension_numbers<[1], [0], [0], [1], [0, 0, 1, 1], [], []>} : vector<10x16xf32>, vector<16x16xf32>, vector<10x16xf32> -> vector<10x16xf32>
    %152 = arith.addf %145, %151 : vector<10x16xf32>
    %c6 = arith.constant 6 : index
    %c0_141 = arith.constant 0 : index
    %c0_142 = arith.constant 0 : index
    %153 = vector.load %arg22[%c6, %c0_141, %c0_142] : memref<9x10x280xf32, #tpu.memory_space<vmem>>, vector<1x10x280xf32>
    %154 = vector.shape_cast %153 : vector<1x10x280xf32> to vector<10x280xf32>
    %cst_143 = arith.constant dense<0.000000e+00> : vector<10x16xf32>
    %155 = tpu.matmul %154, %111, %cst_143 {dimension_numbers = #tpu.dot_dimension_numbers<[1], [0], [0], [1], [0, 0, 1, 1], [], []>} : vector<10x280xf32>, vector<280x16xf32>, vector<10x16xf32> -> vector<10x16xf32>
    %c6_144 = arith.constant 6 : index
    %c0_145 = arith.constant 0 : index
    %c0_146 = arith.constant 0 : index
    %156 = vector.load %arg23[%c6_144, %c0_145, %c0_146] : memref<9x16x16xf32, #tpu.memory_space<vmem>>, vector<1x16x16xf32>
    %157 = vector.shape_cast %156 : vector<1x16x16xf32> to vector<16x16xf32>
    %cst_147 = arith.constant dense<0.000000e+00> : vector<10x16xf32>
    %158 = tpu.matmul %155, %157, %cst_147 {dimension_numbers = #tpu.dot_dimension_numbers<[1], [0], [0], [1], [0, 0, 1, 1], [], []>} : vector<10x16xf32>, vector<16x16xf32>, vector<10x16xf32> -> vector<10x16xf32>
    %159 = arith.addf %152, %158 : vector<10x16xf32>
    %c7 = arith.constant 7 : index
    %c0_148 = arith.constant 0 : index
    %c0_149 = arith.constant 0 : index
    %160 = vector.load %arg22[%c7, %c0_148, %c0_149] : memref<9x10x280xf32, #tpu.memory_space<vmem>>, vector<1x10x280xf32>
    %161 = vector.shape_cast %160 : vector<1x10x280xf32> to vector<10x280xf32>
    %cst_150 = arith.constant dense<0.000000e+00> : vector<10x16xf32>
    %162 = tpu.matmul %161, %111, %cst_150 {dimension_numbers = #tpu.dot_dimension_numbers<[1], [0], [0], [1], [0, 0, 1, 1], [], []>} : vector<10x280xf32>, vector<280x16xf32>, vector<10x16xf32> -> vector<10x16xf32>
    %c7_151 = arith.constant 7 : index
    %c0_152 = arith.constant 0 : index
    %c0_153 = arith.constant 0 : index
    %163 = vector.load %arg23[%c7_151, %c0_152, %c0_153] : memref<9x16x16xf32, #tpu.memory_space<vmem>>, vector<1x16x16xf32>
    %164 = vector.shape_cast %163 : vector<1x16x16xf32> to vector<16x16xf32>
    %cst_154 = arith.constant dense<0.000000e+00> : vector<10x16xf32>
    %165 = tpu.matmul %162, %164, %cst_154 {dimension_numbers = #tpu.dot_dimension_numbers<[1], [0], [0], [1], [0, 0, 1, 1], [], []>} : vector<10x16xf32>, vector<16x16xf32>, vector<10x16xf32> -> vector<10x16xf32>
    %166 = arith.addf %159, %165 : vector<10x16xf32>
    %c8 = arith.constant 8 : index
    %c0_155 = arith.constant 0 : index
    %c0_156 = arith.constant 0 : index
    %167 = vector.load %arg22[%c8, %c0_155, %c0_156] : memref<9x10x280xf32, #tpu.memory_space<vmem>>, vector<1x10x280xf32>
    %168 = vector.shape_cast %167 : vector<1x10x280xf32> to vector<10x280xf32>
    %cst_157 = arith.constant dense<0.000000e+00> : vector<10x16xf32>
    %169 = tpu.matmul %168, %111, %cst_157 {dimension_numbers = #tpu.dot_dimension_numbers<[1], [0], [0], [1], [0, 0, 1, 1], [], []>} : vector<10x280xf32>, vector<280x16xf32>, vector<10x16xf32> -> vector<10x16xf32>
    %c8_158 = arith.constant 8 : index
    %c0_159 = arith.constant 0 : index
    %c0_160 = arith.constant 0 : index
    %170 = vector.load %arg23[%c8_158, %c0_159, %c0_160] : memref<9x16x16xf32, #tpu.memory_space<vmem>>, vector<1x16x16xf32>
    %171 = vector.shape_cast %170 : vector<1x16x16xf32> to vector<16x16xf32>
    %cst_161 = arith.constant dense<0.000000e+00> : vector<10x16xf32>
    %172 = tpu.matmul %169, %171, %cst_161 {dimension_numbers = #tpu.dot_dimension_numbers<[1], [0], [0], [1], [0, 0, 1, 1], [], []>} : vector<10x16xf32>, vector<16x16xf32>, vector<10x16xf32> -> vector<10x16xf32>
    %173 = arith.addf %166, %172 : vector<10x16xf32>
    %c0_162 = arith.constant 0 : index
    %c0_163 = arith.constant 0 : index
    %174 = vector.load %arg24[%c0_162, %c0_163] : memref<1x16xf32, #tpu.memory_space<vmem>>, vector<1x16xf32>
    %175 = vector.broadcast %174 : vector<1x16xf32> to vector<10x16xf32>
    %176 = arith.addf %173, %175 : vector<10x16xf32>
    %c0_164 = arith.constant 0 : index
    %c0_165 = arith.constant 0 : index
    %c0_166 = arith.constant 0 : index
    %177 = vector.load %arg25[%c0_164, %c0_165, %c0_166] : memref<9x6x10xf32, #tpu.memory_space<vmem>>, vector<1x6x10xf32>
    %178 = vector.shape_cast %177 : vector<1x6x10xf32> to vector<6x10xf32>
    %cst_167 = arith.constant dense<0.000000e+00> : vector<6x16xf32>
    %179 = tpu.matmul %178, %176, %cst_167 {dimension_numbers = #tpu.dot_dimension_numbers<[1], [0], [0], [1], [0, 0, 1, 1], [], []>} : vector<6x10xf32>, vector<10x16xf32>, vector<6x16xf32> -> vector<6x16xf32>
    %c0_168 = arith.constant 0 : index
    %c0_169 = arith.constant 0 : index
    %c0_170 = arith.constant 0 : index
    %180 = vector.load %arg26[%c0_168, %c0_169, %c0_170] : memref<9x16x16xf32, #tpu.memory_space<vmem>>, vector<1x16x16xf32>
    %181 = vector.shape_cast %180 : vector<1x16x16xf32> to vector<16x16xf32>
    %cst_171 = arith.constant dense<0.000000e+00> : vector<6x16xf32>
    %182 = tpu.matmul %179, %181, %cst_171 {dimension_numbers = #tpu.dot_dimension_numbers<[1], [0], [0], [1], [0, 0, 1, 1], [], []>} : vector<6x16xf32>, vector<16x16xf32>, vector<6x16xf32> -> vector<6x16xf32>
    %c1_172 = arith.constant 1 : index
    %c0_173 = arith.constant 0 : index
    %c0_174 = arith.constant 0 : index
    %183 = vector.load %arg25[%c1_172, %c0_173, %c0_174] : memref<9x6x10xf32, #tpu.memory_space<vmem>>, vector<1x6x10xf32>
    %184 = vector.shape_cast %183 : vector<1x6x10xf32> to vector<6x10xf32>
    %cst_175 = arith.constant dense<0.000000e+00> : vector<6x16xf32>
    %185 = tpu.matmul %184, %176, %cst_175 {dimension_numbers = #tpu.dot_dimension_numbers<[1], [0], [0], [1], [0, 0, 1, 1], [], []>} : vector<6x10xf32>, vector<10x16xf32>, vector<6x16xf32> -> vector<6x16xf32>
    %c1_176 = arith.constant 1 : index
    %c0_177 = arith.constant 0 : index
    %c0_178 = arith.constant 0 : index
    %186 = vector.load %arg26[%c1_176, %c0_177, %c0_178] : memref<9x16x16xf32, #tpu.memory_space<vmem>>, vector<1x16x16xf32>
    %187 = vector.shape_cast %186 : vector<1x16x16xf32> to vector<16x16xf32>
    %cst_179 = arith.constant dense<0.000000e+00> : vector<6x16xf32>
    %188 = tpu.matmul %185, %187, %cst_179 {dimension_numbers = #tpu.dot_dimension_numbers<[1], [0], [0], [1], [0, 0, 1, 1], [], []>} : vector<6x16xf32>, vector<16x16xf32>, vector<6x16xf32> -> vector<6x16xf32>
    %189 = arith.addf %182, %188 : vector<6x16xf32>
    %c2_180 = arith.constant 2 : index
    %c0_181 = arith.constant 0 : index
    %c0_182 = arith.constant 0 : index
    %190 = vector.load %arg25[%c2_180, %c0_181, %c0_182] : memref<9x6x10xf32, #tpu.memory_space<vmem>>, vector<1x6x10xf32>
    %191 = vector.shape_cast %190 : vector<1x6x10xf32> to vector<6x10xf32>
    %cst_183 = arith.constant dense<0.000000e+00> : vector<6x16xf32>
    %192 = tpu.matmul %191, %176, %cst_183 {dimension_numbers = #tpu.dot_dimension_numbers<[1], [0], [0], [1], [0, 0, 1, 1], [], []>} : vector<6x10xf32>, vector<10x16xf32>, vector<6x16xf32> -> vector<6x16xf32>
    %c2_184 = arith.constant 2 : index
    %c0_185 = arith.constant 0 : index
    %c0_186 = arith.constant 0 : index
    %193 = vector.load %arg26[%c2_184, %c0_185, %c0_186] : memref<9x16x16xf32, #tpu.memory_space<vmem>>, vector<1x16x16xf32>
    %194 = vector.shape_cast %193 : vector<1x16x16xf32> to vector<16x16xf32>
    %cst_187 = arith.constant dense<0.000000e+00> : vector<6x16xf32>
    %195 = tpu.matmul %192, %194, %cst_187 {dimension_numbers = #tpu.dot_dimension_numbers<[1], [0], [0], [1], [0, 0, 1, 1], [], []>} : vector<6x16xf32>, vector<16x16xf32>, vector<6x16xf32> -> vector<6x16xf32>
    %196 = arith.addf %189, %195 : vector<6x16xf32>
    %c3_188 = arith.constant 3 : index
    %c0_189 = arith.constant 0 : index
    %c0_190 = arith.constant 0 : index
    %197 = vector.load %arg25[%c3_188, %c0_189, %c0_190] : memref<9x6x10xf32, #tpu.memory_space<vmem>>, vector<1x6x10xf32>
    %198 = vector.shape_cast %197 : vector<1x6x10xf32> to vector<6x10xf32>
    %cst_191 = arith.constant dense<0.000000e+00> : vector<6x16xf32>
    %199 = tpu.matmul %198, %176, %cst_191 {dimension_numbers = #tpu.dot_dimension_numbers<[1], [0], [0], [1], [0, 0, 1, 1], [], []>} : vector<6x10xf32>, vector<10x16xf32>, vector<6x16xf32> -> vector<6x16xf32>
    %c3_192 = arith.constant 3 : index
    %c0_193 = arith.constant 0 : index
    %c0_194 = arith.constant 0 : index
    %200 = vector.load %arg26[%c3_192, %c0_193, %c0_194] : memref<9x16x16xf32, #tpu.memory_space<vmem>>, vector<1x16x16xf32>
    %201 = vector.shape_cast %200 : vector<1x16x16xf32> to vector<16x16xf32>
    %cst_195 = arith.constant dense<0.000000e+00> : vector<6x16xf32>
    %202 = tpu.matmul %199, %201, %cst_195 {dimension_numbers = #tpu.dot_dimension_numbers<[1], [0], [0], [1], [0, 0, 1, 1], [], []>} : vector<6x16xf32>, vector<16x16xf32>, vector<6x16xf32> -> vector<6x16xf32>
    %203 = arith.addf %196, %202 : vector<6x16xf32>
    %c4_196 = arith.constant 4 : index
    %c0_197 = arith.constant 0 : index
    %c0_198 = arith.constant 0 : index
    %204 = vector.load %arg25[%c4_196, %c0_197, %c0_198] : memref<9x6x10xf32, #tpu.memory_space<vmem>>, vector<1x6x10xf32>
    %205 = vector.shape_cast %204 : vector<1x6x10xf32> to vector<6x10xf32>
    %cst_199 = arith.constant dense<0.000000e+00> : vector<6x16xf32>
    %206 = tpu.matmul %205, %176, %cst_199 {dimension_numbers = #tpu.dot_dimension_numbers<[1], [0], [0], [1], [0, 0, 1, 1], [], []>} : vector<6x10xf32>, vector<10x16xf32>, vector<6x16xf32> -> vector<6x16xf32>
    %c4_200 = arith.constant 4 : index
    %c0_201 = arith.constant 0 : index
    %c0_202 = arith.constant 0 : index
    %207 = vector.load %arg26[%c4_200, %c0_201, %c0_202] : memref<9x16x16xf32, #tpu.memory_space<vmem>>, vector<1x16x16xf32>
    %208 = vector.shape_cast %207 : vector<1x16x16xf32> to vector<16x16xf32>
    %cst_203 = arith.constant dense<0.000000e+00> : vector<6x16xf32>
    %209 = tpu.matmul %206, %208, %cst_203 {dimension_numbers = #tpu.dot_dimension_numbers<[1], [0], [0], [1], [0, 0, 1, 1], [], []>} : vector<6x16xf32>, vector<16x16xf32>, vector<6x16xf32> -> vector<6x16xf32>
    %210 = arith.addf %203, %209 : vector<6x16xf32>
    %c5_204 = arith.constant 5 : index
    %c0_205 = arith.constant 0 : index
    %c0_206 = arith.constant 0 : index
    %211 = vector.load %arg25[%c5_204, %c0_205, %c0_206] : memref<9x6x10xf32, #tpu.memory_space<vmem>>, vector<1x6x10xf32>
    %212 = vector.shape_cast %211 : vector<1x6x10xf32> to vector<6x10xf32>
    %cst_207 = arith.constant dense<0.000000e+00> : vector<6x16xf32>
    %213 = tpu.matmul %212, %176, %cst_207 {dimension_numbers = #tpu.dot_dimension_numbers<[1], [0], [0], [1], [0, 0, 1, 1], [], []>} : vector<6x10xf32>, vector<10x16xf32>, vector<6x16xf32> -> vector<6x16xf32>
    %c5_208 = arith.constant 5 : index
    %c0_209 = arith.constant 0 : index
    %c0_210 = arith.constant 0 : index
    %214 = vector.load %arg26[%c5_208, %c0_209, %c0_210] : memref<9x16x16xf32, #tpu.memory_space<vmem>>, vector<1x16x16xf32>
    %215 = vector.shape_cast %214 : vector<1x16x16xf32> to vector<16x16xf32>
    %cst_211 = arith.constant dense<0.000000e+00> : vector<6x16xf32>
    %216 = tpu.matmul %213, %215, %cst_211 {dimension_numbers = #tpu.dot_dimension_numbers<[1], [0], [0], [1], [0, 0, 1, 1], [], []>} : vector<6x16xf32>, vector<16x16xf32>, vector<6x16xf32> -> vector<6x16xf32>
    %217 = arith.addf %210, %216 : vector<6x16xf32>
    %c6_212 = arith.constant 6 : index
    %c0_213 = arith.constant 0 : index
    %c0_214 = arith.constant 0 : index
    %218 = vector.load %arg25[%c6_212, %c0_213, %c0_214] : memref<9x6x10xf32, #tpu.memory_space<vmem>>, vector<1x6x10xf32>
    %219 = vector.shape_cast %218 : vector<1x6x10xf32> to vector<6x10xf32>
    %cst_215 = arith.constant dense<0.000000e+00> : vector<6x16xf32>
    %220 = tpu.matmul %219, %176, %cst_215 {dimension_numbers = #tpu.dot_dimension_numbers<[1], [0], [0], [1], [0, 0, 1, 1], [], []>} : vector<6x10xf32>, vector<10x16xf32>, vector<6x16xf32> -> vector<6x16xf32>
    %c6_216 = arith.constant 6 : index
    %c0_217 = arith.constant 0 : index
    %c0_218 = arith.constant 0 : index
    %221 = vector.load %arg26[%c6_216, %c0_217, %c0_218] : memref<9x16x16xf32, #tpu.memory_space<vmem>>, vector<1x16x16xf32>
    %222 = vector.shape_cast %221 : vector<1x16x16xf32> to vector<16x16xf32>
    %cst_219 = arith.constant dense<0.000000e+00> : vector<6x16xf32>
    %223 = tpu.matmul %220, %222, %cst_219 {dimension_numbers = #tpu.dot_dimension_numbers<[1], [0], [0], [1], [0, 0, 1, 1], [], []>} : vector<6x16xf32>, vector<16x16xf32>, vector<6x16xf32> -> vector<6x16xf32>
    %224 = arith.addf %217, %223 : vector<6x16xf32>
    %c7_220 = arith.constant 7 : index
    %c0_221 = arith.constant 0 : index
    %c0_222 = arith.constant 0 : index
    %225 = vector.load %arg25[%c7_220, %c0_221, %c0_222] : memref<9x6x10xf32, #tpu.memory_space<vmem>>, vector<1x6x10xf32>
    %226 = vector.shape_cast %225 : vector<1x6x10xf32> to vector<6x10xf32>
    %cst_223 = arith.constant dense<0.000000e+00> : vector<6x16xf32>
    %227 = tpu.matmul %226, %176, %cst_223 {dimension_numbers = #tpu.dot_dimension_numbers<[1], [0], [0], [1], [0, 0, 1, 1], [], []>} : vector<6x10xf32>, vector<10x16xf32>, vector<6x16xf32> -> vector<6x16xf32>
    %c7_224 = arith.constant 7 : index
    %c0_225 = arith.constant 0 : index
    %c0_226 = arith.constant 0 : index
    %228 = vector.load %arg26[%c7_224, %c0_225, %c0_226] : memref<9x16x16xf32, #tpu.memory_space<vmem>>, vector<1x16x16xf32>
    %229 = vector.shape_cast %228 : vector<1x16x16xf32> to vector<16x16xf32>
    %cst_227 = arith.constant dense<0.000000e+00> : vector<6x16xf32>
    %230 = tpu.matmul %227, %229, %cst_227 {dimension_numbers = #tpu.dot_dimension_numbers<[1], [0], [0], [1], [0, 0, 1, 1], [], []>} : vector<6x16xf32>, vector<16x16xf32>, vector<6x16xf32> -> vector<6x16xf32>
    %231 = arith.addf %224, %230 : vector<6x16xf32>
    %c8_228 = arith.constant 8 : index
    %c0_229 = arith.constant 0 : index
    %c0_230 = arith.constant 0 : index
    %232 = vector.load %arg25[%c8_228, %c0_229, %c0_230] : memref<9x6x10xf32, #tpu.memory_space<vmem>>, vector<1x6x10xf32>
    %233 = vector.shape_cast %232 : vector<1x6x10xf32> to vector<6x10xf32>
    %cst_231 = arith.constant dense<0.000000e+00> : vector<6x16xf32>
    %234 = tpu.matmul %233, %176, %cst_231 {dimension_numbers = #tpu.dot_dimension_numbers<[1], [0], [0], [1], [0, 0, 1, 1], [], []>} : vector<6x10xf32>, vector<10x16xf32>, vector<6x16xf32> -> vector<6x16xf32>
    %c8_232 = arith.constant 8 : index
    %c0_233 = arith.constant 0 : index
    %c0_234 = arith.constant 0 : index
    %235 = vector.load %arg26[%c8_232, %c0_233, %c0_234] : memref<9x16x16xf32, #tpu.memory_space<vmem>>, vector<1x16x16xf32>
    %236 = vector.shape_cast %235 : vector<1x16x16xf32> to vector<16x16xf32>
    %cst_235 = arith.constant dense<0.000000e+00> : vector<6x16xf32>
    %237 = tpu.matmul %234, %236, %cst_235 {dimension_numbers = #tpu.dot_dimension_numbers<[1], [0], [0], [1], [0, 0, 1, 1], [], []>} : vector<6x16xf32>, vector<16x16xf32>, vector<6x16xf32> -> vector<6x16xf32>
    %238 = arith.addf %231, %237 : vector<6x16xf32>
    %c0_236 = arith.constant 0 : index
    %c0_237 = arith.constant 0 : index
    %239 = vector.load %arg27[%c0_236, %c0_237] : memref<1x16xf32, #tpu.memory_space<vmem>>, vector<1x16xf32>
    %240 = vector.broadcast %239 : vector<1x16xf32> to vector<6x16xf32>
    %241 = arith.addf %238, %240 : vector<6x16xf32>
    %cst_238 = arith.constant 0.000000e+00 : f32
    %242 = vector.broadcast %cst_238 : f32 to vector<6x16xf32>
    %243 = arith.maximumf %241, %242 : vector<6x16xf32>
    %c0_239 = arith.constant 0 : index
    %c0_240 = arith.constant 0 : index
    %c0_241 = arith.constant 0 : index
    %244 = vector.load %arg28[%c0_239, %c0_240, %c0_241] : memref<9x4x6xf32, #tpu.memory_space<vmem>>, vector<1x4x6xf32>
    %245 = vector.shape_cast %244 : vector<1x4x6xf32> to vector<4x6xf32>
    %cst_242 = arith.constant dense<0.000000e+00> : vector<4x16xf32>
    %246 = tpu.matmul %245, %243, %cst_242 {dimension_numbers = #tpu.dot_dimension_numbers<[1], [0], [0], [1], [0, 0, 1, 1], [], []>} : vector<4x6xf32>, vector<6x16xf32>, vector<4x16xf32> -> vector<4x16xf32>
    %c0_243 = arith.constant 0 : index
    %c0_244 = arith.constant 0 : index
    %c0_245 = arith.constant 0 : index
    %247 = vector.load %arg29[%c0_243, %c0_244, %c0_245] : memref<9x16x16xf32, #tpu.memory_space<vmem>>, vector<1x16x16xf32>
    %248 = vector.shape_cast %247 : vector<1x16x16xf32> to vector<16x16xf32>
    %cst_246 = arith.constant dense<0.000000e+00> : vector<4x16xf32>
    %249 = tpu.matmul %246, %248, %cst_246 {dimension_numbers = #tpu.dot_dimension_numbers<[1], [0], [0], [1], [0, 0, 1, 1], [], []>} : vector<4x16xf32>, vector<16x16xf32>, vector<4x16xf32> -> vector<4x16xf32>
    %c1_247 = arith.constant 1 : index
    %c0_248 = arith.constant 0 : index
    %c0_249 = arith.constant 0 : index
    %250 = vector.load %arg28[%c1_247, %c0_248, %c0_249] : memref<9x4x6xf32, #tpu.memory_space<vmem>>, vector<1x4x6xf32>
    %251 = vector.shape_cast %250 : vector<1x4x6xf32> to vector<4x6xf32>
    %cst_250 = arith.constant dense<0.000000e+00> : vector<4x16xf32>
    %252 = tpu.matmul %251, %243, %cst_250 {dimension_numbers = #tpu.dot_dimension_numbers<[1], [0], [0], [1], [0, 0, 1, 1], [], []>} : vector<4x6xf32>, vector<6x16xf32>, vector<4x16xf32> -> vector<4x16xf32>
    %c1_251 = arith.constant 1 : index
    %c0_252 = arith.constant 0 : index
    %c0_253 = arith.constant 0 : index
    %253 = vector.load %arg29[%c1_251, %c0_252, %c0_253] : memref<9x16x16xf32, #tpu.memory_space<vmem>>, vector<1x16x16xf32>
    %254 = vector.shape_cast %253 : vector<1x16x16xf32> to vector<16x16xf32>
    %cst_254 = arith.constant dense<0.000000e+00> : vector<4x16xf32>
    %255 = tpu.matmul %252, %254, %cst_254 {dimension_numbers = #tpu.dot_dimension_numbers<[1], [0], [0], [1], [0, 0, 1, 1], [], []>} : vector<4x16xf32>, vector<16x16xf32>, vector<4x16xf32> -> vector<4x16xf32>
    %256 = arith.addf %249, %255 : vector<4x16xf32>
    %c2_255 = arith.constant 2 : index
    %c0_256 = arith.constant 0 : index
    %c0_257 = arith.constant 0 : index
    %257 = vector.load %arg28[%c2_255, %c0_256, %c0_257] : memref<9x4x6xf32, #tpu.memory_space<vmem>>, vector<1x4x6xf32>
    %258 = vector.shape_cast %257 : vector<1x4x6xf32> to vector<4x6xf32>
    %cst_258 = arith.constant dense<0.000000e+00> : vector<4x16xf32>
    %259 = tpu.matmul %258, %243, %cst_258 {dimension_numbers = #tpu.dot_dimension_numbers<[1], [0], [0], [1], [0, 0, 1, 1], [], []>} : vector<4x6xf32>, vector<6x16xf32>, vector<4x16xf32> -> vector<4x16xf32>
    %c2_259 = arith.constant 2 : index
    %c0_260 = arith.constant 0 : index
    %c0_261 = arith.constant 0 : index
    %260 = vector.load %arg29[%c2_259, %c0_260, %c0_261] : memref<9x16x16xf32, #tpu.memory_space<vmem>>, vector<1x16x16xf32>
    %261 = vector.shape_cast %260 : vector<1x16x16xf32> to vector<16x16xf32>
    %cst_262 = arith.constant dense<0.000000e+00> : vector<4x16xf32>
    %262 = tpu.matmul %259, %261, %cst_262 {dimension_numbers = #tpu.dot_dimension_numbers<[1], [0], [0], [1], [0, 0, 1, 1], [], []>} : vector<4x16xf32>, vector<16x16xf32>, vector<4x16xf32> -> vector<4x16xf32>
    %263 = arith.addf %256, %262 : vector<4x16xf32>
    %c3_263 = arith.constant 3 : index
    %c0_264 = arith.constant 0 : index
    %c0_265 = arith.constant 0 : index
    %264 = vector.load %arg28[%c3_263, %c0_264, %c0_265] : memref<9x4x6xf32, #tpu.memory_space<vmem>>, vector<1x4x6xf32>
    %265 = vector.shape_cast %264 : vector<1x4x6xf32> to vector<4x6xf32>
    %cst_266 = arith.constant dense<0.000000e+00> : vector<4x16xf32>
    %266 = tpu.matmul %265, %243, %cst_266 {dimension_numbers = #tpu.dot_dimension_numbers<[1], [0], [0], [1], [0, 0, 1, 1], [], []>} : vector<4x6xf32>, vector<6x16xf32>, vector<4x16xf32> -> vector<4x16xf32>
    %c3_267 = arith.constant 3 : index
    %c0_268 = arith.constant 0 : index
    %c0_269 = arith.constant 0 : index
    %267 = vector.load %arg29[%c3_267, %c0_268, %c0_269] : memref<9x16x16xf32, #tpu.memory_space<vmem>>, vector<1x16x16xf32>
    %268 = vector.shape_cast %267 : vector<1x16x16xf32> to vector<16x16xf32>
    %cst_270 = arith.constant dense<0.000000e+00> : vector<4x16xf32>
    %269 = tpu.matmul %266, %268, %cst_270 {dimension_numbers = #tpu.dot_dimension_numbers<[1], [0], [0], [1], [0, 0, 1, 1], [], []>} : vector<4x16xf32>, vector<16x16xf32>, vector<4x16xf32> -> vector<4x16xf32>
    %270 = arith.addf %263, %269 : vector<4x16xf32>
    %c4_271 = arith.constant 4 : index
    %c0_272 = arith.constant 0 : index
    %c0_273 = arith.constant 0 : index
    %271 = vector.load %arg28[%c4_271, %c0_272, %c0_273] : memref<9x4x6xf32, #tpu.memory_space<vmem>>, vector<1x4x6xf32>
    %272 = vector.shape_cast %271 : vector<1x4x6xf32> to vector<4x6xf32>
    %cst_274 = arith.constant dense<0.000000e+00> : vector<4x16xf32>
    %273 = tpu.matmul %272, %243, %cst_274 {dimension_numbers = #tpu.dot_dimension_numbers<[1], [0], [0], [1], [0, 0, 1, 1], [], []>} : vector<4x6xf32>, vector<6x16xf32>, vector<4x16xf32> -> vector<4x16xf32>
    %c4_275 = arith.constant 4 : index
    %c0_276 = arith.constant 0 : index
    %c0_277 = arith.constant 0 : index
    %274 = vector.load %arg29[%c4_275, %c0_276, %c0_277] : memref<9x16x16xf32, #tpu.memory_space<vmem>>, vector<1x16x16xf32>
    %275 = vector.shape_cast %274 : vector<1x16x16xf32> to vector<16x16xf32>
    %cst_278 = arith.constant dense<0.000000e+00> : vector<4x16xf32>
    %276 = tpu.matmul %273, %275, %cst_278 {dimension_numbers = #tpu.dot_dimension_numbers<[1], [0], [0], [1], [0, 0, 1, 1], [], []>} : vector<4x16xf32>, vector<16x16xf32>, vector<4x16xf32> -> vector<4x16xf32>
    %277 = arith.addf %270, %276 : vector<4x16xf32>
    %c5_279 = arith.constant 5 : index
    %c0_280 = arith.constant 0 : index
    %c0_281 = arith.constant 0 : index
    %278 = vector.load %arg28[%c5_279, %c0_280, %c0_281] : memref<9x4x6xf32, #tpu.memory_space<vmem>>, vector<1x4x6xf32>
    %279 = vector.shape_cast %278 : vector<1x4x6xf32> to vector<4x6xf32>
    %cst_282 = arith.constant dense<0.000000e+00> : vector<4x16xf32>
    %280 = tpu.matmul %279, %243, %cst_282 {dimension_numbers = #tpu.dot_dimension_numbers<[1], [0], [0], [1], [0, 0, 1, 1], [], []>} : vector<4x6xf32>, vector<6x16xf32>, vector<4x16xf32> -> vector<4x16xf32>
    %c5_283 = arith.constant 5 : index
    %c0_284 = arith.constant 0 : index
    %c0_285 = arith.constant 0 : index
    %281 = vector.load %arg29[%c5_283, %c0_284, %c0_285] : memref<9x16x16xf32, #tpu.memory_space<vmem>>, vector<1x16x16xf32>
    %282 = vector.shape_cast %281 : vector<1x16x16xf32> to vector<16x16xf32>
    %cst_286 = arith.constant dense<0.000000e+00> : vector<4x16xf32>
    %283 = tpu.matmul %280, %282, %cst_286 {dimension_numbers = #tpu.dot_dimension_numbers<[1], [0], [0], [1], [0, 0, 1, 1], [], []>} : vector<4x16xf32>, vector<16x16xf32>, vector<4x16xf32> -> vector<4x16xf32>
    %284 = arith.addf %277, %283 : vector<4x16xf32>
    %c6_287 = arith.constant 6 : index
    %c0_288 = arith.constant 0 : index
    %c0_289 = arith.constant 0 : index
    %285 = vector.load %arg28[%c6_287, %c0_288, %c0_289] : memref<9x4x6xf32, #tpu.memory_space<vmem>>, vector<1x4x6xf32>
    %286 = vector.shape_cast %285 : vector<1x4x6xf32> to vector<4x6xf32>
    %cst_290 = arith.constant dense<0.000000e+00> : vector<4x16xf32>
    %287 = tpu.matmul %286, %243, %cst_290 {dimension_numbers = #tpu.dot_dimension_numbers<[1], [0], [0], [1], [0, 0, 1, 1], [], []>} : vector<4x6xf32>, vector<6x16xf32>, vector<4x16xf32> -> vector<4x16xf32>
    %c6_291 = arith.constant 6 : index
    %c0_292 = arith.constant 0 : index
    %c0_293 = arith.constant 0 : index
    %288 = vector.load %arg29[%c6_291, %c0_292, %c0_293] : memref<9x16x16xf32, #tpu.memory_space<vmem>>, vector<1x16x16xf32>
    %289 = vector.shape_cast %288 : vector<1x16x16xf32> to vector<16x16xf32>
    %cst_294 = arith.constant dense<0.000000e+00> : vector<4x16xf32>
    %290 = tpu.matmul %287, %289, %cst_294 {dimension_numbers = #tpu.dot_dimension_numbers<[1], [0], [0], [1], [0, 0, 1, 1], [], []>} : vector<4x16xf32>, vector<16x16xf32>, vector<4x16xf32> -> vector<4x16xf32>
    %291 = arith.addf %284, %290 : vector<4x16xf32>
    %c7_295 = arith.constant 7 : index
    %c0_296 = arith.constant 0 : index
    %c0_297 = arith.constant 0 : index
    %292 = vector.load %arg28[%c7_295, %c0_296, %c0_297] : memref<9x4x6xf32, #tpu.memory_space<vmem>>, vector<1x4x6xf32>
    %293 = vector.shape_cast %292 : vector<1x4x6xf32> to vector<4x6xf32>
    %cst_298 = arith.constant dense<0.000000e+00> : vector<4x16xf32>
    %294 = tpu.matmul %293, %243, %cst_298 {dimension_numbers = #tpu.dot_dimension_numbers<[1], [0], [0], [1], [0, 0, 1, 1], [], []>} : vector<4x6xf32>, vector<6x16xf32>, vector<4x16xf32> -> vector<4x16xf32>
    %c7_299 = arith.constant 7 : index
    %c0_300 = arith.constant 0 : index
    %c0_301 = arith.constant 0 : index
    %295 = vector.load %arg29[%c7_299, %c0_300, %c0_301] : memref<9x16x16xf32, #tpu.memory_space<vmem>>, vector<1x16x16xf32>
    %296 = vector.shape_cast %295 : vector<1x16x16xf32> to vector<16x16xf32>
    %cst_302 = arith.constant dense<0.000000e+00> : vector<4x16xf32>
    %297 = tpu.matmul %294, %296, %cst_302 {dimension_numbers = #tpu.dot_dimension_numbers<[1], [0], [0], [1], [0, 0, 1, 1], [], []>} : vector<4x16xf32>, vector<16x16xf32>, vector<4x16xf32> -> vector<4x16xf32>
    %298 = arith.addf %291, %297 : vector<4x16xf32>
    %c8_303 = arith.constant 8 : index
    %c0_304 = arith.constant 0 : index
    %c0_305 = arith.constant 0 : index
    %299 = vector.load %arg28[%c8_303, %c0_304, %c0_305] : memref<9x4x6xf32, #tpu.memory_space<vmem>>, vector<1x4x6xf32>
    %300 = vector.shape_cast %299 : vector<1x4x6xf32> to vector<4x6xf32>
    %cst_306 = arith.constant dense<0.000000e+00> : vector<4x16xf32>
    %301 = tpu.matmul %300, %243, %cst_306 {dimension_numbers = #tpu.dot_dimension_numbers<[1], [0], [0], [1], [0, 0, 1, 1], [], []>} : vector<4x6xf32>, vector<6x16xf32>, vector<4x16xf32> -> vector<4x16xf32>
    %c8_307 = arith.constant 8 : index
    %c0_308 = arith.constant 0 : index
    %c0_309 = arith.constant 0 : index
    %302 = vector.load %arg29[%c8_307, %c0_308, %c0_309] : memref<9x16x16xf32, #tpu.memory_space<vmem>>, vector<1x16x16xf32>
    %303 = vector.shape_cast %302 : vector<1x16x16xf32> to vector<16x16xf32>
    %cst_310 = arith.constant dense<0.000000e+00> : vector<4x16xf32>
    %304 = tpu.matmul %301, %303, %cst_310 {dimension_numbers = #tpu.dot_dimension_numbers<[1], [0], [0], [1], [0, 0, 1, 1], [], []>} : vector<4x16xf32>, vector<16x16xf32>, vector<4x16xf32> -> vector<4x16xf32>
    %305 = arith.addf %298, %304 : vector<4x16xf32>
    %c0_311 = arith.constant 0 : index
    %c0_312 = arith.constant 0 : index
    %306 = vector.load %arg30[%c0_311, %c0_312] : memref<1x16xf32, #tpu.memory_space<vmem>>, vector<1x16xf32>
    %307 = vector.broadcast %306 : vector<1x16xf32> to vector<4x16xf32>
    %308 = arith.addf %305, %307 : vector<4x16xf32>
    %c0_313 = arith.constant 0 : index
    %c0_314 = arith.constant 0 : index
    %c0_315 = arith.constant 0 : index
    %309 = vector.load %arg31[%c0_313, %c0_314, %c0_315] : memref<9x2x4xf32, #tpu.memory_space<vmem>>, vector<1x2x4xf32>
    %310 = vector.shape_cast %309 : vector<1x2x4xf32> to vector<2x4xf32>
    %cst_316 = arith.constant dense<0.000000e+00> : vector<2x16xf32>
    %311 = tpu.matmul %310, %308, %cst_316 {dimension_numbers = #tpu.dot_dimension_numbers<[1], [0], [0], [1], [0, 0, 1, 1], [], []>} : vector<2x4xf32>, vector<4x16xf32>, vector<2x16xf32> -> vector<2x16xf32>
    %c0_317 = arith.constant 0 : index
    %c0_318 = arith.constant 0 : index
    %c0_319 = arith.constant 0 : index
    %312 = vector.load %arg32[%c0_317, %c0_318, %c0_319] : memref<9x16x16xf32, #tpu.memory_space<vmem>>, vector<1x16x16xf32>
    %313 = vector.shape_cast %312 : vector<1x16x16xf32> to vector<16x16xf32>
    %cst_320 = arith.constant dense<0.000000e+00> : vector<2x16xf32>
    %314 = tpu.matmul %311, %313, %cst_320 {dimension_numbers = #tpu.dot_dimension_numbers<[1], [0], [0], [1], [0, 0, 1, 1], [], []>} : vector<2x16xf32>, vector<16x16xf32>, vector<2x16xf32> -> vector<2x16xf32>
    %c1_321 = arith.constant 1 : index
    %c0_322 = arith.constant 0 : index
    %c0_323 = arith.constant 0 : index
    %315 = vector.load %arg31[%c1_321, %c0_322, %c0_323] : memref<9x2x4xf32, #tpu.memory_space<vmem>>, vector<1x2x4xf32>
    %316 = vector.shape_cast %315 : vector<1x2x4xf32> to vector<2x4xf32>
    %cst_324 = arith.constant dense<0.000000e+00> : vector<2x16xf32>
    %317 = tpu.matmul %316, %308, %cst_324 {dimension_numbers = #tpu.dot_dimension_numbers<[1], [0], [0], [1], [0, 0, 1, 1], [], []>} : vector<2x4xf32>, vector<4x16xf32>, vector<2x16xf32> -> vector<2x16xf32>
    %c1_325 = arith.constant 1 : index
    %c0_326 = arith.constant 0 : index
    %c0_327 = arith.constant 0 : index
    %318 = vector.load %arg32[%c1_325, %c0_326, %c0_327] : memref<9x16x16xf32, #tpu.memory_space<vmem>>, vector<1x16x16xf32>
    %319 = vector.shape_cast %318 : vector<1x16x16xf32> to vector<16x16xf32>
    %cst_328 = arith.constant dense<0.000000e+00> : vector<2x16xf32>
    %320 = tpu.matmul %317, %319, %cst_328 {dimension_numbers = #tpu.dot_dimension_numbers<[1], [0], [0], [1], [0, 0, 1, 1], [], []>} : vector<2x16xf32>, vector<16x16xf32>, vector<2x16xf32> -> vector<2x16xf32>
    %321 = arith.addf %314, %320 : vector<2x16xf32>
    %c2_329 = arith.constant 2 : index
    %c0_330 = arith.constant 0 : index
    %c0_331 = arith.constant 0 : index
    %322 = vector.load %arg31[%c2_329, %c0_330, %c0_331] : memref<9x2x4xf32, #tpu.memory_space<vmem>>, vector<1x2x4xf32>
    %323 = vector.shape_cast %322 : vector<1x2x4xf32> to vector<2x4xf32>
    %cst_332 = arith.constant dense<0.000000e+00> : vector<2x16xf32>
    %324 = tpu.matmul %323, %308, %cst_332 {dimension_numbers = #tpu.dot_dimension_numbers<[1], [0], [0], [1], [0, 0, 1, 1], [], []>} : vector<2x4xf32>, vector<4x16xf32>, vector<2x16xf32> -> vector<2x16xf32>
    %c2_333 = arith.constant 2 : index
    %c0_334 = arith.constant 0 : index
    %c0_335 = arith.constant 0 : index
    %325 = vector.load %arg32[%c2_333, %c0_334, %c0_335] : memref<9x16x16xf32, #tpu.memory_space<vmem>>, vector<1x16x16xf32>
    %326 = vector.shape_cast %325 : vector<1x16x16xf32> to vector<16x16xf32>
    %cst_336 = arith.constant dense<0.000000e+00> : vector<2x16xf32>
    %327 = tpu.matmul %324, %326, %cst_336 {dimension_numbers = #tpu.dot_dimension_numbers<[1], [0], [0], [1], [0, 0, 1, 1], [], []>} : vector<2x16xf32>, vector<16x16xf32>, vector<2x16xf32> -> vector<2x16xf32>
    %328 = arith.addf %321, %327 : vector<2x16xf32>
    %c3_337 = arith.constant 3 : index
    %c0_338 = arith.constant 0 : index
    %c0_339 = arith.constant 0 : index
    %329 = vector.load %arg31[%c3_337, %c0_338, %c0_339] : memref<9x2x4xf32, #tpu.memory_space<vmem>>, vector<1x2x4xf32>
    %330 = vector.shape_cast %329 : vector<1x2x4xf32> to vector<2x4xf32>
    %cst_340 = arith.constant dense<0.000000e+00> : vector<2x16xf32>
    %331 = tpu.matmul %330, %308, %cst_340 {dimension_numbers = #tpu.dot_dimension_numbers<[1], [0], [0], [1], [0, 0, 1, 1], [], []>} : vector<2x4xf32>, vector<4x16xf32>, vector<2x16xf32> -> vector<2x16xf32>
    %c3_341 = arith.constant 3 : index
    %c0_342 = arith.constant 0 : index
    %c0_343 = arith.constant 0 : index
    %332 = vector.load %arg32[%c3_341, %c0_342, %c0_343] : memref<9x16x16xf32, #tpu.memory_space<vmem>>, vector<1x16x16xf32>
    %333 = vector.shape_cast %332 : vector<1x16x16xf32> to vector<16x16xf32>
    %cst_344 = arith.constant dense<0.000000e+00> : vector<2x16xf32>
    %334 = tpu.matmul %331, %333, %cst_344 {dimension_numbers = #tpu.dot_dimension_numbers<[1], [0], [0], [1], [0, 0, 1, 1], [], []>} : vector<2x16xf32>, vector<16x16xf32>, vector<2x16xf32> -> vector<2x16xf32>
    %335 = arith.addf %328, %334 : vector<2x16xf32>
    %c4_345 = arith.constant 4 : index
    %c0_346 = arith.constant 0 : index
    %c0_347 = arith.constant 0 : index
    %336 = vector.load %arg31[%c4_345, %c0_346, %c0_347] : memref<9x2x4xf32, #tpu.memory_space<vmem>>, vector<1x2x4xf32>
    %337 = vector.shape_cast %336 : vector<1x2x4xf32> to vector<2x4xf32>
    %cst_348 = arith.constant dense<0.000000e+00> : vector<2x16xf32>
    %338 = tpu.matmul %337, %308, %cst_348 {dimension_numbers = #tpu.dot_dimension_numbers<[1], [0], [0], [1], [0, 0, 1, 1], [], []>} : vector<2x4xf32>, vector<4x16xf32>, vector<2x16xf32> -> vector<2x16xf32>
    %c4_349 = arith.constant 4 : index
    %c0_350 = arith.constant 0 : index
    %c0_351 = arith.constant 0 : index
    %339 = vector.load %arg32[%c4_349, %c0_350, %c0_351] : memref<9x16x16xf32, #tpu.memory_space<vmem>>, vector<1x16x16xf32>
    %340 = vector.shape_cast %339 : vector<1x16x16xf32> to vector<16x16xf32>
    %cst_352 = arith.constant dense<0.000000e+00> : vector<2x16xf32>
    %341 = tpu.matmul %338, %340, %cst_352 {dimension_numbers = #tpu.dot_dimension_numbers<[1], [0], [0], [1], [0, 0, 1, 1], [], []>} : vector<2x16xf32>, vector<16x16xf32>, vector<2x16xf32> -> vector<2x16xf32>
    %342 = arith.addf %335, %341 : vector<2x16xf32>
    %c5_353 = arith.constant 5 : index
    %c0_354 = arith.constant 0 : index
    %c0_355 = arith.constant 0 : index
    %343 = vector.load %arg31[%c5_353, %c0_354, %c0_355] : memref<9x2x4xf32, #tpu.memory_space<vmem>>, vector<1x2x4xf32>
    %344 = vector.shape_cast %343 : vector<1x2x4xf32> to vector<2x4xf32>
    %cst_356 = arith.constant dense<0.000000e+00> : vector<2x16xf32>
    %345 = tpu.matmul %344, %308, %cst_356 {dimension_numbers = #tpu.dot_dimension_numbers<[1], [0], [0], [1], [0, 0, 1, 1], [], []>} : vector<2x4xf32>, vector<4x16xf32>, vector<2x16xf32> -> vector<2x16xf32>
    %c5_357 = arith.constant 5 : index
    %c0_358 = arith.constant 0 : index
    %c0_359 = arith.constant 0 : index
    %346 = vector.load %arg32[%c5_357, %c0_358, %c0_359] : memref<9x16x16xf32, #tpu.memory_space<vmem>>, vector<1x16x16xf32>
    %347 = vector.shape_cast %346 : vector<1x16x16xf32> to vector<16x16xf32>
    %cst_360 = arith.constant dense<0.000000e+00> : vector<2x16xf32>
    %348 = tpu.matmul %345, %347, %cst_360 {dimension_numbers = #tpu.dot_dimension_numbers<[1], [0], [0], [1], [0, 0, 1, 1], [], []>} : vector<2x16xf32>, vector<16x16xf32>, vector<2x16xf32> -> vector<2x16xf32>
    %349 = arith.addf %342, %348 : vector<2x16xf32>
    %c6_361 = arith.constant 6 : index
    %c0_362 = arith.constant 0 : index
    %c0_363 = arith.constant 0 : index
    %350 = vector.load %arg31[%c6_361, %c0_362, %c0_363] : memref<9x2x4xf32, #tpu.memory_space<vmem>>, vector<1x2x4xf32>
    %351 = vector.shape_cast %350 : vector<1x2x4xf32> to vector<2x4xf32>
    %cst_364 = arith.constant dense<0.000000e+00> : vector<2x16xf32>
    %352 = tpu.matmul %351, %308, %cst_364 {dimension_numbers = #tpu.dot_dimension_numbers<[1], [0], [0], [1], [0, 0, 1, 1], [], []>} : vector<2x4xf32>, vector<4x16xf32>, vector<2x16xf32> -> vector<2x16xf32>
    %c6_365 = arith.constant 6 : index
    %c0_366 = arith.constant 0 : index
    %c0_367 = arith.constant 0 : index
    %353 = vector.load %arg32[%c6_365, %c0_366, %c0_367] : memref<9x16x16xf32, #tpu.memory_space<vmem>>, vector<1x16x16xf32>
    %354 = vector.shape_cast %353 : vector<1x16x16xf32> to vector<16x16xf32>
    %cst_368 = arith.constant dense<0.000000e+00> : vector<2x16xf32>
    %355 = tpu.matmul %352, %354, %cst_368 {dimension_numbers = #tpu.dot_dimension_numbers<[1], [0], [0], [1], [0, 0, 1, 1], [], []>} : vector<2x16xf32>, vector<16x16xf32>, vector<2x16xf32> -> vector<2x16xf32>
    %356 = arith.addf %349, %355 : vector<2x16xf32>
    %c7_369 = arith.constant 7 : index
    %c0_370 = arith.constant 0 : index
    %c0_371 = arith.constant 0 : index
    %357 = vector.load %arg31[%c7_369, %c0_370, %c0_371] : memref<9x2x4xf32, #tpu.memory_space<vmem>>, vector<1x2x4xf32>
    %358 = vector.shape_cast %357 : vector<1x2x4xf32> to vector<2x4xf32>
    %cst_372 = arith.constant dense<0.000000e+00> : vector<2x16xf32>
    %359 = tpu.matmul %358, %308, %cst_372 {dimension_numbers = #tpu.dot_dimension_numbers<[1], [0], [0], [1], [0, 0, 1, 1], [], []>} : vector<2x4xf32>, vector<4x16xf32>, vector<2x16xf32> -> vector<2x16xf32>
    %c7_373 = arith.constant 7 : index
    %c0_374 = arith.constant 0 : index
    %c0_375 = arith.constant 0 : index
    %360 = vector.load %arg32[%c7_373, %c0_374, %c0_375] : memref<9x16x16xf32, #tpu.memory_space<vmem>>, vector<1x16x16xf32>
    %361 = vector.shape_cast %360 : vector<1x16x16xf32> to vector<16x16xf32>
    %cst_376 = arith.constant dense<0.000000e+00> : vector<2x16xf32>
    %362 = tpu.matmul %359, %361, %cst_376 {dimension_numbers = #tpu.dot_dimension_numbers<[1], [0], [0], [1], [0, 0, 1, 1], [], []>} : vector<2x16xf32>, vector<16x16xf32>, vector<2x16xf32> -> vector<2x16xf32>
    %363 = arith.addf %356, %362 : vector<2x16xf32>
    %c8_377 = arith.constant 8 : index
    %c0_378 = arith.constant 0 : index
    %c0_379 = arith.constant 0 : index
    %364 = vector.load %arg31[%c8_377, %c0_378, %c0_379] : memref<9x2x4xf32, #tpu.memory_space<vmem>>, vector<1x2x4xf32>
    %365 = vector.shape_cast %364 : vector<1x2x4xf32> to vector<2x4xf32>
    %cst_380 = arith.constant dense<0.000000e+00> : vector<2x16xf32>
    %366 = tpu.matmul %365, %308, %cst_380 {dimension_numbers = #tpu.dot_dimension_numbers<[1], [0], [0], [1], [0, 0, 1, 1], [], []>} : vector<2x4xf32>, vector<4x16xf32>, vector<2x16xf32> -> vector<2x16xf32>
    %c8_381 = arith.constant 8 : index
    %c0_382 = arith.constant 0 : index
    %c0_383 = arith.constant 0 : index
    %367 = vector.load %arg32[%c8_381, %c0_382, %c0_383] : memref<9x16x16xf32, #tpu.memory_space<vmem>>, vector<1x16x16xf32>
    %368 = vector.shape_cast %367 : vector<1x16x16xf32> to vector<16x16xf32>
    %cst_384 = arith.constant dense<0.000000e+00> : vector<2x16xf32>
    %369 = tpu.matmul %366, %368, %cst_384 {dimension_numbers = #tpu.dot_dimension_numbers<[1], [0], [0], [1], [0, 0, 1, 1], [], []>} : vector<2x16xf32>, vector<16x16xf32>, vector<2x16xf32> -> vector<2x16xf32>
    %370 = arith.addf %363, %369 : vector<2x16xf32>
    %c0_385 = arith.constant 0 : index
    %c0_386 = arith.constant 0 : index
    %371 = vector.load %arg33[%c0_385, %c0_386] : memref<1x16xf32, #tpu.memory_space<vmem>>, vector<1x16xf32>
    %372 = vector.broadcast %371 : vector<1x16xf32> to vector<2x16xf32>
    %373 = arith.addf %370, %372 : vector<2x16xf32>
    %cst_387 = arith.constant 0.000000e+00 : f32
    %374 = vector.broadcast %cst_387 : f32 to vector<2x16xf32>
    %375 = arith.maximumf %373, %374 : vector<2x16xf32>
    %c0_388 = arith.constant 0 : index
    %c0_389 = arith.constant 0 : index
    %376 = vector.load %arg34[%c0_388, %c0_389] : memref<16x16xf32, #tpu.memory_space<vmem>>, vector<16x16xf32>
    %cst_390 = arith.constant dense<0.000000e+00> : vector<2x16xf32>
    %377 = tpu.matmul %375, %376, %cst_390 {dimension_numbers = #tpu.dot_dimension_numbers<[1], [0], [0], [1], [0, 0, 1, 1], [], []>} : vector<2x16xf32>, vector<16x16xf32>, vector<2x16xf32> -> vector<2x16xf32>
    %c0_391 = arith.constant 0 : index
    %c0_392 = arith.constant 0 : index
    %378 = vector.load %arg35[%c0_391, %c0_392] : memref<1x16xf32, #tpu.memory_space<vmem>>, vector<1x16xf32>
    %379 = vector.broadcast %378 : vector<1x16xf32> to vector<2x16xf32>
    %380 = arith.addf %377, %379 : vector<2x16xf32>
    %c0_393 = arith.constant 0 : index
    %c0_394 = arith.constant 0 : index
    %381 = vector.load %arg36[%c0_393, %c0_394] : memref<16x16xf32, #tpu.memory_space<vmem>>, vector<16x16xf32>
    %cst_395 = arith.constant dense<0.000000e+00> : vector<2x16xf32>
    %382 = tpu.matmul %380, %381, %cst_395 {dimension_numbers = #tpu.dot_dimension_numbers<[1], [0], [0], [1], [0, 0, 1, 1], [], []>} : vector<2x16xf32>, vector<16x16xf32>, vector<2x16xf32> -> vector<2x16xf32>
    %c0_396 = arith.constant 0 : index
    %c0_397 = arith.constant 0 : index
    %383 = vector.load %arg37[%c0_396, %c0_397] : memref<1x16xf32, #tpu.memory_space<vmem>>, vector<1x16xf32>
    %384 = vector.broadcast %383 : vector<1x16xf32> to vector<2x16xf32>
    %385 = arith.addf %382, %384 : vector<2x16xf32>
    %cst_398 = arith.constant 5.000000e-01 : f32
    %386 = vector.broadcast %cst_398 : f32 to vector<2x16xf32>
    %387 = arith.mulf %386, %380 : vector<2x16xf32>
    %388 = arith.mulf %387, %385 : vector<2x16xf32>
    %c0_399 = arith.constant 0 : index
    %c0_400 = arith.constant 0 : index
    %389 = vector.load %arg38[%c0_399, %c0_400] : memref<18x6xf32, #tpu.memory_space<vmem>>, vector<18x6xf32>
    %cst_401 = arith.constant dense<0.000000e+00> : vector<18x16xf32>
    %390 = tpu.matmul %389, %78, %cst_401 {dimension_numbers = #tpu.dot_dimension_numbers<[1], [0], [0], [1], [0, 0, 1, 1], [], []>} : vector<18x6xf32>, vector<6x16xf32>, vector<18x16xf32> -> vector<18x16xf32>
    %c0_402 = arith.constant 0 : index
    %c0_403 = arith.constant 0 : index
    %391 = vector.load %arg39[%c0_402, %c0_403] : memref<18x6xf32, #tpu.memory_space<vmem>>, vector<18x6xf32>
    %cst_404 = arith.constant dense<0.000000e+00> : vector<18x16xf32>
    %392 = tpu.matmul %391, %78, %cst_404 {dimension_numbers = #tpu.dot_dimension_numbers<[1], [0], [0], [1], [0, 0, 1, 1], [], []>} : vector<18x6xf32>, vector<6x16xf32>, vector<18x16xf32> -> vector<18x16xf32>
    %c0_405 = arith.constant 0 : index
    %c0_406 = arith.constant 0 : index
    %393 = vector.load %arg40[%c0_405, %c0_406] : memref<18x2xf32, #tpu.memory_space<vmem>>, vector<18x2xf32>
    %cst_407 = arith.constant dense<0.000000e+00> : vector<18x16xf32>
    %394 = tpu.matmul %393, %105, %cst_407 {dimension_numbers = #tpu.dot_dimension_numbers<[1], [0], [0], [1], [0, 0, 1, 1], [], []>} : vector<18x2xf32>, vector<2x16xf32>, vector<18x16xf32> -> vector<18x16xf32>
    %c0_408 = arith.constant 0 : index
    %c0_409 = arith.constant 0 : index
    %395 = vector.load %arg40[%c0_408, %c0_409] : memref<18x2xf32, #tpu.memory_space<vmem>>, vector<18x2xf32>
    %cst_410 = arith.constant dense<0.000000e+00> : vector<18x16xf32>
    %396 = tpu.matmul %395, %388, %cst_410 {dimension_numbers = #tpu.dot_dimension_numbers<[1], [0], [0], [1], [0, 0, 1, 1], [], []>} : vector<18x2xf32>, vector<2x16xf32>, vector<18x16xf32> -> vector<18x16xf32>
    %397 = arith.mulf %390, %392 : vector<18x16xf32>
    %398 = arith.mulf %394, %394 : vector<18x16xf32>
    %399 = arith.addf %397, %398 : vector<18x16xf32>
    %400 = arith.mulf %396, %396 : vector<18x16xf32>
    %401 = arith.addf %399, %400 : vector<18x16xf32>
    %cst_411 = arith.constant dense<0xFF800000> : vector<16xf32>
    %402 = vector.multi_reduction <maximumf>, %401, %cst_411 [0] : vector<18x16xf32> to vector<16xf32>
    %403 = vector.shape_cast %402 : vector<16xf32> to vector<1x16xf32>
    %404 = vector.broadcast %403 : vector<1x16xf32> to vector<18x16xf32>
    %405 = arith.subf %401, %404 : vector<18x16xf32>
    %406 = math.exp %405 : vector<18x16xf32>
    %c0_412 = arith.constant 0 : index
    %c0_413 = arith.constant 0 : index
    %407 = vector.load %arg41[%c0_412, %c0_413] : memref<18x18xf32, #tpu.memory_space<vmem>>, vector<18x18xf32>
    %cst_414 = arith.constant dense<0.000000e+00> : vector<18x16xf32>
    %408 = tpu.matmul %407, %406, %cst_414 {dimension_numbers = #tpu.dot_dimension_numbers<[1], [0], [0], [1], [0, 0, 1, 1], [], []>} : vector<18x18xf32>, vector<18x16xf32>, vector<18x16xf32> -> vector<18x16xf32>
    %409 = arith.divf %406, %408 : vector<18x16xf32>
    %410 = arith.mulf %390, %409 : vector<18x16xf32>
    %411 = arith.mulf %394, %409 : vector<18x16xf32>
    %412 = arith.mulf %396, %409 : vector<18x16xf32>
    %cst_415 = arith.constant 0.000000e+00 : f32
    %413 = vector.broadcast %cst_415 : f32 to vector<2x128xf32>
    %414 = vector.extract_strided_slice %410 {offsets = [0, 0], sizes = [2, 16], strides = [1, 1]} : vector<18x16xf32> to vector<2x16xf32>
    %c0_416 = arith.constant 0 : index
    %c0_417 = arith.constant 0 : index
    %c0_418 = arith.constant 0 : index
    %415 = vector.load %arg42[%c0_416, %c0_417, %c0_418] : memref<27x16x128xf32, #tpu.memory_space<vmem>>, vector<1x16x128xf32>
    %416 = vector.shape_cast %415 : vector<1x16x128xf32> to vector<16x128xf32>
    %cst_419 = arith.constant dense<0.000000e+00> : vector<2x128xf32>
    %417 = tpu.matmul %414, %416, %cst_419 {dimension_numbers = #tpu.dot_dimension_numbers<[1], [0], [0], [1], [0, 0, 1, 1], [], []>} : vector<2x16xf32>, vector<16x128xf32>, vector<2x128xf32> -> vector<2x128xf32>
    %418 = arith.addf %413, %417 : vector<2x128xf32>
    %419 = vector.extract_strided_slice %410 {offsets = [2, 0], sizes = [2, 16], strides = [1, 1]} : vector<18x16xf32> to vector<2x16xf32>
    %c1_420 = arith.constant 1 : index
    %c0_421 = arith.constant 0 : index
    %c0_422 = arith.constant 0 : index
    %420 = vector.load %arg42[%c1_420, %c0_421, %c0_422] : memref<27x16x128xf32, #tpu.memory_space<vmem>>, vector<1x16x128xf32>
    %421 = vector.shape_cast %420 : vector<1x16x128xf32> to vector<16x128xf32>
    %cst_423 = arith.constant dense<0.000000e+00> : vector<2x128xf32>
    %422 = tpu.matmul %419, %421, %cst_423 {dimension_numbers = #tpu.dot_dimension_numbers<[1], [0], [0], [1], [0, 0, 1, 1], [], []>} : vector<2x16xf32>, vector<16x128xf32>, vector<2x128xf32> -> vector<2x128xf32>
    %423 = arith.addf %418, %422 : vector<2x128xf32>
    %424 = vector.extract_strided_slice %410 {offsets = [4, 0], sizes = [2, 16], strides = [1, 1]} : vector<18x16xf32> to vector<2x16xf32>
    %c2_424 = arith.constant 2 : index
    %c0_425 = arith.constant 0 : index
    %c0_426 = arith.constant 0 : index
    %425 = vector.load %arg42[%c2_424, %c0_425, %c0_426] : memref<27x16x128xf32, #tpu.memory_space<vmem>>, vector<1x16x128xf32>
    %426 = vector.shape_cast %425 : vector<1x16x128xf32> to vector<16x128xf32>
    %cst_427 = arith.constant dense<0.000000e+00> : vector<2x128xf32>
    %427 = tpu.matmul %424, %426, %cst_427 {dimension_numbers = #tpu.dot_dimension_numbers<[1], [0], [0], [1], [0, 0, 1, 1], [], []>} : vector<2x16xf32>, vector<16x128xf32>, vector<2x128xf32> -> vector<2x128xf32>
    %428 = arith.addf %423, %427 : vector<2x128xf32>
    %429 = vector.extract_strided_slice %410 {offsets = [6, 0], sizes = [2, 16], strides = [1, 1]} : vector<18x16xf32> to vector<2x16xf32>
    %c3_428 = arith.constant 3 : index
    %c0_429 = arith.constant 0 : index
    %c0_430 = arith.constant 0 : index
    %430 = vector.load %arg42[%c3_428, %c0_429, %c0_430] : memref<27x16x128xf32, #tpu.memory_space<vmem>>, vector<1x16x128xf32>
    %431 = vector.shape_cast %430 : vector<1x16x128xf32> to vector<16x128xf32>
    %cst_431 = arith.constant dense<0.000000e+00> : vector<2x128xf32>
    %432 = tpu.matmul %429, %431, %cst_431 {dimension_numbers = #tpu.dot_dimension_numbers<[1], [0], [0], [1], [0, 0, 1, 1], [], []>} : vector<2x16xf32>, vector<16x128xf32>, vector<2x128xf32> -> vector<2x128xf32>
    %433 = arith.addf %428, %432 : vector<2x128xf32>
    %434 = vector.extract_strided_slice %410 {offsets = [8, 0], sizes = [2, 16], strides = [1, 1]} : vector<18x16xf32> to vector<2x16xf32>
    %c4_432 = arith.constant 4 : index
    %c0_433 = arith.constant 0 : index
    %c0_434 = arith.constant 0 : index
    %435 = vector.load %arg42[%c4_432, %c0_433, %c0_434] : memref<27x16x128xf32, #tpu.memory_space<vmem>>, vector<1x16x128xf32>
    %436 = vector.shape_cast %435 : vector<1x16x128xf32> to vector<16x128xf32>
    %cst_435 = arith.constant dense<0.000000e+00> : vector<2x128xf32>
    %437 = tpu.matmul %434, %436, %cst_435 {dimension_numbers = #tpu.dot_dimension_numbers<[1], [0], [0], [1], [0, 0, 1, 1], [], []>} : vector<2x16xf32>, vector<16x128xf32>, vector<2x128xf32> -> vector<2x128xf32>
    %438 = arith.addf %433, %437 : vector<2x128xf32>
    %439 = vector.extract_strided_slice %410 {offsets = [10, 0], sizes = [2, 16], strides = [1, 1]} : vector<18x16xf32> to vector<2x16xf32>
    %c5_436 = arith.constant 5 : index
    %c0_437 = arith.constant 0 : index
    %c0_438 = arith.constant 0 : index
    %440 = vector.load %arg42[%c5_436, %c0_437, %c0_438] : memref<27x16x128xf32, #tpu.memory_space<vmem>>, vector<1x16x128xf32>
    %441 = vector.shape_cast %440 : vector<1x16x128xf32> to vector<16x128xf32>
    %cst_439 = arith.constant dense<0.000000e+00> : vector<2x128xf32>
    %442 = tpu.matmul %439, %441, %cst_439 {dimension_numbers = #tpu.dot_dimension_numbers<[1], [0], [0], [1], [0, 0, 1, 1], [], []>} : vector<2x16xf32>, vector<16x128xf32>, vector<2x128xf32> -> vector<2x128xf32>
    %443 = arith.addf %438, %442 : vector<2x128xf32>
    %444 = vector.extract_strided_slice %410 {offsets = [12, 0], sizes = [2, 16], strides = [1, 1]} : vector<18x16xf32> to vector<2x16xf32>
    %c6_440 = arith.constant 6 : index
    %c0_441 = arith.constant 0 : index
    %c0_442 = arith.constant 0 : index
    %445 = vector.load %arg42[%c6_440, %c0_441, %c0_442] : memref<27x16x128xf32, #tpu.memory_space<vmem>>, vector<1x16x128xf32>
    %446 = vector.shape_cast %445 : vector<1x16x128xf32> to vector<16x128xf32>
    %cst_443 = arith.constant dense<0.000000e+00> : vector<2x128xf32>
    %447 = tpu.matmul %444, %446, %cst_443 {dimension_numbers = #tpu.dot_dimension_numbers<[1], [0], [0], [1], [0, 0, 1, 1], [], []>} : vector<2x16xf32>, vector<16x128xf32>, vector<2x128xf32> -> vector<2x128xf32>
    %448 = arith.addf %443, %447 : vector<2x128xf32>
    %449 = vector.extract_strided_slice %410 {offsets = [14, 0], sizes = [2, 16], strides = [1, 1]} : vector<18x16xf32> to vector<2x16xf32>
    %c7_444 = arith.constant 7 : index
    %c0_445 = arith.constant 0 : index
    %c0_446 = arith.constant 0 : index
    %450 = vector.load %arg42[%c7_444, %c0_445, %c0_446] : memref<27x16x128xf32, #tpu.memory_space<vmem>>, vector<1x16x128xf32>
    %451 = vector.shape_cast %450 : vector<1x16x128xf32> to vector<16x128xf32>
    %cst_447 = arith.constant dense<0.000000e+00> : vector<2x128xf32>
    %452 = tpu.matmul %449, %451, %cst_447 {dimension_numbers = #tpu.dot_dimension_numbers<[1], [0], [0], [1], [0, 0, 1, 1], [], []>} : vector<2x16xf32>, vector<16x128xf32>, vector<2x128xf32> -> vector<2x128xf32>
    %453 = arith.addf %448, %452 : vector<2x128xf32>
    %454 = vector.extract_strided_slice %410 {offsets = [16, 0], sizes = [2, 16], strides = [1, 1]} : vector<18x16xf32> to vector<2x16xf32>
    %c8_448 = arith.constant 8 : index
    %c0_449 = arith.constant 0 : index
    %c0_450 = arith.constant 0 : index
    %455 = vector.load %arg42[%c8_448, %c0_449, %c0_450] : memref<27x16x128xf32, #tpu.memory_space<vmem>>, vector<1x16x128xf32>
    %456 = vector.shape_cast %455 : vector<1x16x128xf32> to vector<16x128xf32>
    %cst_451 = arith.constant dense<0.000000e+00> : vector<2x128xf32>
    %457 = tpu.matmul %454, %456, %cst_451 {dimension_numbers = #tpu.dot_dimension_numbers<[1], [0], [0], [1], [0, 0, 1, 1], [], []>} : vector<2x16xf32>, vector<16x128xf32>, vector<2x128xf32> -> vector<2x128xf32>
    %458 = arith.addf %453, %457 : vector<2x128xf32>
    %459 = vector.extract_strided_slice %411 {offsets = [0, 0], sizes = [2, 16], strides = [1, 1]} : vector<18x16xf32> to vector<2x16xf32>
    %c9 = arith.constant 9 : index
    %c0_452 = arith.constant 0 : index
    %c0_453 = arith.constant 0 : index
    %460 = vector.load %arg42[%c9, %c0_452, %c0_453] : memref<27x16x128xf32, #tpu.memory_space<vmem>>, vector<1x16x128xf32>
    %461 = vector.shape_cast %460 : vector<1x16x128xf32> to vector<16x128xf32>
    %cst_454 = arith.constant dense<0.000000e+00> : vector<2x128xf32>
    %462 = tpu.matmul %459, %461, %cst_454 {dimension_numbers = #tpu.dot_dimension_numbers<[1], [0], [0], [1], [0, 0, 1, 1], [], []>} : vector<2x16xf32>, vector<16x128xf32>, vector<2x128xf32> -> vector<2x128xf32>
    %463 = arith.addf %458, %462 : vector<2x128xf32>
    %464 = vector.extract_strided_slice %411 {offsets = [2, 0], sizes = [2, 16], strides = [1, 1]} : vector<18x16xf32> to vector<2x16xf32>
    %c10 = arith.constant 10 : index
    %c0_455 = arith.constant 0 : index
    %c0_456 = arith.constant 0 : index
    %465 = vector.load %arg42[%c10, %c0_455, %c0_456] : memref<27x16x128xf32, #tpu.memory_space<vmem>>, vector<1x16x128xf32>
    %466 = vector.shape_cast %465 : vector<1x16x128xf32> to vector<16x128xf32>
    %cst_457 = arith.constant dense<0.000000e+00> : vector<2x128xf32>
    %467 = tpu.matmul %464, %466, %cst_457 {dimension_numbers = #tpu.dot_dimension_numbers<[1], [0], [0], [1], [0, 0, 1, 1], [], []>} : vector<2x16xf32>, vector<16x128xf32>, vector<2x128xf32> -> vector<2x128xf32>
    %468 = arith.addf %463, %467 : vector<2x128xf32>
    %469 = vector.extract_strided_slice %411 {offsets = [4, 0], sizes = [2, 16], strides = [1, 1]} : vector<18x16xf32> to vector<2x16xf32>
    %c11 = arith.constant 11 : index
    %c0_458 = arith.constant 0 : index
    %c0_459 = arith.constant 0 : index
    %470 = vector.load %arg42[%c11, %c0_458, %c0_459] : memref<27x16x128xf32, #tpu.memory_space<vmem>>, vector<1x16x128xf32>
    %471 = vector.shape_cast %470 : vector<1x16x128xf32> to vector<16x128xf32>
    %cst_460 = arith.constant dense<0.000000e+00> : vector<2x128xf32>
    %472 = tpu.matmul %469, %471, %cst_460 {dimension_numbers = #tpu.dot_dimension_numbers<[1], [0], [0], [1], [0, 0, 1, 1], [], []>} : vector<2x16xf32>, vector<16x128xf32>, vector<2x128xf32> -> vector<2x128xf32>
    %473 = arith.addf %468, %472 : vector<2x128xf32>
    %474 = vector.extract_strided_slice %411 {offsets = [6, 0], sizes = [2, 16], strides = [1, 1]} : vector<18x16xf32> to vector<2x16xf32>
    %c12 = arith.constant 12 : index
    %c0_461 = arith.constant 0 : index
    %c0_462 = arith.constant 0 : index
    %475 = vector.load %arg42[%c12, %c0_461, %c0_462] : memref<27x16x128xf32, #tpu.memory_space<vmem>>, vector<1x16x128xf32>
    %476 = vector.shape_cast %475 : vector<1x16x128xf32> to vector<16x128xf32>
    %cst_463 = arith.constant dense<0.000000e+00> : vector<2x128xf32>
    %477 = tpu.matmul %474, %476, %cst_463 {dimension_numbers = #tpu.dot_dimension_numbers<[1], [0], [0], [1], [0, 0, 1, 1], [], []>} : vector<2x16xf32>, vector<16x128xf32>, vector<2x128xf32> -> vector<2x128xf32>
    %478 = arith.addf %473, %477 : vector<2x128xf32>
    %479 = vector.extract_strided_slice %411 {offsets = [8, 0], sizes = [2, 16], strides = [1, 1]} : vector<18x16xf32> to vector<2x16xf32>
    %c13 = arith.constant 13 : index
    %c0_464 = arith.constant 0 : index
    %c0_465 = arith.constant 0 : index
    %480 = vector.load %arg42[%c13, %c0_464, %c0_465] : memref<27x16x128xf32, #tpu.memory_space<vmem>>, vector<1x16x128xf32>
    %481 = vector.shape_cast %480 : vector<1x16x128xf32> to vector<16x128xf32>
    %cst_466 = arith.constant dense<0.000000e+00> : vector<2x128xf32>
    %482 = tpu.matmul %479, %481, %cst_466 {dimension_numbers = #tpu.dot_dimension_numbers<[1], [0], [0], [1], [0, 0, 1, 1], [], []>} : vector<2x16xf32>, vector<16x128xf32>, vector<2x128xf32> -> vector<2x128xf32>
    %483 = arith.addf %478, %482 : vector<2x128xf32>
    %484 = vector.extract_strided_slice %411 {offsets = [10, 0], sizes = [2, 16], strides = [1, 1]} : vector<18x16xf32> to vector<2x16xf32>
    %c14 = arith.constant 14 : index
    %c0_467 = arith.constant 0 : index
    %c0_468 = arith.constant 0 : index
    %485 = vector.load %arg42[%c14, %c0_467, %c0_468] : memref<27x16x128xf32, #tpu.memory_space<vmem>>, vector<1x16x128xf32>
    %486 = vector.shape_cast %485 : vector<1x16x128xf32> to vector<16x128xf32>
    %cst_469 = arith.constant dense<0.000000e+00> : vector<2x128xf32>
    %487 = tpu.matmul %484, %486, %cst_469 {dimension_numbers = #tpu.dot_dimension_numbers<[1], [0], [0], [1], [0, 0, 1, 1], [], []>} : vector<2x16xf32>, vector<16x128xf32>, vector<2x128xf32> -> vector<2x128xf32>
    %488 = arith.addf %483, %487 : vector<2x128xf32>
    %489 = vector.extract_strided_slice %411 {offsets = [12, 0], sizes = [2, 16], strides = [1, 1]} : vector<18x16xf32> to vector<2x16xf32>
    %c15 = arith.constant 15 : index
    %c0_470 = arith.constant 0 : index
    %c0_471 = arith.constant 0 : index
    %490 = vector.load %arg42[%c15, %c0_470, %c0_471] : memref<27x16x128xf32, #tpu.memory_space<vmem>>, vector<1x16x128xf32>
    %491 = vector.shape_cast %490 : vector<1x16x128xf32> to vector<16x128xf32>
    %cst_472 = arith.constant dense<0.000000e+00> : vector<2x128xf32>
    %492 = tpu.matmul %489, %491, %cst_472 {dimension_numbers = #tpu.dot_dimension_numbers<[1], [0], [0], [1], [0, 0, 1, 1], [], []>} : vector<2x16xf32>, vector<16x128xf32>, vector<2x128xf32> -> vector<2x128xf32>
    %493 = arith.addf %488, %492 : vector<2x128xf32>
    %494 = vector.extract_strided_slice %411 {offsets = [14, 0], sizes = [2, 16], strides = [1, 1]} : vector<18x16xf32> to vector<2x16xf32>
    %c16 = arith.constant 16 : index
    %c0_473 = arith.constant 0 : index
    %c0_474 = arith.constant 0 : index
    %495 = vector.load %arg42[%c16, %c0_473, %c0_474] : memref<27x16x128xf32, #tpu.memory_space<vmem>>, vector<1x16x128xf32>
    %496 = vector.shape_cast %495 : vector<1x16x128xf32> to vector<16x128xf32>
    %cst_475 = arith.constant dense<0.000000e+00> : vector<2x128xf32>
    %497 = tpu.matmul %494, %496, %cst_475 {dimension_numbers = #tpu.dot_dimension_numbers<[1], [0], [0], [1], [0, 0, 1, 1], [], []>} : vector<2x16xf32>, vector<16x128xf32>, vector<2x128xf32> -> vector<2x128xf32>
    %498 = arith.addf %493, %497 : vector<2x128xf32>
    %499 = vector.extract_strided_slice %411 {offsets = [16, 0], sizes = [2, 16], strides = [1, 1]} : vector<18x16xf32> to vector<2x16xf32>
    %c17 = arith.constant 17 : index
    %c0_476 = arith.constant 0 : index
    %c0_477 = arith.constant 0 : index
    %500 = vector.load %arg42[%c17, %c0_476, %c0_477] : memref<27x16x128xf32, #tpu.memory_space<vmem>>, vector<1x16x128xf32>
    %501 = vector.shape_cast %500 : vector<1x16x128xf32> to vector<16x128xf32>
    %cst_478 = arith.constant dense<0.000000e+00> : vector<2x128xf32>
    %502 = tpu.matmul %499, %501, %cst_478 {dimension_numbers = #tpu.dot_dimension_numbers<[1], [0], [0], [1], [0, 0, 1, 1], [], []>} : vector<2x16xf32>, vector<16x128xf32>, vector<2x128xf32> -> vector<2x128xf32>
    %503 = arith.addf %498, %502 : vector<2x128xf32>
    %504 = vector.extract_strided_slice %412 {offsets = [0, 0], sizes = [2, 16], strides = [1, 1]} : vector<18x16xf32> to vector<2x16xf32>
    %c18 = arith.constant 18 : index
    %c0_479 = arith.constant 0 : index
    %c0_480 = arith.constant 0 : index
    %505 = vector.load %arg42[%c18, %c0_479, %c0_480] : memref<27x16x128xf32, #tpu.memory_space<vmem>>, vector<1x16x128xf32>
    %506 = vector.shape_cast %505 : vector<1x16x128xf32> to vector<16x128xf32>
    %cst_481 = arith.constant dense<0.000000e+00> : vector<2x128xf32>
    %507 = tpu.matmul %504, %506, %cst_481 {dimension_numbers = #tpu.dot_dimension_numbers<[1], [0], [0], [1], [0, 0, 1, 1], [], []>} : vector<2x16xf32>, vector<16x128xf32>, vector<2x128xf32> -> vector<2x128xf32>
    %508 = arith.addf %503, %507 : vector<2x128xf32>
    %509 = vector.extract_strided_slice %412 {offsets = [2, 0], sizes = [2, 16], strides = [1, 1]} : vector<18x16xf32> to vector<2x16xf32>
    %c19 = arith.constant 19 : index
    %c0_482 = arith.constant 0 : index
    %c0_483 = arith.constant 0 : index
    %510 = vector.load %arg42[%c19, %c0_482, %c0_483] : memref<27x16x128xf32, #tpu.memory_space<vmem>>, vector<1x16x128xf32>
    %511 = vector.shape_cast %510 : vector<1x16x128xf32> to vector<16x128xf32>
    %cst_484 = arith.constant dense<0.000000e+00> : vector<2x128xf32>
    %512 = tpu.matmul %509, %511, %cst_484 {dimension_numbers = #tpu.dot_dimension_numbers<[1], [0], [0], [1], [0, 0, 1, 1], [], []>} : vector<2x16xf32>, vector<16x128xf32>, vector<2x128xf32> -> vector<2x128xf32>
    %513 = arith.addf %508, %512 : vector<2x128xf32>
    %514 = vector.extract_strided_slice %412 {offsets = [4, 0], sizes = [2, 16], strides = [1, 1]} : vector<18x16xf32> to vector<2x16xf32>
    %c20 = arith.constant 20 : index
    %c0_485 = arith.constant 0 : index
    %c0_486 = arith.constant 0 : index
    %515 = vector.load %arg42[%c20, %c0_485, %c0_486] : memref<27x16x128xf32, #tpu.memory_space<vmem>>, vector<1x16x128xf32>
    %516 = vector.shape_cast %515 : vector<1x16x128xf32> to vector<16x128xf32>
    %cst_487 = arith.constant dense<0.000000e+00> : vector<2x128xf32>
    %517 = tpu.matmul %514, %516, %cst_487 {dimension_numbers = #tpu.dot_dimension_numbers<[1], [0], [0], [1], [0, 0, 1, 1], [], []>} : vector<2x16xf32>, vector<16x128xf32>, vector<2x128xf32> -> vector<2x128xf32>
    %518 = arith.addf %513, %517 : vector<2x128xf32>
    %519 = vector.extract_strided_slice %412 {offsets = [6, 0], sizes = [2, 16], strides = [1, 1]} : vector<18x16xf32> to vector<2x16xf32>
    %c21 = arith.constant 21 : index
    %c0_488 = arith.constant 0 : index
    %c0_489 = arith.constant 0 : index
    %520 = vector.load %arg42[%c21, %c0_488, %c0_489] : memref<27x16x128xf32, #tpu.memory_space<vmem>>, vector<1x16x128xf32>
    %521 = vector.shape_cast %520 : vector<1x16x128xf32> to vector<16x128xf32>
    %cst_490 = arith.constant dense<0.000000e+00> : vector<2x128xf32>
    %522 = tpu.matmul %519, %521, %cst_490 {dimension_numbers = #tpu.dot_dimension_numbers<[1], [0], [0], [1], [0, 0, 1, 1], [], []>} : vector<2x16xf32>, vector<16x128xf32>, vector<2x128xf32> -> vector<2x128xf32>
    %523 = arith.addf %518, %522 : vector<2x128xf32>
    %524 = vector.extract_strided_slice %412 {offsets = [8, 0], sizes = [2, 16], strides = [1, 1]} : vector<18x16xf32> to vector<2x16xf32>
    %c22 = arith.constant 22 : index
    %c0_491 = arith.constant 0 : index
    %c0_492 = arith.constant 0 : index
    %525 = vector.load %arg42[%c22, %c0_491, %c0_492] : memref<27x16x128xf32, #tpu.memory_space<vmem>>, vector<1x16x128xf32>
    %526 = vector.shape_cast %525 : vector<1x16x128xf32> to vector<16x128xf32>
    %cst_493 = arith.constant dense<0.000000e+00> : vector<2x128xf32>
    %527 = tpu.matmul %524, %526, %cst_493 {dimension_numbers = #tpu.dot_dimension_numbers<[1], [0], [0], [1], [0, 0, 1, 1], [], []>} : vector<2x16xf32>, vector<16x128xf32>, vector<2x128xf32> -> vector<2x128xf32>
    %528 = arith.addf %523, %527 : vector<2x128xf32>
    %529 = vector.extract_strided_slice %412 {offsets = [10, 0], sizes = [2, 16], strides = [1, 1]} : vector<18x16xf32> to vector<2x16xf32>
    %c23 = arith.constant 23 : index
    %c0_494 = arith.constant 0 : index
    %c0_495 = arith.constant 0 : index
    %530 = vector.load %arg42[%c23, %c0_494, %c0_495] : memref<27x16x128xf32, #tpu.memory_space<vmem>>, vector<1x16x128xf32>
    %531 = vector.shape_cast %530 : vector<1x16x128xf32> to vector<16x128xf32>
    %cst_496 = arith.constant dense<0.000000e+00> : vector<2x128xf32>
    %532 = tpu.matmul %529, %531, %cst_496 {dimension_numbers = #tpu.dot_dimension_numbers<[1], [0], [0], [1], [0, 0, 1, 1], [], []>} : vector<2x16xf32>, vector<16x128xf32>, vector<2x128xf32> -> vector<2x128xf32>
    %533 = arith.addf %528, %532 : vector<2x128xf32>
    %534 = vector.extract_strided_slice %412 {offsets = [12, 0], sizes = [2, 16], strides = [1, 1]} : vector<18x16xf32> to vector<2x16xf32>
    %c24 = arith.constant 24 : index
    %c0_497 = arith.constant 0 : index
    %c0_498 = arith.constant 0 : index
    %535 = vector.load %arg42[%c24, %c0_497, %c0_498] : memref<27x16x128xf32, #tpu.memory_space<vmem>>, vector<1x16x128xf32>
    %536 = vector.shape_cast %535 : vector<1x16x128xf32> to vector<16x128xf32>
    %cst_499 = arith.constant dense<0.000000e+00> : vector<2x128xf32>
    %537 = tpu.matmul %534, %536, %cst_499 {dimension_numbers = #tpu.dot_dimension_numbers<[1], [0], [0], [1], [0, 0, 1, 1], [], []>} : vector<2x16xf32>, vector<16x128xf32>, vector<2x128xf32> -> vector<2x128xf32>
    %538 = arith.addf %533, %537 : vector<2x128xf32>
    %539 = vector.extract_strided_slice %412 {offsets = [14, 0], sizes = [2, 16], strides = [1, 1]} : vector<18x16xf32> to vector<2x16xf32>
    %c25 = arith.constant 25 : index
    %c0_500 = arith.constant 0 : index
    %c0_501 = arith.constant 0 : index
    %540 = vector.load %arg42[%c25, %c0_500, %c0_501] : memref<27x16x128xf32, #tpu.memory_space<vmem>>, vector<1x16x128xf32>
    %541 = vector.shape_cast %540 : vector<1x16x128xf32> to vector<16x128xf32>
    %cst_502 = arith.constant dense<0.000000e+00> : vector<2x128xf32>
    %542 = tpu.matmul %539, %541, %cst_502 {dimension_numbers = #tpu.dot_dimension_numbers<[1], [0], [0], [1], [0, 0, 1, 1], [], []>} : vector<2x16xf32>, vector<16x128xf32>, vector<2x128xf32> -> vector<2x128xf32>
    %543 = arith.addf %538, %542 : vector<2x128xf32>
    %544 = vector.extract_strided_slice %412 {offsets = [16, 0], sizes = [2, 16], strides = [1, 1]} : vector<18x16xf32> to vector<2x16xf32>
    %c26 = arith.constant 26 : index
    %c0_503 = arith.constant 0 : index
    %c0_504 = arith.constant 0 : index
    %545 = vector.load %arg42[%c26, %c0_503, %c0_504] : memref<27x16x128xf32, #tpu.memory_space<vmem>>, vector<1x16x128xf32>
    %546 = vector.shape_cast %545 : vector<1x16x128xf32> to vector<16x128xf32>
    %cst_505 = arith.constant dense<0.000000e+00> : vector<2x128xf32>
    %547 = tpu.matmul %544, %546, %cst_505 {dimension_numbers = #tpu.dot_dimension_numbers<[1], [0], [0], [1], [0, 0, 1, 1], [], []>} : vector<2x16xf32>, vector<16x128xf32>, vector<2x128xf32> -> vector<2x128xf32>
    %548 = arith.addf %543, %547 : vector<2x128xf32>
    %c0_506 = arith.constant 0 : index
    %c0_507 = arith.constant 0 : index
    %549 = vector.load %arg43[%c0_506, %c0_507] : memref<1x128xf32, #tpu.memory_space<vmem>>, vector<1x128xf32>
    %550 = vector.broadcast %549 : vector<1x128xf32> to vector<2x128xf32>
    %551 = arith.addf %548, %550 : vector<2x128xf32>
    %cst_508 = arith.constant 0.000000e+00 : f32
    %552 = vector.broadcast %cst_508 : f32 to vector<2x128xf32>
    %553 = arith.maximumf %551, %552 : vector<2x128xf32>
    %c0_509 = arith.constant 0 : index
    %c0_510 = arith.constant 0 : index
    %554 = vector.load %arg44[%c0_509, %c0_510] : memref<128x4xf32, #tpu.memory_space<vmem>>, vector<128x4xf32>
    %cst_511 = arith.constant dense<0.000000e+00> : vector<2x4xf32>
    %555 = tpu.matmul %553, %554, %cst_511 {dimension_numbers = #tpu.dot_dimension_numbers<[1], [0], [0], [1], [0, 0, 1, 1], [], []>} : vector<2x128xf32>, vector<128x4xf32>, vector<2x4xf32> -> vector<2x4xf32>
    %c0_512 = arith.constant 0 : index
    %c0_513 = arith.constant 0 : index
    %556 = vector.load %arg45[%c0_512, %c0_513] : memref<1x4xf32, #tpu.memory_space<vmem>>, vector<1x4xf32>
    %557 = vector.broadcast %556 : vector<1x4xf32> to vector<2x4xf32>
    %558 = arith.addf %555, %557 : vector<2x4xf32>
    %c0_514 = arith.constant 0 : index
    %c0_515 = arith.constant 0 : index
    %559 = vector.load %arg46[%c0_514, %c0_515] : memref<2x4xf32, #tpu.memory_space<vmem>>, vector<2x4xf32>
    tpu.vector_store %arg46[%c0_514, %c0_515], %558 {strides = array<i32>} : memref<2x4xf32, #tpu.memory_space<vmem>>, vector<2x4xf32>,
    return
  }
  func.func @transform_0(%arg0: i32) -> (i32, i32) {
    %c0_i32 = arith.constant 0 : i32
    %c0_i32_0 = arith.constant 0 : i32
    %c0_i32_1 = arith.constant 0 : i32
    return %c0_i32, %c0_i32_0 : i32, i32
  }
  func.func @transform_1(%arg0: i32) -> (i32, i32) {
    %c0_i32 = arith.constant 0 : i32
    %c0_i32_0 = arith.constant 0 : i32
    %c0_i32_1 = arith.constant 0 : i32
    return %c0_i32, %c0_i32_0 : i32, i32
  }
  func.func @transform_2(%arg0: i32) -> (i32, i32) {
    %c0_i32 = arith.constant 0 : i32
    %c0_i32_0 = arith.constant 0 : i32
    %c0_i32_1 = arith.constant 0 : i32
    return %c0_i32, %c0_i32_0 : i32, i32
  }
  func.func @transform_3(%arg0: i32) -> (i32, i32, i32) {
    %c0_i32 = arith.constant 0 : i32
    %c0_i32_0 = arith.constant 0 : i32
    %c0_i32_1 = arith.constant 0 : i32
    %c0_i32_2 = arith.constant 0 : i32
    return %c0_i32, %c0_i32_0, %c0_i32_1 : i32, i32, i32
  }
  func.func @transform_4(%arg0: i32) -> (i32, i32, i32) {
    %c0_i32 = arith.constant 0 : i32
    %c0_i32_0 = arith.constant 0 : i32
    %c0_i32_1 = arith.constant 0 : i32
    %c0_i32_2 = arith.constant 0 : i32
    return %c0_i32, %c0_i32_0, %c0_i32_1 : i32, i32, i32
  }
  func.func @transform_5(%arg0: i32) -> (i32, i32) {
    %c0_i32 = arith.constant 0 : i32
    %c0_i32_0 = arith.constant 0 : i32
    %c0_i32_1 = arith.constant 0 : i32
    return %c0_i32, %c0_i32_0 : i32, i32
  }
  func.func @transform_6(%arg0: i32) -> (i32, i32, i32) {
    %c0_i32 = arith.constant 0 : i32
    %c0_i32_0 = arith.constant 0 : i32
    %c0_i32_1 = arith.constant 0 : i32
    %c0_i32_2 = arith.constant 0 : i32
    return %c0_i32, %c0_i32_0, %c0_i32_1 : i32, i32, i32
  }
  func.func @transform_7(%arg0: i32) -> (i32, i32, i32) {
    %c0_i32 = arith.constant 0 : i32
    %c0_i32_0 = arith.constant 0 : i32
    %c0_i32_1 = arith.constant 0 : i32
    %c0_i32_2 = arith.constant 0 : i32
    return %c0_i32, %c0_i32_0, %c0_i32_1 : i32, i32, i32
  }
  func.func @transform_8(%arg0: i32) -> (i32, i32) {
    %c0_i32 = arith.constant 0 : i32
    %c0_i32_0 = arith.constant 0 : i32
    %c0_i32_1 = arith.constant 0 : i32
    return %c0_i32, %c0_i32_0 : i32, i32
  }
  func.func @transform_9(%arg0: i32) -> (i32, i32) {
    %c0_i32 = arith.constant 0 : i32
    %c0_i32_0 = arith.constant 0 : i32
    %c0_i32_1 = arith.constant 0 : i32
    return %c0_i32, %c0_i32_0 : i32, i32
  }
  func.func @transform_10(%arg0: i32) -> (i32, i32) {
    %c0_i32 = arith.constant 0 : i32
    %c0_i32_0 = arith.constant 0 : i32
    %c0_i32_1 = arith.constant 0 : i32
    return %c0_i32, %c0_i32_0 : i32, i32
  }
  func.func @transform_11(%arg0: i32) -> (i32, i32) {
    %c0_i32 = arith.constant 0 : i32
    %c0_i32_0 = arith.constant 0 : i32
    %c0_i32_1 = arith.constant 0 : i32
    return %c0_i32, %c0_i32_0 : i32, i32
  }
  func.func @transform_12(%arg0: i32) -> (i32, i32) {
    %c0_i32 = arith.constant 0 : i32
    %c0_i32_0 = arith.constant 0 : i32
    %c0_i32_1 = arith.constant 0 : i32
    return %c0_i32, %c0_i32_0 : i32, i32
  }
  func.func @transform_13(%arg0: i32) -> (i32, i32) {
    %c0_i32 = arith.constant 0 : i32
    %c0_i32_0 = arith.constant 0 : i32
    %c0_i32_1 = arith.constant 0 : i32
    return %c0_i32, %c0_i32_0 : i32, i32
  }
  func.func @transform_14(%arg0: i32) -> (i32, i32) {
    %c0_i32 = arith.constant 0 : i32
    %c0_i32_0 = arith.constant 0 : i32
    %c0_i32_1 = arith.constant 0 : i32
    return %c0_i32, %c0_i32_0 : i32, i32
  }
  func.func @transform_15(%arg0: i32) -> (i32, i32) {
    %c0_i32 = arith.constant 0 : i32
    %c0_i32_0 = arith.constant 0 : i32
    %c0_i32_1 = arith.constant 0 : i32
    return %c0_i32, %c0_i32_0 : i32, i32
  }
  func.func @transform_16(%arg0: i32) -> (i32, i32) {
    %c0_i32 = arith.constant 0 : i32
    %c0_i32_0 = arith.constant 0 : i32
    %c0_i32_1 = arith.constant 0 : i32
    return %c0_i32, %c0_i32_0 : i32, i32
  }
  func.func @transform_17(%arg0: i32) -> (i32, i32) {
    %c0_i32 = arith.constant 0 : i32
    %c0_i32_0 = arith.constant 0 : i32
    %c0_i32_1 = arith.constant 0 : i32
    return %c0_i32, %c0_i32_0 : i32, i32
  }
  func.func @transform_18(%arg0: i32) -> (i32, i32) {
    %c0_i32 = arith.constant 0 : i32
    %c0_i32_0 = arith.constant 0 : i32
    %c0_i32_1 = arith.constant 0 : i32
    return %c0_i32, %c0_i32_0 : i32, i32
  }
  func.func @transform_19(%arg0: i32) -> (i32, i32) {
    %c0_i32 = arith.constant 0 : i32
    %c0_i32_0 = arith.constant 0 : i32
    %c0_i32_1 = arith.constant 0 : i32
    return %c0_i32, %c0_i32_0 : i32, i32
  }
  func.func @transform_20(%arg0: i32) -> (i32, i32) {
    %c0_i32 = arith.constant 0 : i32
    %c0_i32_0 = arith.constant 0 : i32
    %c0_i32_1 = arith.constant 0 : i32
    return %c0_i32, %c0_i32_0 : i32, i32
  }
  func.func @transform_21(%arg0: i32) -> (i32, i32, i32) {
    %c0_i32 = arith.constant 0 : i32
    %c0_i32_0 = arith.constant 0 : i32
    %c0_i32_1 = arith.constant 0 : i32
    %c0_i32_2 = arith.constant 0 : i32
    return %c0_i32, %c0_i32_0, %c0_i32_1 : i32, i32, i32
  }
  func.func @transform_22(%arg0: i32) -> (i32, i32, i32) {
    %c0_i32 = arith.constant 0 : i32
    %c0_i32_0 = arith.constant 0 : i32
    %c0_i32_1 = arith.constant 0 : i32
    %c0_i32_2 = arith.constant 0 : i32
    return %c0_i32, %c0_i32_0, %c0_i32_1 : i32, i32, i32
  }
  func.func @transform_23(%arg0: i32) -> (i32, i32) {
    %c0_i32 = arith.constant 0 : i32
    %c0_i32_0 = arith.constant 0 : i32
    %c0_i32_1 = arith.constant 0 : i32
    return %c0_i32, %c0_i32_0 : i32, i32
  }
  func.func @transform_24(%arg0: i32) -> (i32, i32, i32) {
    %c0_i32 = arith.constant 0 : i32
    %c0_i32_0 = arith.constant 0 : i32
    %c0_i32_1 = arith.constant 0 : i32
    %c0_i32_2 = arith.constant 0 : i32
    return %c0_i32, %c0_i32_0, %c0_i32_1 : i32, i32, i32
  }
  func.func @transform_25(%arg0: i32) -> (i32, i32, i32) {
    %c0_i32 = arith.constant 0 : i32
    %c0_i32_0 = arith.constant 0 : i32
    %c0_i32_1 = arith.constant 0 : i32
    %c0_i32_2 = arith.constant 0 : i32
    return %c0_i32, %c0_i32_0, %c0_i32_1 : i32, i32, i32
  }
  func.func @transform_26(%arg0: i32) -> (i32, i32) {
    %c0_i32 = arith.constant 0 : i32
    %c0_i32_0 = arith.constant 0 : i32
    %c0_i32_1 = arith.constant 0 : i32
    return %c0_i32, %c0_i32_0 : i32, i32
  }
  func.func @transform_27(%arg0: i32) -> (i32, i32, i32) {
    %c0_i32 = arith.constant 0 : i32
    %c0_i32_0 = arith.constant 0 : i32
    %c0_i32_1 = arith.constant 0 : i32
    %c0_i32_2 = arith.constant 0 : i32
    return %c0_i32, %c0_i32_0, %c0_i32_1 : i32, i32, i32
  }
  func.func @transform_28(%arg0: i32) -> (i32, i32, i32) {
    %c0_i32 = arith.constant 0 : i32
    %c0_i32_0 = arith.constant 0 : i32
    %c0_i32_1 = arith.constant 0 : i32
    %c0_i32_2 = arith.constant 0 : i32
    return %c0_i32, %c0_i32_0, %c0_i32_1 : i32, i32, i32
  }
  func.func @transform_29(%arg0: i32) -> (i32, i32) {
    %c0_i32 = arith.constant 0 : i32
    %c0_i32_0 = arith.constant 0 : i32
    %c0_i32_1 = arith.constant 0 : i32
    return %c0_i32, %c0_i32_0 : i32, i32
  }
  func.func @transform_30(%arg0: i32) -> (i32, i32, i32) {
    %c0_i32 = arith.constant 0 : i32
    %c0_i32_0 = arith.constant 0 : i32
    %c0_i32_1 = arith.constant 0 : i32
    %c0_i32_2 = arith.constant 0 : i32
    return %c0_i32, %c0_i32_0, %c0_i32_1 : i32, i32, i32
  }
  func.func @transform_31(%arg0: i32) -> (i32, i32, i32) {
    %c0_i32 = arith.constant 0 : i32
    %c0_i32_0 = arith.constant 0 : i32
    %c0_i32_1 = arith.constant 0 : i32
    %c0_i32_2 = arith.constant 0 : i32
    return %c0_i32, %c0_i32_0, %c0_i32_1 : i32, i32, i32
  }
  func.func @transform_32(%arg0: i32) -> (i32, i32) {
    %c0_i32 = arith.constant 0 : i32
    %c0_i32_0 = arith.constant 0 : i32
    %c0_i32_1 = arith.constant 0 : i32
    return %c0_i32, %c0_i32_0 : i32, i32
  }
  func.func @transform_33(%arg0: i32) -> (i32, i32) {
    %c0_i32 = arith.constant 0 : i32
    %c0_i32_0 = arith.constant 0 : i32
    %c0_i32_1 = arith.constant 0 : i32
    return %c0_i32, %c0_i32_0 : i32, i32
  }
  func.func @transform_34(%arg0: i32) -> (i32, i32) {
    %c0_i32 = arith.constant 0 : i32
    %c0_i32_0 = arith.constant 0 : i32
    %c0_i32_1 = arith.constant 0 : i32
    return %c0_i32, %c0_i32_0 : i32, i32
  }
  func.func @transform_35(%arg0: i32) -> (i32, i32) {
    %c0_i32 = arith.constant 0 : i32
    %c0_i32_0 = arith.constant 0 : i32
    %c0_i32_1 = arith.constant 0 : i32
    return %c0_i32, %c0_i32_0 : i32, i32
  }
  func.func @transform_36(%arg0: i32) -> (i32, i32) {
    %c0_i32 = arith.constant 0 : i32
    %c0_i32_0 = arith.constant 0 : i32
    %c0_i32_1 = arith.constant 0 : i32
    return %c0_i32, %c0_i32_0 : i32, i32
  }
  func.func @transform_37(%arg0: i32) -> (i32, i32) {
    %c0_i32 = arith.constant 0 : i32
    %c0_i32_0 = arith.constant 0 : i32
    %c0_i32_1 = arith.constant 0 : i32
    return %c0_i32, %c0_i32_0 : i32, i32
  }
  func.func @transform_38(%arg0: i32) -> (i32, i32) {
    %c0_i32 = arith.constant 0 : i32
    %c0_i32_0 = arith.constant 0 : i32
    %c0_i32_1 = arith.constant 0 : i32
    return %c0_i32, %c0_i32_0 : i32, i32
  }
  func.func @transform_39(%arg0: i32) -> (i32, i32) {
    %c0_i32 = arith.constant 0 : i32
    %c0_i32_0 = arith.constant 0 : i32
    %c0_i32_1 = arith.constant 0 : i32
    return %c0_i32, %c0_i32_0 : i32, i32
  }
  func.func @transform_40(%arg0: i32) -> (i32, i32) {
    %c0_i32 = arith.constant 0 : i32
    %c0_i32_0 = arith.constant 0 : i32
    %c0_i32_1 = arith.constant 0 : i32
    return %c0_i32, %c0_i32_0 : i32, i32
  }
  func.func @transform_41(%arg0: i32) -> (i32, i32, i32) {
    %c0_i32 = arith.constant 0 : i32
    %c0_i32_0 = arith.constant 0 : i32
    %c0_i32_1 = arith.constant 0 : i32
    %c0_i32_2 = arith.constant 0 : i32
    return %c0_i32, %c0_i32_0, %c0_i32_1 : i32, i32, i32
  }
  func.func @transform_42(%arg0: i32) -> (i32, i32) {
    %c0_i32 = arith.constant 0 : i32
    %c0_i32_0 = arith.constant 0 : i32
    %c0_i32_1 = arith.constant 0 : i32
    return %c0_i32, %c0_i32_0 : i32, i32
  }
  func.func @transform_43(%arg0: i32) -> (i32, i32) {
    %c0_i32 = arith.constant 0 : i32
    %c0_i32_0 = arith.constant 0 : i32
    %c0_i32_1 = arith.constant 0 : i32
    return %c0_i32, %c0_i32_0 : i32, i32
  }
  func.func @transform_44(%arg0: i32) -> (i32, i32) {
    %c0_i32 = arith.constant 0 : i32
    %c0_i32_0 = arith.constant 0 : i32
    %c0_i32_1 = arith.constant 0 : i32
    return %c0_i32, %c0_i32_0 : i32, i32
  }
  func.func @transform_45(%arg0: i32) -> (i32, i32) {
    %c0_i32 = arith.constant 0 : i32
    %c0_i32_0 = arith.constant 0 : i32
    %c0_i32_1 = arith.constant 0 : i32
    return %c0_i32, %c0_i32_0 : i32, i32
  }
}

</mosaic_0001>

<bundles_post_ra>
// kernel: ampcnet_forward.1
= control target key start
LH: loop header
LB: loop body
LE: loop exit
PB: predicated region body
PF: predicated region fallthrough
CT: control target
= control target key end

     0   :  { %s14846_s6 = smov 1   ;;  %s14847_s10 = smov 2   ;;  %s16604_s0 = inlined_call_operand.smem [shape: u32[46], index: -1, kind: input, shape index: {}] }
   0x1   :  { %s14906_s5 = sld [smem:[%s16604_s0]]   ;;  %s14848_s14 = smov 3  }
   0x2   :  { %s14911_s9 = sld [smem:[%s16604_s0 + %s14846_s6]]   ;;  %s14849_s18 = smov 4  }
   0x3   :  { %s14916_s13 = sld [smem:[%s16604_s0 + %s14847_s10]]   ;;  %s14850_s22 = smov 5  }
   0x4   :  { %s14921_s17 = sld [smem:[%s16604_s0 + %s14848_s14]]   ;;  %s14851_s26 = smov 6  }
   0x5   :  { %s14926_s21 = sld [smem:[%s16604_s0 + %s14849_s18]]   ;;  %s14852_s30 = smov 7  }
   0x6   :  { %s14931_s25 = sld [smem:[%s16604_s0 + %s14850_s22]]   ;;  %s14853_s4 = smov 8  }
   0x7   :  { %s14936_s29 = sld [smem:[%s16604_s0 + %s14851_s26]]   ;;  %s14854_s10 = smov 9  }
   0x8   :  { %s14941_s3 = sld [smem:[%s16604_s0 + %s14852_s30]]   ;;  %s14855_s15 = smov 10  }
   0x9   :  { %s14946_s8 = sld [smem:[%s16604_s0 + %s14853_s4]]   ;;  %s14856_s20 = smov 11  }
   0xa   :  { %s14951_s14 = sld [smem:[%s16604_s0 + %s14854_s10]]   ;;  %s14857_s26 = smov 12  }
   0xb   :  { %s14956_s19 = sld [smem:[%s16604_s0 + %s14855_s15]]   ;;  %s14858_s1 = smov 13  }
   0xc   :  { %s14961_s24 = sld [smem:[%s16604_s0 + %s14856_s20]]   ;;  %s14859_s7 = smov 14  }
   0xd   :  { %s14966_s30 = sld [smem:[%s16604_s0 + %s14857_s26]]   ;;  %s14860_s15 = smov 15  }
   0xe   :  { %s14971_s6 = sld [smem:[%s16604_s0 + %s14858_s1]]   ;;  %s14861_s22 = smov 16  }
   0xf   :  { %s14976_s12 = sld [smem:[%s16604_s0 + %s14859_s7]]   ;;  %s14862_s28 = smov 17  }
  0x10   :  { %s14981_s20 = sld [smem:[%s16604_s0 + %s14860_s15]]   ;;  %s14863_s7 = smov 18  }
  0x11   :  { %s14986_s27 = sld [smem:[%s16604_s0 + %s14861_s22]]   ;;  %s14864_s15 = smov 19  }
  0x12   :  { %s14991_s4 = sld [smem:[%s16604_s0 + %s14862_s28]]   ;;  %s14865_s22 = smov 20  }
  0x13   :  { %s14866_s28 = smov 21  }
  0x14   :  { %16622 = sst [smem:[#allocation11_spill]] %s14971_s6 }
  0x15   :  { %16623 = sst [smem:[#allocation12_spill]] %s14976_s12 }
  0x16   :  { %16624 = sst [smem:[#allocation13_spill]] %s14981_s20 }
  0x17   :  { %16625 = sst [smem:[#allocation14_spill]] %s14986_s27 }
  0x18   :  { %16626 = sst [smem:[#allocation15_spill]] %s14991_s4 }
  0x19   :  { %s14996_s6 = sld [smem:[%s16604_s0 + %s14863_s7]]   ;;  %s14867_s7 = smov 22  }
  0x1a   :  { %s15001_s20 = sld [smem:[%s16604_s0 + %s14864_s15]]   ;;  %s14868_s15 = smov 23  }
  0x1b   :  { %s15006_s27 = sld [smem:[%s16604_s0 + %s14865_s22]]   ;;  %s14869_s22 = smov 24  }
  0x1c   :  { %s15011_s4 = sld [smem:[%s16604_s0 + %s14866_s28]]   ;;  %s14870_s28 = smov 25  }
  0x1d   :  { %s15016_s12 = sld [smem:[%s16604_s0 + %s14867_s7]]   ;;  %s14871_s7 = smov 26  }
  0x1f   :  { %16627 = sst [smem:[#allocation16_spill]] %s14996_s6 }
  0x20   :  { %s15021_s6 = sld [smem:[%s16604_s0 + %s14868_s15]]   ;;  %s14872_s15 = smov 27  }
  0x21   :  { %16628 = sst [smem:[#allocation17_spill]] %s15006_s27 }
  0x22   :  { %16629 = sst [smem:[#allocation18_spill]] %s15011_s4 }
  0x23   :  { %16630 = sst [smem:[#allocation19_spill]] %s15016_s12 }
  0x24   :  { %s15026_s27 = sld [smem:[%s16604_s0 + %s14869_s22]]   ;;  %s14873_s22 = smov 28  }
  0x25   :  { %s15031_s4 = sld [smem:[%s16604_s0 + %s14870_s28]]   ;;  %s14874_s28 = smov 29  }
  0x26   :  { %16631 = sst [smem:[#allocation20_spill]] %s15021_s6 }
  0x27   :  { %s15036_s12 = sld [smem:[%s16604_s0 + %s14871_s7]]   ;;  %s14875_s7 = smov 30  }
  0x28   :  { %s15041_s6 = sld [smem:[%s16604_s0 + %s14872_s15]]   ;;  %s14876_s15 = smov 31  }
  0x2a   :  { %16632 = sst [smem:[#allocation21_spill]] %s15026_s27 }
  0x2b   :  { %16633 = sst [smem:[#allocation22_spill]] %s15031_s4 }
  0x2c   :  { %s15046_s27 = sld [smem:[%s16604_s0 + %s14873_s22]]   ;;  %s14877_s22 = smov 32  }
  0x2d   :  { %16634 = sst [smem:[#allocation23_spill]] %s15036_s12 }
  0x2e   :  { %16635 = sst [smem:[#allocation24_spill]] %s15041_s6 }
  0x2f   :  { %s15051_s4 = sld [smem:[%s16604_s0 + %s14874_s28]]   ;;  %s14878_s28 = smov 33  }
  0x30   :  { %s15056_s12 = sld [smem:[%s16604_s0 + %s14875_s7]]   ;;  %s14879_s7 = smov 34  }
  0x31   :  { %s15061_s6 = sld [smem:[%s16604_s0 + %s14876_s15]]   ;;  %s14880_s15 = smov 35  }
  0x32   :  { %16636 = sst [smem:[#allocation25_spill]] %s15046_s27 }
  0x33   :  { %s15066_s27 = sld [smem:[%s16604_s0 + %s14877_s22]]   ;;  %s14881_s22 = smov 36  }
  0x35   :  { %16637 = sst [smem:[#allocation26_spill]] %s15051_s4 }
  0x36   :  { %16638 = sst [smem:[#allocation27_spill]] %s15056_s12 }
  0x37   :  { %16639 = sst [smem:[#allocation28_spill]] %s15061_s6 }
  0x38   :  { %s15071_s4 = sld [smem:[%s16604_s0 + %s14878_s28]]   ;;  %s14882_s28 = smov 37  }
  0x39   :  { %16640 = sst [smem:[#allocation29_spill]] %s15066_s27 }
  0x3a   :  { %s15076_s12 = sld [smem:[%s16604_s0 + %s14879_s7]]   ;;  %s14883_s7 = smov 38  }
  0x3b   :  { %s15081_s6 = sld [smem:[%s16604_s0 + %s14880_s15]]   ;;  %s14884_s15 = smov 39  }
  0x3c   :  { %s15086_s27 = sld [smem:[%s16604_s0 + %s14881_s22]]   ;;  %s14885_s22 = smov 40  }
  0x3e   :  { %16641 = sst [smem:[#allocation30_spill]] %s15071_s4 }
  0x3f   :  { %s15091_s4 = sld [smem:[%s16604_s0 + %s14882_s28]]   ;;  %s14886_s28 = smov 41  }
  0x40   :  { %16642 = sst [smem:[#allocation31_spill]] %s15076_s12 }
  0x41   :  { %16643 = sst [smem:[#allocation32_spill]] %s15081_s6 }
  0x42   :  { %16644 = sst [smem:[#allocation33_spill]] %s15086_s27 }
  0x43   :  { %s15096_s12 = sld [smem:[%s16604_s0 + %s14883_s7]]   ;;  %s14887_s7 = smov 42  }
  0x44   :  { %s15101_s6 = sld [smem:[%s16604_s0 + %s14884_s15]]   ;;  %s14888_s15 = smov 43  }
  0x45   :  { %16645 = sst [smem:[#allocation34_spill]] %s15091_s4 }
  0x46   :  { %s15106_s27 = sld [smem:[%s16604_s0 + %s14885_s22]]   ;;  %s14889_s22 = smov 44  }
  0x47   :  { %s15111_s4 = sld [smem:[%s16604_s0 + %s14886_s28]]   ;;  %s14890_s28 = smov 45  }
  0x49   :  { %16646 = sst [smem:[#allocation35_spill]] %s15096_s12 }
  0x4a   :  { %16647 = sst [smem:[#allocation36_spill]] %s15101_s6 }
  0x4b   :  { %s15116_s12 = sld [smem:[%s16604_s0 + %s14887_s7]]  }
  0x4c   :  { %16648 = sst [smem:[#allocation37_spill]] %s15106_s27 }
  0x4d   :  { %16649 = sst [smem:[#allocation38_spill]] %s15111_s4 }
  0x4e   :  { %s15121_s6 = sld [smem:[%s16604_s0 + %s14888_s15]]  }
  0x4f   :  { %s15126_s27 = sld [smem:[%s16604_s0 + %s14889_s22]]  }
  0x50   :  { %s15131_s4 = sld [smem:[%s16604_s0 + %s14890_s28]]  }
  0x51   :  { %96 = vsyncpa [#allocation3], 0 }
  0x52   :  { %97 = vsyncpa [#allocation6], 0 }
  0x53   :  { %98 = vsyncpa [#allocation4], 0  ;;  %s14891_s7 = smov [#allocation2]   ;;  %s14892_s11 = smov [#allocation5]  }
  0x54   :  { %s189_s10 = sshll.u32 %s14891_s7, 4  ;;  %s201_s15 = sshll.u32 %s14892_s11, 4  ;;  %s190_s10 = int_to_ptr.vmem [resolvable:$true] %s189_s10  ;;  %s202_s15 = int_to_ptr.vmem [resolvable:$true] %s201_s15 }
  0x55   :  { %s14774_s16 = scalar_lea.hbm %s15116_s12, 16 }
  0x56   :  { %p14775_p0 = scmp.ne.s32.totalorder %s15116_s12, %s14774_s16  ;;  %p14778_p1 = scmp.lt.u32.totalorder %s14774_s16, %s15116_s12 }
  0x58   :  { %p14780_p2 = pnand %p14778_p1, %p14775_p0 }
  0x5a   :  { %14783 = shalt.err (!%p14780_p2)
}
  0x5b   :  { %s14784_s18 = scalar_lea.vmem %s190_s10, 16  ;;  %s14788_s0 = scalar_lea.vmem %s190_s10, 32 }
  0x5c   :  { %p14785_p3 = scmp.ne.s32.totalorder %s190_s10, %s14784_s18  ;;  %p14789_p4 = scmp.lt.s32.totalorder %s190_s10, %s190_s10 }
  0x5d   :  { %p14790_p5 = scmp.lt.s32.totalorder %s14788_s0, %s14784_s18 }
  0x5f   :  { %p14791_p6 = por %p14790_p5, %p14789_p4 }
  0x61   :  { %p14792_p7 = pnand %p14791_p6, %p14785_p3 }
  0x63   :  { %14795 = shalt.err (!%p14792_p7)
}
  0x64   :  { %192 = dma.hbm_to_vmem [thread:$0]  %s15116_s12, 16, %s190_s10, [#allocation3]  }
  0x65   :  { %s14796_s22 = scalar_lea.hbm %s15126_s27, 16 }
  0x66   :  { %p14797_p8 = scmp.ne.s32.totalorder %s15126_s27, %s14796_s22  ;;  %p14800_p9 = scmp.lt.u32.totalorder %s14796_s22, %s15126_s27 }
  0x68   :  { %p14802_p10 = pnand %p14800_p9, %p14797_p8 }
  0x6a   :  { %14805 = shalt.err (!%p14802_p10)
}
  0x6b   :  { %s14806_s23 = scalar_lea.vmem %s202_s15, 16  ;;  %s14810_s26 = scalar_lea.vmem %s202_s15, 32 }
  0x6c   :  { %p14807_p11 = scmp.ne.s32.totalorder %s202_s15, %s14806_s23  ;;  %p14811_p12 = scmp.lt.s32.totalorder %s202_s15, %s202_s15 }
  0x6d   :  { %p14812_p13 = scmp.lt.s32.totalorder %s14810_s26, %s14806_s23 }
  0x6f   :  { %p14813_p0 = por %p14812_p13, %p14811_p12 }
  0x71   :  { %p14814_p1 = pnand %p14813_p0, %p14807_p11 }
  0x73   :  { %14817 = shalt.err (!%p14814_p1)
}
  0x74   :  { %204 = dma.hbm_to_vmem [thread:$0]  %s15126_s27, 16, %s202_s15, [#allocation6]  }
  0x75   :  { %14840 = dma.done.wait [#allocation3], 16  }
  0x76   :  { %14841 = vsyncadd [#allocation3], 4294967280 }
  0x77   :  { %14842 = dma.done.wait [#allocation6], 16  }
  0x78   :  { %14843 = vsyncadd [#allocation6], 4294967280  ;;  %v14893_v0 = vmov 0.0|0.0   ;;  %vm14894_vm0 = vmmov 0   ;;  %v14895_v1 = vmov 0.0   ;;  %v224_v2 = vld [vmem:[%s14911_s9] sm:$0xff] }
  0x79   :  { %13907 = vmatprep.subr.bf16.mxu0 %v14893_v0  ;;  %12872 = vmatprep.mubr.msk.f32.mxu0 %vm14894_vm0, %v14895_v1  ;;  %v225_v3 = vld [vmem:[%s14911_s9 + $0x8] sm:$0xff]  ;;  %v226_v4 = vld [vmem:[%s14911_s9 + $0x10] sm:$0xff]  ;;  %v227_v6 = vld [vmem:[%s14911_s9 + $0x18] sm:$0xff]  ;;  %vm241_vm1 = vcmask 654336   ;;  %vm415_vm2 = vcmask 818176   ;;  %vm428_vm3 = vcmask 1043456  }
  0x7a   :  { %v13908_v5 = vpack.c.bf16 %v225_v3, %v224_v2  ;;  %v13911_v7 = vpack.c.bf16 %v227_v6, %v226_v4  ;;  %v228_v8 = vld [vmem:[%s14911_s9 + $0x20] sm:$0xff]  ;;  %v229_v9 = vld [vmem:[%s14911_s9 + $0x28] sm:$0xff]  ;;  %v230_v11 = vld [vmem:[%s14911_s9 + $0x30] sm:$0xff]  ;;  %vm624_vm4 = vcmask 130048   ;;  %vm1045_vm5 = vcmask 1045504   ;;  %s16667_s12 = sld [smem:[#allocation24_spill]] }
  0x7b   :  { %v13914_v10 = vpack.c.bf16 %v229_v9, %v228_v8  ;;  %v231_v12 = vld [vmem:[%s14911_s9 + $0x38] sm:$0xff]  ;;  %v232_v14 = vld [vmem:[%s14911_s9 + $0x40] sm:$0xff]  ;;  %v233_v15 = vld [vmem:[%s14911_s9 + $0x48] sm:$0xff]  ;;  %vm14896_vm6 = vmmov 1   ;;  %vm1041_vm8 = vcmask 244736   ;;  %vm1507_vm9 = vcmask 48128  }
  0x7c   :  { %13909 = vmatpush3.bf16.msra.mxu0 %v13908_v5  ;;  %v13917_v13 = vpack.c.bf16 %v231_v12, %v230_v11  ;;  %v13920_v16 = vpack.c.bf16 %v233_v15, %v232_v14  ;;  %v211_v17 = vld [vmem:[%s14906_s5] sm:$0xff]  ;;  %v212_v18 = vld [vmem:[%s14906_s5 + $0x8] sm:$0xff]  ;;  %v213_v19 = vld [vmem:[%s14906_s5 + $0x10] sm:$0xff]  ;;  %vm1592_vm10 = vcmask 123904   ;;  %vm1616_vm11 = vcmask 1041408   ;;  %s16653_s9 = sld [smem:[#allocation12_spill]] }
  0x7d   :  { %13910 = vmatprep.subr.bf16.mxu0 %v14893_v0  ;;  %v214_v20 = vld [vmem:[%s14906_s5 + $0x18] sm:$0xff]  ;;  %v215_v21 = vld [vmem:[%s14906_s5 + $0x20] sm:$0xff]  ;;  %v216_v22 = vld [vmem:[%s14906_s5 + $0x28] sm:$0xff]  ;;  %vm1612_vm12 = vcmask 15360   ;;  %vm1912_vm13 = vcmask 588800   ;;  %vm2264_vm14 = vcmask 195584  }
  0x7e   :  { %v217_v23 = vld [vmem:[%s14906_s5 + $0x30] sm:$0xff]  ;;  %v218_v24 = vld [vmem:[%s14906_s5 + $0x38] sm:$0xff]  ;;  %v219_v25 = vld [vmem:[%s14906_s5 + $0x40] sm:$0xff]  ;;  %s16669_s27 = sld [smem:[#allocation28_spill]]  ;;  %s16670_s28 = sld [smem:[#allocation27_spill]] }
  0x7f   :  { %v220_v26 = vld [vmem:[%s14906_s5 + $0x48] sm:$0xff]  ;;  %v221_v27 = vld [vmem:[%s14906_s5 + $0x50] sm:$0xff]  ;;  %v222_v28 = vld [vmem:[%s14906_s5 + $0x58] sm:$0xff]  ;;  %s16671_s1 = sld [smem:[#allocation30_spill]]  ;;  %s16672_s2 = sld [smem:[#allocation32_spill]] }
  0x80   :  { %13912 = vmatpush3.bf16.msra.mxu0 %v13911_v7  ;;  %v223_v29 = vld [vmem:[%s14906_s5 + $0x60] sm:$0xf]  ;;  %vm15305_vm7 = vmpackc.low %vm1045_vm5, %vm14896_vm6  ;;  %s16652_s5 = sld [smem:[#allocation16_spill]]  ;;  %s16673_s7 = sld [smem:[#allocation15_spill]] }
  0x81   :  { %13913 = vmatprep.subr.bf16.mxu0 %v14893_v0  ;;  %v411_v30 = vld [vmem:[%s14921_s17] sm:$0xff]  ;;  %vm15909_vm15 = vmpackc.low %vm1616_vm11, %vm14896_vm6  ;;  %s16674_s10 = sld [smem:[#allocation29_spill]]  ;;  %s16675_s11 = sld [smem:[#allocation34_spill]] }
  0x82   :  { %12937 = vmatprep.mubr.msk.f32.mxu1 %vm415_vm2, %v411_v30  ;;  %v11588_v31 = vld [vmem:[%s14921_s17 + $0x40] sm:$0xff]  ;;  %v518_v30 = vld [vmem:[%s14926_s21 + $0x8] sm:$0xff]  ;;  %s16676_s15 = sld [smem:[#allocation36_spill]]  ;;  %s16677_s16 = sld [smem:[#allocation31_spill]] }
  0x83   :  { %v15213_v34 = vld [vmem:[%s14916_s13] ss:$0 sm:$0xff]  ;;  %s16654_s13 = sld [smem:[#allocation11_spill]]  ;;  %s16679_s0 = sld [smem:[#allocation33_spill]] }
  0x84   :  { %13915 = vmatpush3.bf16.msra.mxu0 %v13914_v10  ;;  %s16678_s18 = sld [smem:[#allocation35_spill]]  ;;  %s16680_s22 = sld [smem:[#allocation37_spill]] }
  0x85   :  { %13916 = vmatprep.subr.bf16.mxu0 %v14893_v0  ;;  %s16681_s23 = sld [smem:[#allocation38_spill]] }
  0x88   :  { %13918 = vmatpush3.bf16.msra.mxu0 %v13917_v13 }
  0x89   :  { %13919 = vmatprep.subr.bf16.mxu0 %v14893_v0 }
  0x8c   :  { %13921 = vmatpush3.bf16.msra.mxu0 %v13920_v16  ;;  %v412_v16 = vld [vmem:[%s14921_s17 + $0x8] sm:$0xff] }
  0x8f   :  { %12873 = vmatmul.mubr.msk.f32.vlgmr.msra.gmra.mrb[0].mxu0 %vm241_vm1, %v211_v17  ;;  %v413_v17 = vld [vmem:[%s14921_s17 + $0x10] sm:$0xff] }
  0x90   :  { %12875 = vmatprep.mubr.msk.f32.mxu0 %vm14894_vm0, %v14895_v1 }
  0x93   :  { %12876 = vmatmul.mubr.msk.f32.gmra.mrb[2].mxu0 %vm241_vm1, %v212_v18  ;;  %v11589_v18 = vld [vmem:[%s14921_s17 + $0x48] sm:$0xff] }
  0x94   :  { %12878 = vmatprep.mubr.msk.f32.mxu0 %vm14894_vm0, %v14895_v1 }
  0x97   :  { %12879 = vmatmul.mubr.msk.f32.gmra.mrb[4].mxu0 %vm241_vm1, %v213_v19  ;;  %v11590_v19 = vld [vmem:[%s14921_s17 + $0x50] sm:$0xff] }
  0x98   :  { %12881 = vmatprep.mubr.msk.f32.mxu0 %vm14894_vm0, %v14895_v1 }
  0x9b   :  { %12882 = vmatmul.mubr.msk.f32.gmra.mrb[6].mxu0 %vm241_vm1, %v214_v20  ;;  %v414_v20 = vld [vmem:[%s14921_s17 + $0x18] sm:$0x3f] }
  0x9c   :  { %12884 = vmatprep.mubr.msk.f32.mxu0 %vm14894_vm0, %v14895_v1 }
  0x9f   :  { %12885 = vmatmul.mubr.msk.f32.gmra.mrb[8].mxu0 %vm241_vm1, %v215_v21  ;;  %v11569_v21 = vld [vmem:[%s14921_s17 + $0x20] sm:$0xff] }
  0xa0   :  { %12887 = vmatprep.mubr.msk.f32.mxu0 %vm14894_vm0, %v14895_v1 }
  0xa3   :  { %12888 = vmatmul.mubr.msk.f32.gmra.mrb[10].mxu0 %vm241_vm1, %v216_v22  ;;  %v11591_v22 = vld [vmem:[%s14921_s17 + $0x58] sm:$0x3f] }
  0xa4   :  { %12890 = vmatprep.mubr.msk.f32.mxu0 %vm14894_vm0, %v14895_v1 }
  0xa7   :  { %12891 = vmatmul.mubr.msk.f32.gmra.mrb[12].mxu0 %vm241_vm1, %v217_v23  ;;  %v11570_v23 = vld [vmem:[%s14921_s17 + $0x28] sm:$0xff] }
  0xa8   :  { %12893 = vmatprep.mubr.msk.f32.mxu0 %vm14894_vm0, %v14895_v1 }
  0xab   :  { %12894 = vmatmul.mubr.msk.f32.gmra.mrb[14].mxu0 %vm241_vm1, %v218_v24  ;;  %v11571_v24 = vld [vmem:[%s14921_s17 + $0x30] sm:$0xff] }
  0xac   :  { %12896 = vmatprep.mubr.msk.f32.mxu0 %vm14894_vm0, %v14895_v1 }
  0xaf   :  { %12897 = vmatmul.mubr.msk.f32.gmra.mrb[16].mxu0 %vm241_vm1, %v219_v25  ;;  %v11572_v25 = vld [vmem:[%s14921_s17 + $0x38] sm:$0x3f]  ;;  %s16655_s17 = sld [smem:[#allocation17_spill]] }
  0xb0   :  { %12899 = vmatprep.mubr.msk.f32.mxu0 %vm14894_vm0, %v14895_v1 }
  0xb3   :  { %12900 = vmatmul.mubr.msk.f32.gmra.mrb[18].mxu0 %vm241_vm1, %v220_v26  ;;  %v11578_v26 = vld [vmem:[%s14926_s21 + $0x10] sm:$0xff] }
  0xb4   :  { %12902 = vmatprep.mubr.msk.f32.mxu0 %vm14894_vm0, %v14895_v1 }
  0xb7   :  { %12903 = vmatmul.mubr.msk.f32.gmra.mrb[20].mxu0 %vm241_vm1, %v221_v27  ;;  %v11579_v27 = vld [vmem:[%s14926_s21 + $0x18] sm:$0xff] }
  0xb8   :  { %12905 = vmatprep.mubr.msk.f32.mxu0 %vm14894_vm0, %v14895_v1 }
  0xbb   :  { %12906 = vmatmul.mubr.msk.f32.gmra.mrb[22].mxu0 %vm241_vm1, %v222_v28  ;;  %v13970_v28 = vpack.c.bf16 %v11579_v27, %v11578_v26 }
  0xbc   :  { %12908 = vmatprep.mubr.msk.f32.mxu0 %vm14894_vm0, %v14895_v1 }
  0xbf   :  { %12909 = vmatmul.mubr.msk.f32.gmra.mrb[24].mxu0 %vm241_vm1, %v223_v29  ;;  %v517_v29 = vld [vmem:[%s14926_s21] sm:$0xff] }
  0xc0   :  { %13021 = vmatprep.mubr.msk.f32.mxu0 %vm415_vm2, %v11588_v31  ;;  %v13974_v31 = vpack.c.bf16 %v518_v30, %v517_v29  ;;  %v1506_v30 = vld [vmem:[%s14951_s14] sm:$0x3]  ;;  %s16661_s14 = sld [smem:[#allocation21_spill]] }
 0x162   :  { %v347_v32 = vpop.f32.mrb[0].mxu0 }
 0x163   :  { %v12874_v33 = vpop.f32.mrb[1].mxu0  ;;  %v348_v36 = vadd.f32 %v15213_v34, %v347_v32 }
 0x166   :  { %v352_v35 = vpop.f32.mrb[2].mxu0 }
 0x167   :  { %v353_v37 = vadd.f32 %v15213_v34, %v352_v35  ;;  %v12877_v38 = vpop.f32.mrb[3].mxu0 }
 0x169   :  { %v15217_v39 = vpack.c.bf16 %v353_v37, %v348_v36 }
 0x16a   :  { %v357_v40 = vpop.f32.mrb[4].mxu0 }
 0x16b   :  { %v12880_v41 = vpop.f32.mrb[5].mxu0  ;;  %13923 = vmatprep.subr.bf16.mxu1 %v15217_v39  ;;  %13979 = vmatprep.subr.bf16.mxu0 %v15217_v39  ;;  %v358_v43 = vadd.f32 %v15213_v34, %v357_v40  ;;  %v11597_v40 = vld [vmem:[%s14926_s21 + $0x20] sm:$0xff] }
 0x16c   :  { %13925 = vmatpush3.bf16.msra.mxu1 %v15217_v39  ;;  %13981 = vmatpush3.bf16.msra.mxu0 %v15217_v39  ;;  %v11598_v41 = vld [vmem:[%s14926_s21 + $0x28] sm:$0xff]  ;;  %s16656_s21 = sld [smem:[#allocation18_spill]] }
 0x16e   :  { %v362_v42 = vpop.f32.mrb[6].mxu0 }
 0x16f   :  { %v363_v44 = vadd.f32 %v15213_v34, %v362_v42  ;;  %v12883_v45 = vpop.f32.mrb[7].mxu0 }
 0x171   :  { %v15225_v46 = vpack.c.bf16 %v363_v44, %v358_v43  ;;  %v14002_v44 = vpack.c.bf16 %v11598_v41, %v11597_v40 }
 0x172   :  { %v367_v47 = vpop.f32.mrb[8].mxu0 }
 0x173   :  { %v12886_v48 = vpop.f32.mrb[9].mxu0  ;;  %13927 = vmatprep.subr.bf16.mxu1 %v15225_v46  ;;  %13983 = vmatprep.subr.bf16.mxu0 %v15225_v46  ;;  %v368_v50 = vadd.f32 %v15213_v34, %v367_v47  ;;  %v11603_v47 = vld [vmem:[%s14931_s25] ss:$0 sm:$0xff]  ;;  %s16657_s25 = sld [smem:[#allocation13_spill]] }
 0x174   :  { %13929 = vmatpush3.bf16.msra.mxu1 %v15225_v46  ;;  %13985 = vmatpush3.bf16.msra.mxu0 %v15225_v46 }
 0x176   :  { %v372_v49 = vpop.f32.mrb[10].mxu0 }
 0x177   :  { %v373_v51 = vadd.f32 %v15213_v34, %v372_v49  ;;  %v12889_v52 = vpop.f32.mrb[11].mxu0 }
 0x179   :  { %v15233_v53 = vpack.c.bf16 %v373_v51, %v368_v50 }
 0x17a   :  { %v377_v54 = vpop.f32.mrb[12].mxu0 }
 0x17b   :  { %v12892_v55 = vpop.f32.mrb[13].mxu0  ;;  %13931 = vmatprep.subr.bf16.mxu1 %v15233_v53  ;;  %13987 = vmatprep.subr.bf16.mxu0 %v15233_v53  ;;  %v378_v57 = vadd.f32 %v15213_v34, %v377_v54 }
 0x17c   :  { %13933 = vmatpush3.bf16.msra.mxu1 %v15233_v53  ;;  %13989 = vmatpush3.bf16.msra.mxu0 %v15233_v53 }
 0x17e   :  { %v382_v56 = vpop.f32.mrb[14].mxu0 }
 0x17f   :  { %v383_v58 = vadd.f32 %v15213_v34, %v382_v56  ;;  %v12895_v59 = vpop.f32.mrb[15].mxu0 }
 0x181   :  { %v13934_v60 = vpack.c.bf16 %v383_v58, %v378_v57 }
 0x182   :  { %v387_v61 = vpop.f32.mrb[16].mxu0 }
 0x183   :  { %v12898_v62 = vpop.f32.mrb[17].mxu0  ;;  %13935 = vmatprep.subr.bf16.mxu1 %v13934_v60  ;;  %13991 = vmatprep.subr.bf16.mxu0 %v13934_v60  ;;  %v388_v2 = vadd.f32 %v15213_v34, %v387_v61 }
 0x184   :  { %13937 = vmatpush3.bf16.msra.mxu1 %v13934_v60  ;;  %13993 = vmatpush3.bf16.msra.mxu0 %v13934_v60  ;;  %v11609_v62 = vld [vmem:[%s14941_s3 + $0x10] sm:$0xff] }
 0x186   :  { %v392_v63 = vpop.f32.mrb[18].mxu0 }
 0x187   :  { %v393_v3 = vadd.f32 %v15213_v34, %v392_v63  ;;  %v12901_v4 = vpop.f32.mrb[19].mxu0  ;;  %v11610_v63 = vld [vmem:[%s14941_s3 + $0x18] sm:$0xff] }
 0x189   :  { %v13938_v5 = vpack.c.bf16 %v393_v3, %v388_v2  ;;  %v1119_v2 = vld [vmem:[%s14941_s3] sm:$0xff]  ;;  %v1120_v3 = vld [vmem:[%s14941_s3 + $0x8] sm:$0xff] }
 0x18a   :  { %v397_v6 = vpop.f32.mrb[20].mxu0 }
 0x18b   :  { %v12904_v7 = vpop.f32.mrb[21].mxu0  ;;  %13939 = vmatprep.subr.bf16.mxu1 %v13938_v5  ;;  %13995 = vmatprep.subr.bf16.mxu0 %v13938_v5  ;;  %v398_v9 = vadd.f32 %v15213_v34, %v397_v6  ;;  %v11606_v6 = vld [vmem:[%s14936_s29 + $0x8] sm:$0x3f] }
 0x18c   :  { %13941 = vmatpush3.bf16.msra.mxu1 %v13938_v5  ;;  %13997 = vmatpush3.bf16.msra.mxu0 %v13938_v5  ;;  %v14021_v7 = vpack.c.bf16 %v11610_v63, %v11609_v62  ;;  %v1890_v62 = vld [vmem:[%s15001_s20 + $0x50] sm:$0xff]  ;;  %v1891_v63 = vld [vmem:[%s15001_s20 + $0x58] sm:$0xff] }
 0x18e   :  { %v402_v8 = vpop.f32.mrb[22].mxu0 }
 0x18f   :  { %v403_v10 = vadd.f32 %v15213_v34, %v402_v8  ;;  %v12907_v11 = vpop.f32.mrb[23].mxu0  ;;  %v14024_v8 = vpack.c.bf16 %v1120_v3, %v1119_v2  ;;  %v14067_v2 = vpack.c.bf16 %v1891_v63, %v1890_v62  ;;  %v1892_v3 = vld [vmem:[%s15001_s20 + $0x60] sm:$0xff]  ;;  %v1832_v62 = vld [vmem:[%s16652_s5 + $0xb0] sm:$0xff]  ;;  %v1835_v63 = vld [vmem:[%s16652_s5 + $0xc8] sm:$0xff] }
 0x191   :  { %v13942_v12 = vpack.c.bf16 %v403_v10, %v398_v9 }
 0x192   :  { %v407_v13 = vpop.f32.mrb[24].mxu0 }
 0x193   :  { %v408_v14 = vadd.f32 %v15213_v34, %v407_v13  ;;  %13943 = vmatprep.subr.bf16.mxu1 %v13942_v12  ;;  %13999 = vmatprep.subr.bf16.mxu0 %v13942_v12  ;;  %v12910_v15 = vpop.f32.mrb[25].mxu0  ;;  %v11613_v13 = vld [vmem:[%s14936_s29 + $0x10] sm:$0x3f] }
 0x194   :  { %13945 = vmatpush3.bf16.msra.mxu1 %v13942_v12  ;;  %14001 = vmatpush3.bf16.msra.mxu0 %v13942_v12  ;;  %v11617_v15 = vld [vmem:[%s14941_s3 + $0x28] sm:$0xff] }
 0x195   :  { %12935 = vmatprep.subr.msk.mxu1 %vm428_vm3, %v408_v14  ;;  %13019 = vmatprep.subr.msk.mxu0 %vm428_vm3, %v408_v14 }
 0x198   :  { %12936 = vmatpush3.msk.msra.mxu1 %vm428_vm3, %v408_v14  ;;  %13020 = vmatpush3.msk.msra.mxu0 %vm428_vm3, %v408_v14 }
 0x199   :  { %12938 = vmatmul.mubr.msk.f32.vlgmr.msra.gmra.mrb[0].mxu1 %vm415_vm2, %v412_v16  ;;  %13947 = vmatprep.subr.bf16.mxu1 %v15217_v39 }
 0x19a   :  { %13949 = vmatpush3.bf16.msra.mxu1 %v15217_v39  ;;  %12940 = vmatprep.mubr.msk.f32.mxu1 %vm415_vm2, %v413_v17 }
 0x19b   :  { %13951 = vmatprep.subr.bf16.mxu1 %v15225_v46  ;;  %13022 = vmatmul.mubr.msk.f32.vlgmr.msra.gmra.mrb[26].mxu0 %vm415_vm2, %v11589_v18 }
 0x19c   :  { %13024 = vmatprep.mubr.msk.f32.mxu0 %vm415_vm2, %v11590_v19  ;;  %14006 = vmatprep.subr.bf16.mxu0 %v14893_v0 }
 0x19d   :  { %12941 = vmatmul.mubr.msk.f32.gmra.mrb[2].mxu1 %vm415_vm2, %v414_v20 }
 0x19e   :  { %13953 = vmatpush3.bf16.msra.mxu1 %v15225_v46  ;;  %12969 = vmatprep.mubr.msk.f32.mxu1 %vm415_vm2, %v11569_v21 }
 0x19f   :  { %13955 = vmatprep.subr.bf16.mxu1 %v15233_v53  ;;  %13025 = vmatmul.mubr.msk.f32.gmra.mrb[28].mxu0 %vm415_vm2, %v11591_v22 }
 0x1a0   :  { %13045 = vmatprep.mubr.msk.f32.mxu0 %vm14894_vm0, %v14895_v1 }
 0x1a2   :  { %13957 = vmatpush3.bf16.msra.mxu1 %v15233_v53 }
 0x1a3   :  { %13959 = vmatprep.subr.bf16.mxu1 %v13934_v60 }
 0x1a6   :  { %13961 = vmatpush3.bf16.msra.mxu1 %v13934_v60 }
 0x1a7   :  { %13963 = vmatprep.subr.bf16.mxu1 %v13938_v5 }
 0x1aa   :  { %13965 = vmatpush3.bf16.msra.mxu1 %v13938_v5  ;;  %v1040_v5 = vld [vmem:[%s14936_s29] sm:$0x3f]  ;;  %s16658_s29 = sld [smem:[#allocation14_spill]] }
 0x1ab   :  { %13967 = vmatprep.subr.bf16.mxu1 %v13942_v12 }
 0x1ae   :  { %13969 = vmatpush3.bf16.msra.mxu1 %v13942_v12 }
 0x1af   :  { %12967 = vmatprep.subr.msk.mxu1 %vm428_vm3, %v408_v14 }
 0x1b2   :  { %12968 = vmatpush3.msk.msra.mxu1 %vm428_vm3, %v408_v14  ;;  %v11616_v14 = vld [vmem:[%s14941_s3 + $0x20] sm:$0xff]  ;;  %s16659_s3 = sld [smem:[#allocation19_spill]] }
 0x1b3   :  { %12970 = vmatmul.mubr.msk.f32.vlgmr.msra.gmra.mrb[4].mxu1 %vm415_vm2, %v11570_v23  ;;  %13971 = vmatprep.subr.bf16.mxu1 %v13970_v28  ;;  %v14034_v16 = vpack.c.bf16 %v11617_v15, %v11616_v14  ;;  %v1900_v15 = vld [vmem:[%s15001_s20 + $0xa0] sm:$0xff] }
 0x1b4   :  { %12972 = vmatprep.mubr.msk.f32.mxu1 %vm415_vm2, %v11571_v24  ;;  %13973 = vmatpush3.bf16.msra.mxu1 %v13970_v28 }
 0x1b5   :  { %13975 = vmatprep.subr.bf16.mxu1 %v13974_v31 }
 0x1b7   :  { %12973 = vmatmul.mubr.msk.f32.gmra.mrb[6].mxu1 %vm415_vm2, %v11572_v25  ;;  %v11619_v25 = vld [vmem:[%s14946_s8] ss:$0 sm:$0xff]  ;;  %s16660_s8 = sld [smem:[#allocation20_spill]]  ;;  %vm7256_vm2 = vcmask 31744  }
 0x26c   :  { %v12939_v32 = vpop.f32.mrb[0].mxu1 }
 0x26d   :  { %v498_v33 = vpop.f32.mrb[1].mxu1 }
 0x26e   :  { %v13023_v34 = vpop.f32.mrb[26].mxu0 }
 0x26f   :  { %v902_v35 = vpop.f32.mrb[27].mxu0 }
 0x270   :  { %v12942_v36 = vpop.f32.mrb[2].mxu1 }
 0x271   :  { %v508_v37 = vpop.f32.mrb[3].mxu1 }
 0x272   :  { %v13026_v38 = vpop.f32.mrb[28].mxu0 }
 0x273   :  { %v912_v39 = vpop.f32.mrb[29].mxu0 }
 0x286   :  { %v12971_v42 = vpop.f32.mrb[4].mxu1 }
 0x287   :  { %v602_v43 = vpop.f32.mrb[5].mxu1 }
 0x288   :  { %12979 = vmatprep.mubr.msk.f32.mxu1 %vm624_vm4, %v602_v43 }
 0x289   :  { %12980 = vmatmul.mubr.msk.f32.vlgmr.msra.gmra.mrb[8].mxu1 %vm624_vm4, %v12971_v42 }
 0x28a   :  { %v12974_v45 = vpop.f32.mrb[6].mxu1  ;;  %13977 = vmatpush3.bf16.msra.mxu1 %v13974_v31  ;;  %v11622_v31 = vld [vmem:[%s14961_s24] ss:$0 sm:$0xff]  ;;  %s16665_s24 = sld [smem:[#allocation23_spill]] }
 0x28b   :  { %v612_v46 = vpop.f32.mrb[7].mxu1  ;;  %14003 = vmatprep.subr.bf16.mxu1 %v14002_v44 }
 0x28c   :  { %12982 = vmatprep.mubr.msk.f32.mxu1 %vm624_vm4, %v612_v46  ;;  %v1611_v46 = vld [vmem:[%s14956_s19] sm:$0x3f]  ;;  %s16662_s19 = sld [smem:[#allocation22_spill]] }
 0x28d   :  { %12983 = vmatmul.mubr.msk.f32.gmra.mrb[10].mxu1 %vm624_vm4, %v12974_v45  ;;  %v1881_v45 = vld [vmem:[%s15001_s20 + $0x8] sm:$0xff] }
 0x28e   :  { %12989 = vmatprep.mubr.msk.f32.mxu1 %vm624_vm4, %v498_v33 }
 0x291   :  { %12990 = vmatmul.mubr.msk.f32.vlgmr.msra.gmra.mrb[8].mxu1 %vm624_vm4, %v12939_v32 }
 0x292   :  { %12992 = vmatprep.mubr.msk.f32.mxu1 %vm624_vm4, %v508_v37  ;;  %14005 = vmatpush3.bf16.msra.mxu1 %v14002_v44  ;;  %v1880_v44 = vld [vmem:[%s15001_s20] sm:$0xff] }
 0x293   :  { %14013 = vmatprep.subr.bf16.mxu1 %v14893_v0 }
 0x295   :  { %12993 = vmatmul.mubr.msk.f32.gmra.mrb[10].mxu1 %vm624_vm4, %v12942_v36 }
 0x296   :  { %13031 = vmatprep.mubr.msk.f32.mxu1 %vm624_vm4, %v902_v35 }
 0x299   :  { %13032 = vmatmul.mubr.msk.f32.vlgmr.msra.gmra.mrb[8].mxu1 %vm624_vm4, %v13023_v34 }
 0x29a   :  { %13034 = vmatprep.mubr.msk.f32.mxu1 %vm624_vm4, %v912_v39 }
 0x29d   :  { %13035 = vmatmul.mubr.msk.f32.gmra.mrb[10].mxu1 %vm624_vm4, %v13026_v38  ;;  %v11623_v38 = vld [vmem:[%s14966_s30] ss:$0 sm:$0xff]  ;;  %s16666_s30 = sld [smem:[#allocation25_spill]] }
 0x29e   :  { %13056 = vmatprep.mubr.msk.f32.mxu1 %vm14894_vm0, %v14895_v1 }
 0x36c   :  { %v13033_v48 = vpop.f32.mrb[8].mxu1 }
 0x36d   :  { %v1033_v49 = vadd.f32 %v13033_v48, %v11603_v47  ;;  %v1002_v50 = vpop.f32.mrb[9].mxu1 }
 0x36e   :  { %v1032_v51 = vadd.f32 %v11603_v47, %v1002_v50  ;;  %v1883_v50 = vld [vmem:[%s15001_s20 + $0x18] sm:$0xff] }
 0x36f   :  { %v1037_v52 = vmax.f32 %v1033_v49, 0.0  ;;  %v1882_v49 = vld [vmem:[%s15001_s20 + $0x10] sm:$0xff] }
 0x370   :  { %v1036_v53 = vmax.f32 %v1032_v51, 0.0  ;;  %v13036_v54 = vpop.f32.mrb[10].mxu1  ;;  %v1811_v51 = vld [vmem:[%s16652_s5 + $0x8] sm:$0xff] }
 0x371   :  { %v1035_v55 = vadd.f32 %v13036_v54, %v11603_v47  ;;  %v1012_v56 = vpop.f32.mrb[11].mxu1  ;;  %v1885_v54 = vld [vmem:[%s15001_s20 + $0x28] sm:$0xff] }
 0x372   :  { %v14007_v57 = vpack.c.bf16 %v1037_v52, %v1036_v53  ;;  %v1034_v58 = vadd.f32 %v11603_v47, %v1012_v56  ;;  %v14052_v47 = vpack.c.bf16 %v1881_v45, %v1880_v44  ;;  %v14055_v52 = vpack.c.bf16 %v1883_v50, %v1882_v49  ;;  %v1884_v53 = vld [vmem:[%s15001_s20 + $0x20] sm:$0xff]  ;;  %v1886_v56 = vld [vmem:[%s15001_s20 + $0x30] sm:$0xff]  ;;  %v1817_v44 = vld [vmem:[%s16652_s5 + $0x38] sm:$0xff] }
 0x373   :  { %v1039_v59 = vmax.f32 %v1035_v55, 0.0  ;;  %v14058_v55 = vpack.c.bf16 %v1885_v54, %v1884_v53  ;;  %v1691_v45 = vld [vmem:[%s16654_s13] sm:$0x3]  ;;  %v1821_v49 = vld [vmem:[%s16652_s5 + $0x58] sm:$0xff]  ;;  %v1820_v50 = vld [vmem:[%s16652_s5 + $0x50] sm:$0xff] }
 0x374   :  { %v1038_v60 = vmax.f32 %v1034_v58, 0.0  ;;  %14008 = vmatpush3.bf16.msra.mxu0 %v14007_v57  ;;  %14015 = vmatpush3.bf16.msra.mxu1 %v14007_v57  ;;  %v1825_v53 = vld [vmem:[%s16652_s5 + $0x78] sm:$0xff]  ;;  %v1824_v54 = vld [vmem:[%s16652_s5 + $0x70] sm:$0xff] }
 0x375   :  { %14009 = vmatprep.subr.bf16.mxu0 %v14893_v0  ;;  %14016 = vmatprep.subr.bf16.mxu1 %v14893_v0 }
 0x376   :  { %v14010_v4 = vpack.c.bf16 %v1039_v59, %v1038_v60  ;;  %v1888_v59 = vld [vmem:[%s15001_s20 + $0x40] sm:$0xff]  ;;  %v1889_v60 = vld [vmem:[%s15001_s20 + $0x48] sm:$0xff] }
 0x377   :  { %v14064_v61 = vpack.c.bf16 %v1889_v60, %v1888_v59  ;;  %v1831_v59 = vld [vmem:[%s16652_s5 + $0xa8] sm:$0xff]  ;;  %v1830_v60 = vld [vmem:[%s16652_s5 + $0xa0] sm:$0xff] }
 0x378   :  { %14012 = vmatpush3.bf16.msk.msra.mxu0 %vm15305_vm7, %v14010_v4  ;;  %14019 = vmatpush3.bf16.msk.msra.mxu1 %vm15305_vm7, %v14010_v4 }
 0x379   :  { %14020 = vmatprep.subr.bf16.mxu1 %v14893_v0  ;;  %14023 = vmatprep.subr.bf16.mxu0 %v14893_v0 }
 0x37b   :  { %13046 = vmatmul.mubr.msk.f32.vlgmr.msra.gmra.mrb[30].mxu0 %vm1041_vm8, %v1040_v5  ;;  %13057 = vmatmul.mubr.msk.f32.vlgmr.msra.gmra.mrb[12].mxu1 %vm1041_vm8, %v11606_v6  ;;  %v1894_v6 = vld [vmem:[%s15001_s20 + $0x70] sm:$0xff] }
 0x37c   :  { %14022 = vmatpush3.bf16.msra.mxu1 %v14021_v7  ;;  %14025 = vmatpush3.bf16.msra.mxu0 %v14024_v8  ;;  %v1895_v7 = vld [vmem:[%s15001_s20 + $0x78] sm:$0xff] }
 0x37d   :  { %13063 = vmatprep.mubr.msk.f32.mxu1 %vm14894_vm0, %v14895_v1  ;;  %13070 = vmatprep.mubr.msk.f32.mxu0 %vm14894_vm0, %v14895_v1  ;;  %v14073_v8 = vpack.c.bf16 %v1895_v7, %v1894_v6  ;;  %v1838_v6 = vld [vmem:[%s16652_s5 + $0xe0] sm:$0xff]  ;;  %v1841_v7 = vld [vmem:[%s16652_s5 + $0xf8] sm:$0xff] }
 0x37e   :  { %14026 = vmatprep.subr.bf16.mxu1 %v14893_v0  ;;  %14033 = vmatprep.subr.bf16.mxu0 %v14893_v0 }
 0x44e   :  { %v1115_v9 = vpop.f32.mrb[30].mxu0  ;;  %v1192_v10 = vpop.f32.mrb[12].mxu1 }
 0x44f   :  { %v13058_v11 = vpop.f32.mrb[13].mxu1  ;;  %13064 = vmatmul.mubr.msk.f32.vlgmr.msra.gmra.mrb[14].mxu1 %vm624_vm4, %v1192_v10  ;;  %13071 = vmatmul.mubr.msk.f32.vlgmr.msra.gmra.mrb[32].mxu0 %vm624_vm4, %v1115_v9  ;;  %v13047_v12 = vpop.f32.mrb[31].mxu0  ;;  %v1896_v9 = vld [vmem:[%s15001_s20 + $0x80] sm:$0xff]  ;;  %v1897_v10 = vld [vmem:[%s15001_s20 + $0x88] sm:$0xff] }
 0x450   :  { %14028 = vmatpush3.bf16.msra.mxu1 %v14007_v57  ;;  %13081 = vmatprep.mubr.msk.f32.mxu1 %vm14894_vm0, %v14895_v1  ;;  %v1887_v57 = vld [vmem:[%s15001_s20 + $0x38] sm:$0xff]  ;;  %v14076_v11 = vpack.c.bf16 %v1897_v10, %v1896_v9  ;;  %v1898_v12 = vld [vmem:[%s15001_s20 + $0x90] sm:$0xff]  ;;  %v1843_v9 = vld [vmem:[%s16652_s5 + $0x108] sm:$0xff] }
 0x451   :  { %14029 = vmatprep.subr.bf16.mxu1 %v14893_v0  ;;  %13088 = vmatprep.mubr.msk.f32.mxu0 %vm14894_vm0, %v14895_v1  ;;  %v14061_v58 = vpack.c.bf16 %v1887_v57, %v1886_v56  ;;  %v1826_v56 = vld [vmem:[%s16652_s5 + $0x80] sm:$0xff]  ;;  %v1829_v57 = vld [vmem:[%s16652_s5 + $0x98] sm:$0xff] }
 0x452   :  { %14035 = vmatpush3.bf16.msra.mxu0 %v14034_v16  ;;  %v1901_v16 = vld [vmem:[%s15001_s20 + $0xa8] sm:$0xff]  ;;  %v1842_v10 = vld [vmem:[%s16652_s5 + $0x100] sm:$0xff] }
 0x453   :  { %13091 = vmatprep.subr.mxu0 %v14895_v1 }
 0x454   :  { %14032 = vmatpush3.bf16.msk.msra.mxu1 %vm15305_vm7, %v14010_v4  ;;  %v1893_v4 = vld [vmem:[%s15001_s20 + $0x68] sm:$0xff] }
 0x455   :  { %13096 = vmatprep.subr.mxu1 %v14895_v1  ;;  %v14070_v5 = vpack.c.bf16 %v1893_v4, %v1892_v3  ;;  %v1837_v3 = vld [vmem:[%s16652_s5 + $0xd8] sm:$0xff]  ;;  %v1836_v4 = vld [vmem:[%s16652_s5 + $0xd0] sm:$0xff] }
 0x457   :  { %13082 = vmatmul.mubr.msk.f32.vlgmr.msra.gmra.mrb[16].mxu1 %vm1041_vm8, %v11613_v13  ;;  %v1899_v13 = vld [vmem:[%s15001_s20 + $0x98] sm:$0xff] }
 0x458   :  { %13098 = vmatprep.mubr.msk.f32.mxu1 %vm14894_vm0, %v14895_v1  ;;  %v14079_v14 = vpack.c.bf16 %v1899_v13, %v1898_v12  ;;  %v1844_v12 = vld [vmem:[%s16652_s5 + $0x110] sm:$0xff]  ;;  %v1847_v13 = vld [vmem:[%s16652_s5 + $0x128] sm:$0xff] }
 0x522   :  { %v1268_v17 = vpop.f32.mrb[14].mxu1  ;;  %v1341_v18 = vpop.f32.mrb[32].mxu0 }
 0x523   :  { %v1342_v19 = vadd.f32 %v1341_v18, %v1268_v17  ;;  %v13065_v20 = vpop.f32.mrb[15].mxu1  ;;  %v13072_v21 = vpop.f32.mrb[33].mxu0  ;;  %v14082_v17 = vpack.c.bf16 %v1901_v16, %v1900_v15  ;;  %v1902_v18 = vld [vmem:[%s15001_s20 + $0xb0] sm:$0xff]  ;;  %v1849_v15 = vld [vmem:[%s16652_s5 + $0x138] sm:$0xff] }
 0x524   :  { %v1692_v20 = vld [vmem:[%s16653_s9] sm:$0xff]  ;;  %v1693_v21 = vld [vmem:[%s16653_s9 + $0x8] sm:$0xff]  ;;  %v1848_v16 = vld [vmem:[%s16652_s5 + $0x130] sm:$0xff] }
 0x52a   :  { %v1416_v22 = vpop.f32.mrb[16].mxu1 }
 0x52b   :  { %v13083_v23 = vpop.f32.mrb[17].mxu1  ;;  %13089 = vmatmul.mubr.msk.f32.vlgmr.msra.gmra.mrb[34].mxu0 %vm624_vm4, %v1416_v22  ;;  %v14037_v22 = vpack.c.bf16 %v1693_v21, %v1692_v20  ;;  %v1852_v20 = vld [vmem:[%s16652_s5 + $0x150] sm:$0xff]  ;;  %v1855_v21 = vld [vmem:[%s16652_s5 + $0x168] sm:$0xff] }
 0x52c   :  { %13093 = vmatprep.mubr.msk.f32.mxu0 %vm14894_vm0, %v14895_v1 }
 0x5fe   :  { %v1492_v24 = vpop.f32.mrb[34].mxu0 }
 0x5ff   :  { %v1496_v26 = vadd.f32 %v1492_v24, %v1342_v19  ;;  %v13090_v27 = vpop.f32.mrb[35].mxu0  ;;  %v1903_v19 = vld [vmem:[%s15001_s20 + $0xb8] sm:$0xff]  ;;  %v1694_v24 = vld [vmem:[%s16653_s9 + $0x10] sm:$0xff] }
 0x600   :  { %v14085_v23 = vpack.c.bf16 %v1903_v19, %v1902_v18  ;;  %v1904_v27 = vld [vmem:[%s15001_s20 + $0xc0] sm:$0xff]  ;;  %v1853_v19 = vld [vmem:[%s16652_s5 + $0x158] sm:$0xff]  ;;  %s16668_s20 = sld [smem:[#allocation26_spill]] }
 0x601   :  { %v15352_v28 = vadd.f32 %v11619_v25, %v1496_v26  ;;  %v1695_v25 = vld [vmem:[%s16653_s9 + $0x18] sm:$0xff]  ;;  %v1850_v18 = vld [vmem:[%s16652_s5 + $0x140] sm:$0xff] }
 0x602   :  { %v14040_v26 = vpack.c.bf16 %v1695_v25, %v1694_v24  ;;  %v1856_v24 = vld [vmem:[%s16652_s5 + $0x170] sm:$0xff]  ;;  %v1859_v25 = vld [vmem:[%s16652_s5 + $0x188] sm:$0xff] }
 0x603   :  { %v1505_v29 = vmax.f32 %v15352_v28, 0.0  ;;  %v8799_v28 = vld [vmem:[%s16675_s11 + $0x8] sm:$0xff] }
 0x605   :  { %13092 = vmatpush3.msk.msra.mxu0 %vm1045_vm5, %v1505_v29 }
 0x606   :  { %13094 = vmatmul.mubr.msk.f32.vlgmr.msra.gmra.mrb[36].mxu0 %vm1507_vm9, %v1506_v30  ;;  %14036 = vmatprep.subr.bf16.mxu0 %v14893_v0  ;;  %v1810_v30 = vld [vmem:[%s16652_s5] sm:$0xff] }
 0x607   :  { %13121 = vmatprep.mubr.msk.f32.mxu0 %vm14894_vm0, %v14895_v1  ;;  %14038 = vmatpush3.bf16.msra.mxu0 %v14037_v22  ;;  %v1854_v22 = vld [vmem:[%s16652_s5 + $0x160] sm:$0xff] }
 0x608   :  { %14039 = vmatprep.subr.bf16.mxu0 %v14893_v0 }
 0x60b   :  { %14041 = vmatpush3.bf16.msra.mxu0 %v14040_v26  ;;  %v1858_v26 = vld [vmem:[%s16652_s5 + $0x180] sm:$0xff] }
 0x60c   :  { %14042 = vmatprep.subr.bf16.mxu0 %v14893_v0 }
 0x6d9   :  { %v1580_v32 = vpop.f32.mrb[36].mxu0 }
 0x6da   :  { %v1591_v33 = vmul.f32 %v11622_v31, %v1580_v32  ;;  %v13095_v34 = vpop.f32.mrb[37].mxu0  ;;  %v1696_v31 = vld [vmem:[%s16653_s9 + $0x20] sm:$0xff]  ;;  %v1697_v32 = vld [vmem:[%s16653_s9 + $0x28] sm:$0xff] }
 0x6db   :  { %v14043_v34 = vpack.c.bf16 %v1697_v32, %v1696_v31  ;;  %v1863_v31 = vld [vmem:[%s16652_s5 + $0x1a8] sm:$0xff]  ;;  %v1862_v32 = vld [vmem:[%s16652_s5 + $0x1a0] sm:$0xff] }
 0x6dc   :  { %v1593_v35 = vsel %vm1592_vm10, %v1591_v33, 0.0  ;;  %v1813_v33 = vld [vmem:[%s16652_s5 + $0x18] sm:$0xff] }
 0x6dd   :  { %1594 = vadd.xlane.f32.xlu0 %v1593_v35  ;;  %14044 = vmatpush3.bf16.msra.mxu0 %v14043_v34  ;;  %v1812_v35 = vld [vmem:[%s16652_s5 + $0x10] sm:$0xff] }
 0x6de   :  { %14045 = vmatprep.subr.bf16.mxu0 %v14893_v0  ;;  %v1864_v34 = vld [vmem:[%s16652_s5 + $0x1b0] sm:$0xff] }
 0x76a   :  { %v1595_v36 = vpop.xlane.xlu0 %1594 }
 0x76b   :  { %v1596_v37 = vmax.f32 %v1595_v36, 0.0  ;;  %v1698_v36 = vld [vmem:[%s16653_s9 + $0x30] sm:$0xff] }
 0x76d   :  { %v1597_v39 = vsub.f32 0.0, %v1596_v37  ;;  %v1699_v37 = vld [vmem:[%s16653_s9 + $0x38] sm:$0xff] }
 0x76f   :  { %v1605_v40 = vmul.f32 %v11623_v38, %v1597_v39  ;;  %v1815_v38 = vld [vmem:[%s16652_s5 + $0x28] sm:$0xff]  ;;  %v14046_v39 = vpack.c.bf16 %v1699_v37, %v1698_v36  ;;  %v1866_v36 = vld [vmem:[%s16652_s5 + $0x1c0] sm:$0xff]  ;;  %v1869_v37 = vld [vmem:[%s16652_s5 + $0x1d8] sm:$0xff] }
 0x771   :  { %v1606_v41 = vmul.f32 1.442695, %v1605_v40  ;;  %14047 = vmatpush3.bf16.msra.mxu0 %v14046_v39  ;;  %v1700_v40 = vld [vmem:[%s16653_s9 + $0x40] sm:$0xff]  ;;  %v1871_v39 = vld [vmem:[%s16652_s5 + $0x1e8] sm:$0xff] }
 0x772   :  { %14048 = vmatprep.subr.bf16.mxu0 %v14893_v0 }
 0x773   :  { %14754 = vpow2.f32 %v1606_v41  ;;  %v1701_v41 = vld [vmem:[%s16653_s9 + $0x48] sm:$0xff] }
 0x77d   :  { %v14755_v42 = vpop.eup %14754 }
 0x77e   :  { %v1608_v43 = vadd.f32 1.0, %v14755_v42  ;;  %v1814_v42 = vld [vmem:[%s16652_s5 + $0x20] sm:$0xff] }
 0x780   :  { %14756 = vrcp.f32 %v1608_v43  ;;  %v14049_v43 = vpack.c.bf16 %v1701_v41, %v1700_v40  ;;  %v1870_v40 = vld [vmem:[%s16652_s5 + $0x1e0] sm:$0xff]  ;;  %v1873_v41 = vld [vmem:[%s16652_s5 + $0x1f8] sm:$0xff] }
 0x782   :  { %14050 = vmatpush3.bf16.msra.mxu0 %v14049_v43  ;;  %v1875_v43 = vld [vmem:[%s16652_s5 + $0x208] sm:$0xff] }
 0x785   :  { %13122 = vmatmul.mubr.msk.f32.vlgmr.msra.gmra.mrb[38].mxu0 %vm241_vm1, %v1691_v45  ;;  %v1877_v45 = vld [vmem:[%s16652_s5 + $0x218] sm:$0xff]  ;;  %vm4504_vm1 = vcmask 80896  }
 0x78a   :  { %v14757_v48 = vpop.eup %14756 }
 0x78b   :  { %13097 = vmatpush3.msk.msra.mxu1 %vm1616_vm11, %v14757_v48  ;;  %v1818_v48 = vld [vmem:[%s16652_s5 + $0x40] sm:$0xff] }
 0x78c   :  { %13099 = vmatmul.mubr.msk.f32.vlgmr.msra.gmra.mrb[18].mxu1 %vm1612_vm12, %v1611_v46  ;;  %14051 = vmatprep.subr.bf16.mxu1 %v14893_v0  ;;  %v1816_v46 = vld [vmem:[%s16652_s5 + $0x30] sm:$0xff] }
 0x78d   :  { %14053 = vmatpush1.bf16.msra.mxu1 %v14052_v47  ;;  %11631 = vmatprep.mubr.msk.f32.mxu1 %vm1912_vm13, %v1811_v51  ;;  %v1819_v47 = vld [vmem:[%s16652_s5 + $0x48] sm:$0xff] }
 0x78e   :  { %14054 = vmatprep.subr.bf16.mxu1 %v14893_v0  ;;  %v1823_v51 = vld [vmem:[%s16652_s5 + $0x68] sm:$0xff] }
 0x791   :  { %14056 = vmatpush1.bf16.msra.mxu1 %v14055_v52  ;;  %v1822_v52 = vld [vmem:[%s16652_s5 + $0x60] sm:$0xff] }
 0x792   :  { %14057 = vmatprep.subr.bf16.mxu1 %v14893_v0 }
 0x795   :  { %14059 = vmatpush1.bf16.msra.mxu1 %v14058_v55  ;;  %v1827_v55 = vld [vmem:[%s16652_s5 + $0x88] sm:$0xff] }
 0x796   :  { %14060 = vmatprep.subr.bf16.mxu1 %v14893_v0 }
 0x799   :  { %14062 = vmatpush1.bf16.msra.mxu1 %v14061_v58  ;;  %v1828_v58 = vld [vmem:[%s16652_s5 + $0x90] sm:$0xff] }
 0x79a   :  { %14063 = vmatprep.subr.bf16.mxu1 %v14893_v0 }
 0x79d   :  { %14065 = vmatpush1.bf16.msra.mxu1 %v14064_v61  ;;  %v1833_v61 = vld [vmem:[%s16652_s5 + $0xb8] sm:$0xff] }
 0x79e   :  { %14066 = vmatprep.subr.bf16.mxu1 %v14893_v0 }
 0x7a1   :  { %14068 = vmatpush1.bf16.msra.mxu1 %v14067_v2  ;;  %v1834_v2 = vld [vmem:[%s16652_s5 + $0xc0] sm:$0xff] }
 0x7a2   :  { %14069 = vmatprep.subr.bf16.mxu1 %v14893_v0 }
 0x7a5   :  { %14071 = vmatpush1.bf16.msra.mxu1 %v14070_v5  ;;  %v1839_v5 = vld [vmem:[%s16652_s5 + $0xe8] sm:$0xff] }
 0x7a6   :  { %14072 = vmatprep.subr.bf16.mxu1 %v14893_v0 }
 0x7a9   :  { %14074 = vmatpush1.bf16.msra.mxu1 %v14073_v8  ;;  %v1840_v8 = vld [vmem:[%s16652_s5 + $0xf0] sm:$0xff] }
 0x7aa   :  { %14075 = vmatprep.subr.bf16.mxu1 %v14893_v0 }
 0x7ad   :  { %14077 = vmatpush1.bf16.msra.mxu1 %v14076_v11  ;;  %v1845_v11 = vld [vmem:[%s16652_s5 + $0x118] sm:$0xff] }
 0x7ae   :  { %14078 = vmatprep.subr.bf16.mxu1 %v14893_v0 }
 0x7b1   :  { %14080 = vmatpush1.bf16.msra.mxu1 %v14079_v14  ;;  %v1846_v14 = vld [vmem:[%s16652_s5 + $0x120] sm:$0xff] }
 0x7b2   :  { %14081 = vmatprep.subr.bf16.mxu1 %v14893_v0 }
 0x7b5   :  { %14083 = vmatpush1.bf16.msra.mxu1 %v14082_v17  ;;  %v1851_v17 = vld [vmem:[%s16652_s5 + $0x148] sm:$0xff] }
 0x7b6   :  { %14084 = vmatprep.subr.bf16.mxu1 %v14893_v0 }
 0x7b9   :  { %14086 = vmatpush1.bf16.msra.mxu1 %v14085_v23  ;;  %v1857_v23 = vld [vmem:[%s16652_s5 + $0x178] sm:$0xff] }
 0x7ba   :  { %2066 = vmatprep.subr.mxu1 %v14895_v1 }
 0x7bd   :  { %2067 = vmatpush1.msra.mxu1 %v1904_v27  ;;  %v1861_v27 = vld [vmem:[%s16652_s5 + $0x198] sm:$0xff] }
 0x7be   :  { %2083 = vmatmul.mubr.f32.vlgmr.msra.gmra.mrb[20].mxu1 %v1810_v30  ;;  %v1860_v30 = vld [vmem:[%s16652_s5 + $0x190] sm:$0xff] }
 0x7bf   :  { %11632 = vmatprep.mubr.msk.f32.mxu1 %vm1912_vm13, %v1813_v33  ;;  %v1865_v33 = vld [vmem:[%s16652_s5 + $0x1b8] sm:$0xff] }
 0x7c2   :  { %2088 = vmatmul.mubr.f32.gmra.mrb[22].mxu1 %v1812_v35  ;;  %v1867_v35 = vld [vmem:[%s16652_s5 + $0x1c8] sm:$0xff] }
 0x7c3   :  { %11633 = vmatprep.mubr.msk.f32.mxu1 %vm1912_vm13, %v1815_v38  ;;  %v1868_v38 = vld [vmem:[%s16652_s5 + $0x1d0] sm:$0xff] }
 0x7c6   :  { %2093 = vmatmul.mubr.f32.gmra.mrb[24].mxu1 %v1814_v42  ;;  %v1872_v42 = vld [vmem:[%s16652_s5 + $0x1f0] sm:$0xff] }
 0x7c7   :  { %11634 = vmatprep.mubr.msk.f32.mxu1 %vm1912_vm13, %v1817_v44  ;;  %v1874_v44 = vld [vmem:[%s16652_s5 + $0x200] sm:$0xff] }
 0x7ca   :  { %2098 = vmatmul.mubr.f32.gmra.mrb[26].mxu1 %v1816_v46  ;;  %v1876_v46 = vld [vmem:[%s16652_s5 + $0x210] sm:$0xff] }
 0x7cb   :  { %11635 = vmatprep.mubr.msk.f32.mxu1 %vm1912_vm13, %v1819_v47  ;;  %v1879_v47 = vld [vmem:[%s16652_s5 + $0x228] sm:$0xff] }
 0x7ce   :  { %2103 = vmatmul.mubr.f32.gmra.mrb[28].mxu1 %v1818_v48  ;;  %v1878_v48 = vld [vmem:[%s16652_s5 + $0x220] sm:$0xff] }
 0x7cf   :  { %11636 = vmatprep.mubr.msk.f32.mxu1 %vm1912_vm13, %v1821_v49 }
 0x7d2   :  { %2108 = vmatmul.mubr.f32.gmra.mrb[30].mxu1 %v1820_v50 }
 0x7d3   :  { %11637 = vmatprep.mubr.msk.f32.mxu1 %vm1912_vm13, %v1823_v51 }
 0x7d6   :  { %2113 = vmatmul.mubr.f32.gmra.mrb[32].mxu1 %v1822_v52 }
 0x7d7   :  { %11638 = vmatprep.mubr.msk.f32.mxu1 %vm1912_vm13, %v1825_v53  ;;  %v15531_v53 = vld [vmem:[%s16655_s17] ss:$0 sm:$0xff] }
 0x7da   :  { %2118 = vmatmul.mubr.f32.gmra.mrb[34].mxu1 %v1824_v54 }
 0x7db   :  { %11639 = vmatprep.mubr.msk.f32.mxu1 %vm1912_vm13, %v1827_v55 }
 0x7de   :  { %2123 = vmatmul.mubr.f32.gmra.mrb[36].mxu1 %v1826_v56 }
 0x7df   :  { %11640 = vmatprep.mubr.msk.f32.mxu1 %vm1912_vm13, %v1829_v57 }
 0x7e2   :  { %2128 = vmatmul.mubr.f32.gmra.mrb[38].mxu1 %v1828_v58  ;;  %v2259_v58 = vld [vmem:[%s16656_s21 + $0x8] sm:$0xff] }
 0x7e3   :  { %11641 = vmatprep.mubr.msk.f32.mxu1 %vm1912_vm13, %v1831_v59  ;;  %2335 = vmatprep.mubr.f32.mxu0 %v2259_v58  ;;  %v11707_v59 = vld [vmem:[%s16656_s21 + $0xc8] sm:$0xff] }
 0x7e6   :  { %2133 = vmatmul.mubr.f32.gmra.mrb[40].mxu1 %v1830_v60 }
 0x7e7   :  { %11642 = vmatprep.mubr.msk.f32.mxu1 %vm1912_vm13, %v1833_v61 }
 0x7ea   :  { %2138 = vmatmul.mubr.f32.gmra.mrb[42].mxu1 %v1832_v62 }
 0x7eb   :  { %11643 = vmatprep.mubr.msk.f32.mxu1 %vm1912_vm13, %v1835_v63  ;;  %v11626_v63 = vld [vmem:[%s16657_s25] ss:$0 sm:$0xff] }
 0x7ee   :  { %2143 = vmatmul.mubr.f32.gmra.mrb[44].mxu1 %v1834_v2 }
 0x7ef   :  { %11644 = vmatprep.mubr.msk.f32.mxu1 %vm1912_vm13, %v1837_v3 }
 0x7f2   :  { %2148 = vmatmul.mubr.f32.gmra.mrb[46].mxu1 %v1836_v4 }
 0x7f3   :  { %11645 = vmatprep.mubr.msk.f32.mxu1 %vm1912_vm13, %v1839_v5 }
 0x7f6   :  { %2153 = vmatmul.mubr.f32.gmra.mrb[48].mxu1 %v1838_v6 }
 0x7f7   :  { %11646 = vmatprep.mubr.msk.f32.mxu1 %vm1912_vm13, %v1841_v7 }
 0x7fa   :  { %2158 = vmatmul.mubr.f32.gmra.mrb[50].mxu1 %v1840_v8 }
 0x7fb   :  { %11647 = vmatprep.mubr.msk.f32.mxu1 %vm1912_vm13, %v1843_v9 }
 0x7fe   :  { %2163 = vmatmul.mubr.f32.gmra.mrb[52].mxu1 %v1842_v10 }
 0x7ff   :  { %11648 = vmatprep.mubr.msk.f32.mxu1 %vm1912_vm13, %v1845_v11 }
 0x802   :  { %2168 = vmatmul.mubr.f32.gmra.mrb[54].mxu1 %v1844_v12 }
 0x803   :  { %11649 = vmatprep.mubr.msk.f32.mxu1 %vm1912_vm13, %v1847_v13  ;;  %v11628_v13 = vld [vmem:[%s16658_s29] ss:$0 sm:$0xff] }
 0x806   :  { %2173 = vmatmul.mubr.f32.gmra.mrb[56].mxu1 %v1846_v14 }
 0x807   :  { %11650 = vmatprep.mubr.msk.f32.mxu1 %vm1912_vm13, %v1849_v15 }
 0x80a   :  { %2178 = vmatmul.mubr.f32.gmra.mrb[58].mxu1 %v1848_v16 }
 0x80b   :  { %11651 = vmatprep.mubr.msk.f32.mxu1 %vm1912_vm13, %v1851_v17 }
 0x80e   :  { %2183 = vmatmul.mubr.f32.gmra.mrb[60].mxu1 %v1850_v18 }
 0x80f   :  { %11652 = vmatprep.mubr.msk.f32.mxu1 %vm1912_vm13, %v1853_v19 }
 0x812   :  { %2188 = vmatmul.mubr.f32.gmra.mrb[62].mxu1 %v1852_v20 }
 0x813   :  { %11653 = vmatprep.mubr.msk.f32.mxu1 %vm1912_vm13, %v1855_v21 }
 0x816   :  { %2193 = vmatmul.mubr.f32.gmra.mrb[64].mxu1 %v1854_v22 }
 0x817   :  { %11654 = vmatprep.mubr.msk.f32.mxu1 %vm1912_vm13, %v1857_v23 }
 0x81a   :  { %2198 = vmatmul.mubr.f32.gmra.mrb[66].mxu1 %v1856_v24 }
 0x81b   :  { %11655 = vmatprep.mubr.msk.f32.mxu1 %vm1912_vm13, %v1859_v25 }
 0x81e   :  { %2203 = vmatmul.mubr.f32.gmra.mrb[68].mxu1 %v1858_v26 }
 0x81f   :  { %11656 = vmatprep.mubr.msk.f32.mxu1 %vm1912_vm13, %v1861_v27 }
 0x822   :  { %2208 = vmatmul.mubr.f32.gmra.mrb[70].mxu1 %v1860_v30 }
 0x823   :  { %11657 = vmatprep.mubr.msk.f32.mxu1 %vm1912_vm13, %v1863_v31 }
 0x826   :  { %2213 = vmatmul.mubr.f32.gmra.mrb[72].mxu1 %v1862_v32 }
 0x827   :  { %11658 = vmatprep.mubr.msk.f32.mxu1 %vm1912_vm13, %v1865_v33 }
 0x82a   :  { %2218 = vmatmul.mubr.f32.gmra.mrb[74].mxu1 %v1864_v34 }
 0x82b   :  { %11659 = vmatprep.mubr.msk.f32.mxu1 %vm1912_vm13, %v1867_v35 }
 0x82e   :  { %2223 = vmatmul.mubr.f32.gmra.mrb[76].mxu1 %v1866_v36 }
 0x82f   :  { %11660 = vmatprep.mubr.msk.f32.mxu1 %vm1912_vm13, %v1869_v37 }
 0x832   :  { %2228 = vmatmul.mubr.f32.gmra.mrb[78].mxu1 %v1868_v38 }
 0x833   :  { %11661 = vmatprep.mubr.msk.f32.mxu1 %vm1912_vm13, %v1871_v39 }
 0x836   :  { %2233 = vmatmul.mubr.f32.gmra.mrb[80].mxu1 %v1870_v40 }
 0x837   :  { %11662 = vmatprep.mubr.msk.f32.mxu1 %vm1912_vm13, %v1873_v41 }
 0x83a   :  { %2238 = vmatmul.mubr.f32.gmra.mrb[82].mxu1 %v1872_v42 }
 0x83b   :  { %11663 = vmatprep.mubr.msk.f32.mxu1 %vm1912_vm13, %v1875_v43 }
 0x83e   :  { %2243 = vmatmul.mubr.f32.gmra.mrb[84].mxu1 %v1874_v44 }
 0x83f   :  { %11664 = vmatprep.mubr.msk.f32.mxu1 %vm1912_vm13, %v1877_v45 }
 0x842   :  { %2248 = vmatmul.mubr.f32.gmra.mrb[86].mxu1 %v1876_v46 }
 0x843   :  { %11665 = vmatprep.mubr.msk.f32.mxu1 %vm1912_vm13, %v1879_v47 }
 0x846   :  { %2253 = vmatmul.mubr.f32.gmra.mrb[88].mxu1 %v1878_v48 }
 0x847   :  { %3326 = vmatprep.mubr.f32.mxu1 %v11707_v59 }
 0x858   :  { %v1778_v2 = vpop.f32.mrb[38].mxu0 }
 0x859   :  { %v15540_v4 = vadd.f32 %v11626_v63, %v1778_v2  ;;  %v13123_v5 = vpop.f32.mrb[39].mxu0 }
 0x85b   :  { %v1782_v9 = vmax.f32 %v15540_v4, 0.0  ;;  %v11923_v4 = vld [vmem:[%s16677_s16] ss:$0 sm:$0xff] }
 0x85d   :  { %v1790_v14 = vmul.f32 %v11628_v13, %v1782_v9 }
 0x85f   :  { %v15528_v49 = vpop.f32.mrb[18].mxu1  ;;  %v1791_v16 = vsel %vm1592_vm10, %v1790_v14, 0.0 }
 0x860   :  { %v13100_v50 = vpop.f32.mrb[19].mxu1  ;;  %1792 = vadd.xlane.f32.xlu0 %v1791_v16 }
 0x891   :  { %v2084_v51 = vpop.f32.mrb[20].mxu1 }
 0x892   :  { %v2086_v52 = vpop.f32.mrb[21].mxu1  ;;  %v2085_v55 = vadd.f32 %v15531_v53, %v2084_v51 }
 0x895   :  { %v2089_v54 = vpop.f32.mrb[22].mxu1 }
 0x896   :  { %v2090_v56 = vadd.f32 %v15531_v53, %v2089_v54  ;;  %v2091_v57 = vpop.f32.mrb[23].mxu1 }
 0x898   :  { %v15537_v60 = vpack.c.bf16 %v2090_v56, %v2085_v55 }
 0x899   :  { %v2094_v61 = vpop.f32.mrb[24].mxu1 }
 0x89a   :  { %v2096_v62 = vpop.f32.mrb[25].mxu1  ;;  %v2095_v6 = vadd.f32 %v15531_v53, %v2094_v61 }
 0x89d   :  { %v2099_v3 = vpop.f32.mrb[26].mxu1 }
 0x89e   :  { %v2100_v7 = vadd.f32 %v15531_v53, %v2099_v3  ;;  %v2101_v8 = vpop.f32.mrb[27].mxu1 }
 0x8a0   :  { %v15545_v10 = vpack.c.bf16 %v2100_v7, %v2095_v6 }
 0x8a1   :  { %v2104_v11 = vpop.f32.mrb[28].mxu1 }
 0x8a2   :  { %v2106_v12 = vpop.f32.mrb[29].mxu1  ;;  %v2105_v17 = vadd.f32 %v15531_v53, %v2104_v11 }
 0x8a5   :  { %v2109_v15 = vpop.f32.mrb[30].mxu1 }
 0x8a6   :  { %v2110_v18 = vadd.f32 %v15531_v53, %v2109_v15  ;;  %v2111_v19 = vpop.f32.mrb[31].mxu1 }
 0x8a8   :  { %v15553_v20 = vpack.c.bf16 %v2110_v18, %v2105_v17 }
 0x8a9   :  { %v2114_v21 = vpop.f32.mrb[32].mxu1 }
 0x8aa   :  { %v2116_v22 = vpop.f32.mrb[33].mxu1  ;;  %v2115_v24 = vadd.f32 %v15531_v53, %v2114_v21 }
 0x8ad   :  { %v2119_v23 = vpop.f32.mrb[34].mxu1 }
 0x8ae   :  { %v2120_v25 = vadd.f32 %v15531_v53, %v2119_v23  ;;  %v2121_v26 = vpop.f32.mrb[35].mxu1 }
 0x8b0   :  { %v15557_v27 = vpack.c.bf16 %v2120_v25, %v2115_v24 }
 0x8b1   :  { %v2124_v30 = vpop.f32.mrb[36].mxu1 }
 0x8b2   :  { %v2126_v31 = vpop.f32.mrb[37].mxu1  ;;  %v2125_v33 = vadd.f32 %v15531_v53, %v2124_v30 }
 0x8b5   :  { %v2129_v32 = vpop.f32.mrb[38].mxu1 }
 0x8b6   :  { %v2130_v34 = vadd.f32 %v15531_v53, %v2129_v32  ;;  %v2131_v35 = vpop.f32.mrb[39].mxu1 }
 0x8b8   :  { %v15561_v36 = vpack.c.bf16 %v2130_v34, %v2125_v33 }
 0x8b9   :  { %v2134_v37 = vpop.f32.mrb[40].mxu1 }
 0x8ba   :  { %v2136_v38 = vpop.f32.mrb[41].mxu1  ;;  %v2135_v40 = vadd.f32 %v15531_v53, %v2134_v37 }
 0x8bd   :  { %v2139_v39 = vpop.f32.mrb[42].mxu1 }
 0x8be   :  { %v2140_v41 = vadd.f32 %v15531_v53, %v2139_v39  ;;  %v2141_v42 = vpop.f32.mrb[43].mxu1 }
 0x8c0   :  { %v15565_v43 = vpack.c.bf16 %v2140_v41, %v2135_v40 }
 0x8c1   :  { %v2144_v44 = vpop.f32.mrb[44].mxu1 }
 0x8c2   :  { %v2146_v45 = vpop.f32.mrb[45].mxu1  ;;  %v2145_v47 = vadd.f32 %v15531_v53, %v2144_v44 }
 0x8c5   :  { %v2149_v46 = vpop.f32.mrb[46].mxu1 }
 0x8c6   :  { %v2150_v48 = vadd.f32 %v15531_v53, %v2149_v46  ;;  %v2151_v50 = vpop.f32.mrb[47].mxu1 }
 0x8c8   :  { %v15569_v51 = vpack.c.bf16 %v2150_v48, %v2145_v47 }
 0x8c9   :  { %v2154_v52 = vpop.f32.mrb[48].mxu1 }
 0x8ca   :  { %v2156_v54 = vpop.f32.mrb[49].mxu1  ;;  %v2155_v56 = vadd.f32 %v15531_v53, %v2154_v52 }
 0x8cd   :  { %v2159_v55 = vpop.f32.mrb[50].mxu1 }
 0x8ce   :  { %v2160_v57 = vadd.f32 %v15531_v53, %v2159_v55  ;;  %v2161_v58 = vpop.f32.mrb[51].mxu1 }
 0x8d0   :  { %v15573_v59 = vpack.c.bf16 %v2160_v57, %v2155_v56 }
 0x8d1   :  { %v2164_v61 = vpop.f32.mrb[52].mxu1 }
 0x8d2   :  { %v2166_v62 = vpop.f32.mrb[53].mxu1  ;;  %v2165_v2 = vadd.f32 %v15531_v53, %v2164_v61 }
 0x8d5   :  { %v2169_v63 = vpop.f32.mrb[54].mxu1 }
 0x8d6   :  { %v2170_v3 = vadd.f32 %v15531_v53, %v2169_v63  ;;  %v2171_v5 = vpop.f32.mrb[55].mxu1 }
 0x8d8   :  { %v15577_v6 = vpack.c.bf16 %v2170_v3, %v2165_v2 }
 0x8d9   :  { %v2174_v7 = vpop.f32.mrb[56].mxu1 }
 0x8da   :  { %v2176_v8 = vpop.f32.mrb[57].mxu1  ;;  %14088 = vmatprep.subr.bf16.mxu0 %v15577_v6  ;;  %14248 = vmatprep.subr.bf16.mxu1 %v15577_v6  ;;  %v2175_v12 = vadd.f32 %v15531_v53, %v2174_v7 }
 0x8db   :  { %14090 = vmatpush3.bf16.msra.mxu0 %v15537_v60  ;;  %14250 = vmatpush3.bf16.msra.mxu1 %v15537_v60 }
 0x8dd   :  { %v2179_v11 = vpop.f32.mrb[58].mxu1 }
 0x8de   :  { %v2180_v13 = vadd.f32 %v15531_v53, %v2179_v11  ;;  %v2181_v14 = vpop.f32.mrb[59].mxu1 }
 0x8df   :  { %v11706_v14 = vld [vmem:[%s16656_s21 + $0xc0] sm:$0xff] }
 0x8e0   :  { %v15585_v15 = vpack.c.bf16 %v2180_v13, %v2175_v12  ;;  %v2258_v13 = vld [vmem:[%s16656_s21] sm:$0xff] }
 0x8e1   :  { %v2184_v16 = vpop.f32.mrb[60].mxu1 }
 0x8e2   :  { %v2186_v17 = vpop.f32.mrb[61].mxu1  ;;  %14092 = vmatprep.subr.bf16.mxu0 %v15585_v15  ;;  %14252 = vmatprep.subr.bf16.mxu1 %v15585_v15  ;;  %v2185_v19 = vadd.f32 %v15531_v53, %v2184_v16  ;;  %v2262_v16 = vld [vmem:[%s16656_s21 + $0x20] sm:$0x3] }
 0x8e3   :  { %14094 = vmatpush3.bf16.msra.mxu0 %v15545_v10  ;;  %14254 = vmatpush3.bf16.msra.mxu1 %v15545_v10  ;;  %v11710_v17 = vld [vmem:[%s16656_s21 + $0xe0] sm:$0x3] }
 0x8e5   :  { %v2189_v18 = vpop.f32.mrb[62].mxu1 }
 0x8e6   :  { %v2190_v21 = vadd.f32 %v15531_v53, %v2189_v18  ;;  %v2191_v22 = vpop.f32.mrb[63].mxu1 }
 0x8e8   :  { %v15593_v23 = vpack.c.bf16 %v2190_v21, %v2185_v19 }
 0x8e9   :  { %v2194_v24 = vpop.f32.mrb[64].mxu1 }
 0x8ea   :  { %v2196_v25 = vpop.f32.mrb[65].mxu1  ;;  %14096 = vmatprep.subr.bf16.mxu0 %v15593_v23  ;;  %14256 = vmatprep.subr.bf16.mxu1 %v15593_v23  ;;  %v2195_v30 = vadd.f32 %v15531_v53, %v2194_v24 }
 0x8eb   :  { %14098 = vmatpush3.bf16.msra.mxu0 %v15553_v20  ;;  %14258 = vmatpush3.bf16.msra.mxu1 %v15553_v20 }
 0x8ed   :  { %v2199_v26 = vpop.f32.mrb[66].mxu1 }
 0x8ee   :  { %v2200_v31 = vadd.f32 %v15531_v53, %v2199_v26  ;;  %v2201_v32 = vpop.f32.mrb[67].mxu1  ;;  %v2261_v26 = vld [vmem:[%s16656_s21 + $0x18] sm:$0x3] }
 0x8f0   :  { %v15601_v33 = vpack.c.bf16 %v2200_v31, %v2195_v30  ;;  %v11709_v30 = vld [vmem:[%s16656_s21 + $0xd8] sm:$0x3] }
 0x8f1   :  { %v2204_v34 = vpop.f32.mrb[68].mxu1 }
 0x8f2   :  { %v2206_v35 = vpop.f32.mrb[69].mxu1  ;;  %14100 = vmatprep.subr.bf16.mxu0 %v15601_v33  ;;  %14260 = vmatprep.subr.bf16.mxu1 %v15601_v33  ;;  %v2205_v38 = vadd.f32 %v15531_v53, %v2204_v34  ;;  %v2260_v34 = vld [vmem:[%s16656_s21 + $0x10] sm:$0xff] }
 0x8f3   :  { %14102 = vmatpush3.bf16.msra.mxu0 %v15557_v27  ;;  %14262 = vmatpush3.bf16.msra.mxu1 %v15557_v27  ;;  %v11720_v35 = vld [vmem:[%s16656_s21 + $0x100] sm:$0xff] }
 0x8f5   :  { %v2209_v37 = vpop.f32.mrb[70].mxu1 }
 0x8f6   :  { %v2210_v39 = vadd.f32 %v15531_v53, %v2209_v37  ;;  %v2211_v40 = vpop.f32.mrb[71].mxu1  ;;  %v11723_v37 = vld [vmem:[%s16656_s21 + $0x118] sm:$0x3] }
 0x8f7   :  { %v11668_v40 = vld [vmem:[%s16656_s21 + $0x30] sm:$0xff] }
 0x8f8   :  { %v15609_v41 = vpack.c.bf16 %v2210_v39, %v2205_v38  ;;  %v11669_v38 = vld [vmem:[%s16656_s21 + $0x38] sm:$0xff]  ;;  %v11731_v39 = vld [vmem:[%s16656_s21 + $0x128] sm:$0xff] }
 0x8f9   :  { %v2214_v42 = vpop.f32.mrb[72].mxu1 }
 0x8fa   :  { %v2216_v44 = vpop.f32.mrb[73].mxu1  ;;  %14104 = vmatprep.subr.bf16.mxu0 %v15609_v41  ;;  %14264 = vmatprep.subr.bf16.mxu1 %v15609_v41  ;;  %v2215_v46 = vadd.f32 %v15531_v53, %v2214_v42  ;;  %v11672_v42 = vld [vmem:[%s16656_s21 + $0x50] sm:$0x3] }
 0x8fb   :  { %14106 = vmatpush3.bf16.msra.mxu0 %v15561_v36  ;;  %14266 = vmatpush3.bf16.msra.mxu1 %v15561_v36  ;;  %v11730_v44 = vld [vmem:[%s16656_s21 + $0x120] sm:$0xff] }
 0x8fd   :  { %v2219_v45 = vpop.f32.mrb[74].mxu1 }
 0x8fe   :  { %v2220_v47 = vadd.f32 %v15531_v53, %v2219_v45  ;;  %v2221_v48 = vpop.f32.mrb[75].mxu1  ;;  %v11734_v45 = vld [vmem:[%s16656_s21 + $0x140] sm:$0x3] }
 0x8ff   :  { %v11733_v48 = vld [vmem:[%s16656_s21 + $0x138] sm:$0x3] }
 0x900   :  { %v15617_v50 = vpack.c.bf16 %v2220_v47, %v2215_v46  ;;  %v11671_v46 = vld [vmem:[%s16656_s21 + $0x48] sm:$0x3]  ;;  %v11670_v47 = vld [vmem:[%s16656_s21 + $0x40] sm:$0xff] }
 0x901   :  { %v2224_v52 = vpop.f32.mrb[76].mxu1 }
 0x902   :  { %v2226_v54 = vpop.f32.mrb[77].mxu1  ;;  %14108 = vmatprep.subr.bf16.mxu0 %v15617_v50  ;;  %14268 = vmatprep.subr.bf16.mxu1 %v15617_v50  ;;  %v2225_v56 = vadd.f32 %v15531_v53, %v2224_v52  ;;  %v11744_v52 = vld [vmem:[%s16656_s21 + $0x160] sm:$0xff] }
 0x903   :  { %14110 = vmatpush3.bf16.msra.mxu0 %v15565_v43  ;;  %14270 = vmatpush3.bf16.msra.mxu1 %v15565_v43  ;;  %v11673_v54 = vld [vmem:[%s16656_s21 + $0x58] sm:$0x3] }
 0x905   :  { %v2229_v55 = vpop.f32.mrb[78].mxu1 }
 0x906   :  { %v2230_v57 = vadd.f32 %v15531_v53, %v2229_v55  ;;  %v2231_v58 = vpop.f32.mrb[79].mxu1  ;;  %v11747_v55 = vld [vmem:[%s16656_s21 + $0x178] sm:$0x3] }
 0x908   :  { %v15625_v61 = vpack.c.bf16 %v2230_v57, %v2225_v56  ;;  %v11676_v56 = vld [vmem:[%s16659_s3 + $0x10] sm:$0xff]  ;;  %v11677_v57 = vld [vmem:[%s16659_s3 + $0x18] sm:$0xff] }
 0x909   :  { %v2234_v62 = vpop.f32.mrb[80].mxu1  ;;  %v14159_v58 = vpack.c.bf16 %v11677_v57, %v11676_v56 }
 0x90a   :  { %v2236_v63 = vpop.f32.mrb[81].mxu1  ;;  %14112 = vmatprep.subr.bf16.mxu0 %v15625_v61  ;;  %14272 = vmatprep.subr.bf16.mxu1 %v15625_v61  ;;  %v2235_v3 = vadd.f32 %v15531_v53, %v2234_v62  ;;  %v2421_v62 = vld [vmem:[%s16659_s3] sm:$0xff] }
 0x90b   :  { %14114 = vmatpush3.bf16.msra.mxu0 %v15569_v51  ;;  %14274 = vmatpush3.bf16.msra.mxu1 %v15569_v51  ;;  %v2422_v63 = vld [vmem:[%s16659_s3 + $0x8] sm:$0xff] }
 0x90d   :  { %v2239_v2 = vpop.f32.mrb[82].mxu1 }
 0x90e   :  { %v2240_v5 = vadd.f32 %v15531_v53, %v2239_v2  ;;  %v2241_v7 = vpop.f32.mrb[83].mxu1  ;;  %v14163_v2 = vpack.c.bf16 %v2422_v63, %v2421_v62 }
 0x910   :  { %v15633_v8 = vpack.c.bf16 %v2240_v5, %v2235_v3 }
 0x911   :  { %v2244_v11 = vpop.f32.mrb[84].mxu1 }
 0x912   :  { %v2246_v12 = vpop.f32.mrb[85].mxu1  ;;  %14116 = vmatprep.subr.bf16.mxu0 %v15633_v8  ;;  %14276 = vmatprep.subr.bf16.mxu1 %v15633_v8  ;;  %v2245_v19 = vadd.f32 %v15531_v53, %v2244_v11 }
 0x913   :  { %14118 = vmatpush3.bf16.msra.mxu0 %v15573_v59  ;;  %14278 = vmatpush3.bf16.msra.mxu1 %v15573_v59 }
 0x915   :  { %v2249_v18 = vpop.f32.mrb[86].mxu1 }
 0x916   :  { %v2250_v21 = vadd.f32 %v15531_v53, %v2249_v18  ;;  %v2251_v22 = vpop.f32.mrb[87].mxu1  ;;  %2336 = vmatmul.mubr.f32.vlgmr.msra.gmra.mrb[40].mxu0 %v2258_v13  ;;  %3327 = vmatmul.mubr.f32.vlgmr.msra.gmra.mrb[90].mxu1 %v11706_v14 }
 0x917   :  { %2340 = vmatprep.mubr.f32.mxu0 %v2262_v16  ;;  %3331 = vmatprep.mubr.f32.mxu1 %v11710_v17 }
 0x918   :  { %v15645_v24 = vpack.c.bf16 %v2250_v21, %v2245_v19 }
 0x919   :  { %v2254_v25 = vpop.f32.mrb[88].mxu1 }
 0x91a   :  { %v15650_v31 = vadd.f32 %v15531_v53, %v2254_v25  ;;  %14120 = vmatprep.subr.bf16.mxu0 %v15645_v24  ;;  %14320 = vmatprep.subr.bf16.mxu1 %v15645_v24  ;;  %v2256_v32 = vpop.f32.mrb[89].mxu1  ;;  %v2263_v53 = vld [vmem:[%s16656_s21 + $0x28] sm:$0x3] }
 0x91b   :  { %14122 = vmatpush3.bf16.msra.mxu0 %v15645_v24  ;;  %14322 = vmatpush3.bf16.msra.mxu1 %v15645_v24 }
 0x91c   :  { %2341 = vmatmul.mubr.f32.gmra.mrb[42].mxu0 %v2261_v26  ;;  %3332 = vmatmul.mubr.f32.gmra.mrb[92].mxu1 %v11709_v30 }
 0x91d   :  { %13128 = vmatprep.subr.mxu0 %v15650_v31  ;;  %13208 = vmatprep.subr.mxu1 %v15650_v31 }
 0x91e   :  { %13130 = vmatprep.mubr.msk.f32.mxu0 %vm2264_vm14, %v2260_v34  ;;  %13210 = vmatprep.mubr.msk.f32.mxu1 %vm2264_vm14, %v11720_v35 }
 0x91f   :  { %13129 = vmatpush3.msra.mxu0 %v15650_v31  ;;  %13209 = vmatpush3.msra.mxu1 %v15650_v31 }
 0x920   :  { %13131 = vmatmul.mubr.msk.f32.vlgmr.msra.gmra.mrb[44].mxu0 %vm2264_vm14, %v2263_v53  ;;  %14124 = vmatprep.subr.bf16.mxu0 %v15577_v6 }
 0x921   :  { %14328 = vmatprep.subr.bf16.mxu1 %v15577_v6  ;;  %14126 = vmatpush3.bf16.msra.mxu0 %v15537_v60 }
 0x922   :  { %13211 = vmatmul.mubr.msk.f32.vlgmr.msra.gmra.mrb[94].mxu1 %vm2264_vm14, %v11723_v37  ;;  %14128 = vmatprep.subr.bf16.mxu0 %v15585_v15  ;;  %v11683_v37 = vld [vmem:[%s16656_s21 + $0x68] sm:$0xff] }
 0x923   :  { %14330 = vmatpush3.bf16.msra.mxu1 %v15537_v60  ;;  %2500 = vmatprep.mubr.f32.mxu0 %v11669_v38  ;;  %v11682_v38 = vld [vmem:[%s16656_s21 + $0x60] sm:$0xff] }
 0x924   :  { %14332 = vmatprep.subr.bf16.mxu1 %v15585_v15  ;;  %3824 = vmatprep.mubr.f32.mxu1 %v11731_v39  ;;  %v11686_v39 = vld [vmem:[%s16656_s21 + $0x80] sm:$0x3] }
 0x925   :  { %14130 = vmatpush3.bf16.msra.mxu0 %v15545_v10 }
 0x926   :  { %14132 = vmatprep.subr.bf16.mxu0 %v15593_v23 }
 0x927   :  { %14334 = vmatpush3.bf16.msra.mxu1 %v15545_v10 }
 0x928   :  { %14336 = vmatprep.subr.bf16.mxu1 %v15593_v23 }
 0x929   :  { %14134 = vmatpush3.bf16.msra.mxu0 %v15553_v20 }
 0x92a   :  { %14136 = vmatprep.subr.bf16.mxu0 %v15601_v33 }
 0x92b   :  { %14338 = vmatpush3.bf16.msra.mxu1 %v15553_v20 }
 0x92c   :  { %14340 = vmatprep.subr.bf16.mxu1 %v15601_v33 }
 0x92d   :  { %14138 = vmatpush3.bf16.msra.mxu0 %v15557_v27 }
 0x92e   :  { %14140 = vmatprep.subr.bf16.mxu0 %v15609_v41 }
 0x92f   :  { %14342 = vmatpush3.bf16.msra.mxu1 %v15557_v27 }
 0x930   :  { %14344 = vmatprep.subr.bf16.mxu1 %v15609_v41 }
 0x931   :  { %14142 = vmatpush3.bf16.msra.mxu0 %v15561_v36 }
 0x932   :  { %14144 = vmatprep.subr.bf16.mxu0 %v15617_v50 }
 0x933   :  { %14346 = vmatpush3.bf16.msra.mxu1 %v15561_v36 }
 0x934   :  { %14348 = vmatprep.subr.bf16.mxu1 %v15617_v50 }
 0x935   :  { %14146 = vmatpush3.bf16.msra.mxu0 %v15565_v43 }
 0x936   :  { %14148 = vmatprep.subr.bf16.mxu0 %v15625_v61 }
 0x937   :  { %14350 = vmatpush3.bf16.msra.mxu1 %v15565_v43 }
 0x938   :  { %14352 = vmatprep.subr.bf16.mxu1 %v15625_v61 }
 0x939   :  { %14150 = vmatpush3.bf16.msra.mxu0 %v15569_v51 }
 0x93a   :  { %14152 = vmatprep.subr.bf16.mxu0 %v15633_v8 }
 0x93b   :  { %14354 = vmatpush3.bf16.msra.mxu1 %v15569_v51 }
 0x93c   :  { %14356 = vmatprep.subr.bf16.mxu1 %v15633_v8 }
 0x93d   :  { %14154 = vmatpush3.bf16.msra.mxu0 %v15573_v59 }
 0x93e   :  { %14156 = vmatprep.subr.bf16.mxu0 %v15645_v24 }
 0x93f   :  { %14358 = vmatpush3.bf16.msra.mxu1 %v15573_v59 }
 0x940   :  { %14400 = vmatprep.subr.bf16.mxu1 %v15645_v24  ;;  %2501 = vmatmul.mubr.f32.vlgmr.msra.gmra.mrb[46].mxu0 %v11668_v40  ;;  %v11690_v40 = vld [vmem:[%s16659_s3 + $0x20] sm:$0xff] }
 0x941   :  { %14158 = vmatpush3.bf16.msra.mxu0 %v15645_v24  ;;  %2505 = vmatprep.mubr.f32.mxu0 %v11672_v42  ;;  %v11691_v42 = vld [vmem:[%s16659_s3 + $0x28] sm:$0xff] }
 0x942   :  { %3825 = vmatmul.mubr.f32.vlgmr.msra.gmra.mrb[96].mxu1 %v11730_v44  ;;  %13137 = vmatprep.subr.mxu0 %v15650_v31  ;;  %v11685_v44 = vld [vmem:[%s16656_s21 + $0x78] sm:$0x3] }
 0x943   :  { %14402 = vmatpush3.bf16.msra.mxu1 %v15645_v24  ;;  %3829 = vmatprep.mubr.f32.mxu1 %v11734_v45  ;;  %v11684_v45 = vld [vmem:[%s16656_s21 + $0x70] sm:$0xff] }
 0x944   :  { %13240 = vmatprep.subr.mxu1 %v15650_v31  ;;  %2506 = vmatmul.mubr.f32.gmra.mrb[48].mxu0 %v11671_v46  ;;  %v14203_v46 = vpack.c.bf16 %v11691_v42, %v11690_v40 }
 0x945   :  { %13138 = vmatpush3.msra.mxu0 %v15650_v31  ;;  %13139 = vmatprep.mubr.msk.f32.mxu0 %vm2264_vm14, %v11670_v47  ;;  %v11687_v47 = vld [vmem:[%s16656_s21 + $0x88] sm:$0x3] }
 0x946   :  { %3830 = vmatmul.mubr.f32.gmra.mrb[98].mxu1 %v11733_v48  ;;  %14160 = vmatprep.subr.bf16.mxu0 %v14159_v58 }
 0x947   :  { %13241 = vmatpush3.msra.mxu1 %v15650_v31  ;;  %13242 = vmatprep.mubr.msk.f32.mxu1 %vm2264_vm14, %v11744_v52 }
 0x948   :  { %14408 = vmatprep.subr.bf16.mxu1 %v15577_v6  ;;  %13140 = vmatmul.mubr.msk.f32.vlgmr.msra.gmra.mrb[50].mxu0 %vm2264_vm14, %v11673_v54 }
 0x949   :  { %14162 = vmatpush3.bf16.msra.mxu0 %v14159_v58 }
 0x94a   :  { %13243 = vmatmul.mubr.msk.f32.vlgmr.msra.gmra.mrb[100].mxu1 %vm2264_vm14, %v11747_v55  ;;  %14164 = vmatprep.subr.bf16.mxu0 %v14163_v2 }
 0x94b   :  { %14410 = vmatpush3.bf16.msra.mxu1 %v15537_v60 }
 0x94c   :  { %14412 = vmatprep.subr.bf16.mxu1 %v15585_v15 }
 0x94f   :  { %14414 = vmatpush3.bf16.msra.mxu1 %v15545_v10 }
 0x950   :  { %14416 = vmatprep.subr.bf16.mxu1 %v15593_v23 }
 0x953   :  { %14418 = vmatpush3.bf16.msra.mxu1 %v15553_v20 }
 0x954   :  { %14420 = vmatprep.subr.bf16.mxu1 %v15601_v33 }
 0x957   :  { %14422 = vmatpush3.bf16.msra.mxu1 %v15557_v27 }
 0x958   :  { %14424 = vmatprep.subr.bf16.mxu1 %v15609_v41 }
 0x95b   :  { %14426 = vmatpush3.bf16.msra.mxu1 %v15561_v36 }
 0x95c   :  { %14428 = vmatprep.subr.bf16.mxu1 %v15617_v50 }
 0x95f   :  { %14430 = vmatpush3.bf16.msra.mxu1 %v15565_v43 }
 0x960   :  { %14432 = vmatprep.subr.bf16.mxu1 %v15625_v61 }
 0x963   :  { %14434 = vmatpush3.bf16.msra.mxu1 %v15569_v51 }
 0x964   :  { %14436 = vmatprep.subr.bf16.mxu1 %v15633_v8 }
 0x967   :  { %14438 = vmatpush3.bf16.msra.mxu1 %v15573_v59 }
 0x968   :  { %14455 = vmatprep.subr.bf16.mxu1 %v14893_v0 }
 0x9e9   :  { %v12191_v3 = vpop.f32.mrb[40].mxu0 }
 0x9ea   :  { %v12192_v5 = vpop.f32.mrb[41].mxu0 }
 0x9eb   :  { %v12193_v7 = vadd.f32 %v12192_v5, %v12191_v3  ;;  %v11695_v3 = vld [vmem:[%s16656_s21 + $0x98] sm:$0xff]  ;;  %v11694_v5 = vld [vmem:[%s16656_s21 + $0x90] sm:$0xff] }
 0x9ef   :  { %v12194_v11 = vpop.f32.mrb[42].mxu0 }
 0x9f0   :  { %v12195_v12 = vpop.f32.mrb[43].mxu0 }
 0x9f1   :  { %v12196_v13 = vadd.f32 %v12195_v12, %v12194_v11  ;;  %v11702_v11 = vld [vmem:[%s16659_s3 + $0x30] sm:$0xff]  ;;  %v11703_v12 = vld [vmem:[%s16659_s3 + $0x38] sm:$0xff] }
 0x9f3   :  { %v13132_v14 = vpop.f32.mrb[44].mxu0 }
 0x9f4   :  { %v2418_v16 = vadd.f32 %v13132_v14, %v12196_v13  ;;  %v2412_v17 = vpop.f32.mrb[45].mxu0  ;;  %v11697_v13 = vld [vmem:[%s16656_s21 + $0xa8] sm:$0x3]  ;;  %v11696_v14 = vld [vmem:[%s16656_s21 + $0xa0] sm:$0xff] }
 0x9f5   :  { %v2413_v18 = vadd.f32 %v12193_v7, %v2412_v17  ;;  %v11698_v7 = vld [vmem:[%s16656_s21 + $0xb0] sm:$0x3]  ;;  %v11699_v17 = vld [vmem:[%s16656_s21 + $0xb8] sm:$0x3] }
 0xa13   :  { %v12234_v19 = vpop.f32.mrb[46].mxu0 }
 0xa14   :  { %v12235_v21 = vpop.f32.mrb[47].mxu0 }
 0xa15   :  { %v12236_v22 = vadd.f32 %v12235_v21, %v12234_v19 }
 0xa17   :  { %v12237_v25 = vpop.f32.mrb[48].mxu0 }
 0xa18   :  { %v12238_v26 = vpop.f32.mrb[49].mxu0 }
 0xa19   :  { %v12239_v30 = vadd.f32 %v12238_v26, %v12237_v25 }
 0xa1b   :  { %v13141_v32 = vpop.f32.mrb[50].mxu0 }
 0xa1c   :  { %v2583_v34 = vadd.f32 %v13141_v32, %v12239_v30  ;;  %v2577_v35 = vpop.f32.mrb[51].mxu0 }
 0xa1d   :  { %v2578_v53 = vadd.f32 %v12236_v22, %v2577_v35 }
 0xa1f   :  { %13146 = vmatprep.mubr.msk.f32.mxu0 %vm624_vm4, %v2578_v53 }
 0xa20   :  { %13147 = vmatmul.mubr.msk.f32.vlgmr.msra.gmra.mrb[52].mxu0 %vm624_vm4, %v2583_v34 }
 0xa21   :  { %14166 = vmatpush3.bf16.msra.mxu0 %v14163_v2  ;;  %13153 = vmatprep.mubr.msk.f32.mxu0 %vm624_vm4, %v2413_v18  ;;  %v12379_v18 = vpop.f32.mrb[90].mxu1 }
 0xa22   :  { %14168 = vmatprep.subr.bf16.mxu0 %v15577_v6  ;;  %v12380_v19 = vpop.f32.mrb[91].mxu1 }
 0xa23   :  { %v12381_v21 = vadd.f32 %v12380_v19, %v12379_v18  ;;  %v12382_v22 = vpop.f32.mrb[92].mxu1 }
 0xa24   :  { %v12383_v25 = vpop.f32.mrb[93].mxu1 }
 0xa25   :  { %v12384_v26 = vadd.f32 %v12383_v25, %v12382_v22 }
 0xa28   :  { %13154 = vmatmul.mubr.msk.f32.vlgmr.msra.gmra.mrb[52].mxu0 %vm624_vm4, %v2418_v16  ;;  %v14243_v16 = vpack.c.bf16 %v11703_v12, %v11702_v11 }
 0xa29   :  { %14170 = vmatpush3.bf16.msra.mxu0 %v15537_v60  ;;  %2828 = vmatprep.mubr.f32.mxu0 %v11683_v37 }
 0xa2a   :  { %14172 = vmatprep.subr.bf16.mxu0 %v15585_v15 }
 0xa2d   :  { %14174 = vmatpush3.bf16.msra.mxu0 %v15545_v10 }
 0xa2e   :  { %14176 = vmatprep.subr.bf16.mxu0 %v15593_v23 }
 0xa31   :  { %14178 = vmatpush3.bf16.msra.mxu0 %v15553_v20 }
 0xa32   :  { %14180 = vmatprep.subr.bf16.mxu0 %v15601_v33 }
 0xa35   :  { %14182 = vmatpush3.bf16.msra.mxu0 %v15557_v27 }
 0xa36   :  { %14184 = vmatprep.subr.bf16.mxu0 %v15609_v41 }
 0xa39   :  { %14186 = vmatpush3.bf16.msra.mxu0 %v15561_v36 }
 0xa3a   :  { %14188 = vmatprep.subr.bf16.mxu0 %v15617_v50 }
 0xa3d   :  { %14190 = vmatpush3.bf16.msra.mxu0 %v15565_v43 }
 0xa3e   :  { %14192 = vmatprep.subr.bf16.mxu0 %v15625_v61 }
 0xa41   :  { %14194 = vmatpush3.bf16.msra.mxu0 %v15569_v51 }
 0xa42   :  { %14196 = vmatprep.subr.bf16.mxu0 %v15633_v8 }
 0xa45   :  { %14198 = vmatpush3.bf16.msra.mxu0 %v15573_v59 }
 0xa46   :  { %14200 = vmatprep.subr.bf16.mxu0 %v15645_v24 }
 0xa48   :  { %2829 = vmatmul.mubr.f32.vlgmr.msra.gmra.mrb[54].mxu0 %v11682_v38 }
 0xa49   :  { %14202 = vmatpush3.bf16.msra.mxu0 %v15645_v24  ;;  %2833 = vmatprep.mubr.f32.mxu0 %v11686_v39 }
 0xa4a   :  { %13160 = vmatprep.subr.mxu0 %v15650_v31 }
 0xa4c   :  { %2834 = vmatmul.mubr.f32.gmra.mrb[56].mxu0 %v11685_v44  ;;  %v11708_v44 = vld [vmem:[%s16656_s21 + $0xd0] sm:$0xff] }
 0xa4d   :  { %13161 = vmatpush3.msra.mxu0 %v15650_v31  ;;  %13162 = vmatprep.mubr.msk.f32.mxu0 %vm2264_vm14, %v11684_v45  ;;  %v11714_v45 = vld [vmem:[%s16659_s3 + $0x40] sm:$0xff] }
 0xa4e   :  { %14204 = vmatprep.subr.bf16.mxu0 %v14203_v46 }
 0xa50   :  { %13163 = vmatmul.mubr.msk.f32.vlgmr.msra.gmra.mrb[58].mxu0 %vm2264_vm14, %v11687_v47 }
 0xa51   :  { %14206 = vmatpush3.bf16.msra.mxu0 %v14203_v46  ;;  %v11715_v46 = vld [vmem:[%s16659_s3 + $0x48] sm:$0xff] }
 0xa52   :  { %14208 = vmatprep.subr.bf16.mxu0 %v15577_v6  ;;  %v14283_v47 = vpack.c.bf16 %v11715_v46, %v11714_v45  ;;  %v11743_v46 = vld [vmem:[%s16656_s21 + $0x158] sm:$0xff] }
 0xb1b   :  { %v12285_v48 = vpop.f32.mrb[54].mxu0 }
 0xb1c   :  { %v12286_v52 = vpop.f32.mrb[55].mxu0 }
 0xb1d   :  { %v12287_v54 = vadd.f32 %v12286_v52, %v12285_v48  ;;  %v11711_v48 = vld [vmem:[%s16656_s21 + $0xe8] sm:$0x3] }
 0xb1f   :  { %v12288_v55 = vpop.f32.mrb[56].mxu0 }
 0xb20   :  { %v12289_v56 = vpop.f32.mrb[57].mxu0 }
 0xb21   :  { %v12290_v57 = vadd.f32 %v12289_v56, %v12288_v55 }
 0xb23   :  { %v13164_v58 = vpop.f32.mrb[58].mxu0 }
 0xb24   :  { %v2911_v62 = vadd.f32 %v13164_v58, %v12290_v57  ;;  %v2905_v63 = vpop.f32.mrb[59].mxu0  ;;  %v11719_v57 = vld [vmem:[%s16656_s21 + $0xf8] sm:$0xff]  ;;  %v11726_v58 = vld [vmem:[%s16659_s3 + $0x50] sm:$0xff] }
 0xb25   :  { %v2906_v2 = vadd.f32 %v12287_v54, %v2905_v63 }
 0xb27   :  { %13169 = vmatprep.mubr.msk.f32.mxu0 %vm624_vm4, %v2906_v2  ;;  %v11718_v2 = vld [vmem:[%s16656_s21 + $0xf0] sm:$0xff] }
 0xb28   :  { %13170 = vmatmul.mubr.msk.f32.vlgmr.msra.gmra.mrb[52].mxu0 %vm624_vm4, %v2911_v62  ;;  %v11727_v62 = vld [vmem:[%s16659_s3 + $0x58] sm:$0xff] }
 0xb29   :  { %14210 = vmatpush3.bf16.msra.mxu0 %v15537_v60  ;;  %3077 = vmatprep.mubr.f32.mxu0 %v11695_v3  ;;  %v14323_v63 = vpack.c.bf16 %v11727_v62, %v11726_v58  ;;  %v11722_v3 = vld [vmem:[%s16656_s21 + $0x110] sm:$0x3] }
 0xb2a   :  { %14212 = vmatprep.subr.bf16.mxu0 %v15585_v15 }
 0xb2d   :  { %14214 = vmatpush3.bf16.msra.mxu0 %v15545_v10 }
 0xb2e   :  { %14216 = vmatprep.subr.bf16.mxu0 %v15593_v23 }
 0xb31   :  { %14218 = vmatpush3.bf16.msra.mxu0 %v15553_v20 }
 0xb32   :  { %14220 = vmatprep.subr.bf16.mxu0 %v15601_v33 }
 0xb35   :  { %14222 = vmatpush3.bf16.msra.mxu0 %v15557_v27 }
 0xb36   :  { %14224 = vmatprep.subr.bf16.mxu0 %v15609_v41 }
 0xb39   :  { %14226 = vmatpush3.bf16.msra.mxu0 %v15561_v36 }
 0xb3a   :  { %14228 = vmatprep.subr.bf16.mxu0 %v15617_v50 }
 0xb3d   :  { %14230 = vmatpush3.bf16.msra.mxu0 %v15565_v43 }
 0xb3e   :  { %14232 = vmatprep.subr.bf16.mxu0 %v15625_v61 }
 0xb41   :  { %14234 = vmatpush3.bf16.msra.mxu0 %v15569_v51 }
 0xb42   :  { %14236 = vmatprep.subr.bf16.mxu0 %v15633_v8 }
 0xb45   :  { %14238 = vmatpush3.bf16.msra.mxu0 %v15573_v59 }
 0xb46   :  { %14240 = vmatprep.subr.bf16.mxu0 %v15645_v24 }
 0xb48   :  { %3078 = vmatmul.mubr.f32.vlgmr.msra.gmra.mrb[60].mxu0 %v11694_v5  ;;  %v11721_v5 = vld [vmem:[%s16656_s21 + $0x108] sm:$0x3] }
 0xb49   :  { %14242 = vmatpush3.bf16.msra.mxu0 %v15645_v24  ;;  %3082 = vmatprep.mubr.f32.mxu0 %v11698_v7  ;;  %v13212_v7 = vpop.f32.mrb[94].mxu1 }
 0xb4a   :  { %13176 = vmatprep.subr.mxu0 %v15650_v31  ;;  %v3652_v11 = vpop.f32.mrb[95].mxu1 }
 0xb4b   :  { %v12473_v12 = vpop.f32.mrb[96].mxu1 }
 0xb4c   :  { %3083 = vmatmul.mubr.f32.gmra.mrb[62].mxu0 %v11697_v13  ;;  %v12474_v13 = vpop.f32.mrb[97].mxu1 }
 0xb4d   :  { %13177 = vmatpush3.msra.mxu0 %v15650_v31  ;;  %13178 = vmatprep.mubr.msk.f32.mxu0 %vm2264_vm14, %v11696_v14  ;;  %v12475_v14 = vadd.f32 %v12474_v13, %v12473_v12 }
 0xb4e   :  { %14244 = vmatprep.subr.bf16.mxu0 %v14243_v16 }
 0xb50   :  { %13179 = vmatmul.mubr.msk.f32.vlgmr.msra.gmra.mrb[64].mxu0 %vm2264_vm14, %v11699_v17 }
 0xb51   :  { %14246 = vmatpush3.bf16.msra.mxu0 %v14243_v16  ;;  %v12476_v16 = vpop.f32.mrb[98].mxu1 }
 0xb52   :  { %14280 = vmatprep.subr.bf16.mxu0 %v15645_v24  ;;  %v12477_v17 = vpop.f32.mrb[99].mxu1 }
 0xb53   :  { %v12478_v18 = vadd.f32 %v12477_v17, %v12476_v16 }
 0xc1b   :  { %v12332_v30 = vpop.f32.mrb[60].mxu0 }
 0xc1c   :  { %v12333_v32 = vpop.f32.mrb[61].mxu0 }
 0xc1d   :  { %v12334_v34 = vadd.f32 %v12333_v32, %v12332_v30 }
 0xc1f   :  { %v12335_v35 = vpop.f32.mrb[62].mxu0 }
 0xc20   :  { %v12336_v53 = vpop.f32.mrb[63].mxu0 }
 0xc21   :  { %v12337_v37 = vadd.f32 %v12336_v53, %v12335_v35  ;;  %v11732_v35 = vld [vmem:[%s16656_s21 + $0x130] sm:$0xff]  ;;  %v11738_v53 = vld [vmem:[%s16659_s3 + $0x60] sm:$0xff] }
 0xc23   :  { %v13180_v38 = vpop.f32.mrb[64].mxu0 }
 0xc24   :  { %v3160_v39 = vadd.f32 %v13180_v38, %v12337_v37  ;;  %v3154_v40 = vpop.f32.mrb[65].mxu0  ;;  %v11739_v37 = vld [vmem:[%s16659_s3 + $0x68] sm:$0xff] }
 0xc25   :  { %v3155_v42 = vadd.f32 %v12334_v34, %v3154_v40  ;;  %v14363_v38 = vpack.c.bf16 %v11739_v37, %v11738_v53  ;;  %v11773_v53 = vld [vmem:[%s16662_s19 + $0x18] sm:$0xff] }
 0xc27   :  { %13185 = vmatprep.mubr.msk.f32.mxu0 %vm624_vm4, %v3155_v42 }
 0xc28   :  { %13186 = vmatmul.mubr.msk.f32.vlgmr.msra.gmra.mrb[52].mxu0 %vm624_vm4, %v3160_v39  ;;  %v11735_v39 = vld [vmem:[%s16656_s21 + $0x148] sm:$0x3] }
 0xc29   :  { %14282 = vmatpush3.bf16.msra.mxu0 %v15645_v24  ;;  %13194 = vmatprep.mubr.msk.f32.mxu0 %vm2264_vm14, %v11708_v44 }
 0xc2a   :  { %13192 = vmatprep.subr.mxu0 %v15650_v31 }
 0xc2d   :  { %13193 = vmatpush3.msra.mxu0 %v15650_v31 }
 0xc2e   :  { %13195 = vmatmul.mubr.msk.f32.vlgmr.msra.gmra.mrb[66].mxu0 %vm2264_vm14, %v11711_v48  ;;  %14284 = vmatprep.subr.bf16.mxu0 %v14283_v47 }
 0xc2f   :  { %14286 = vmatpush3.bf16.msra.mxu0 %v14283_v47 }
 0xc30   :  { %14288 = vmatprep.subr.bf16.mxu0 %v15577_v6 }
 0xd01   :  { %v13196_v52 = vpop.f32.mrb[66].mxu0 }
 0xd02   :  { %v3409_v54 = vadd.f32 %v13196_v52, %v12384_v26  ;;  %v3403_v55 = vpop.f32.mrb[67].mxu0 }
 0xd03   :  { %v3404_v56 = vadd.f32 %v12381_v21, %v3403_v55  ;;  %v11756_v55 = vld [vmem:[%s16656_s21 + $0x190] sm:$0xff] }
 0xd05   :  { %13201 = vmatprep.mubr.msk.f32.mxu0 %vm624_vm4, %v3404_v56  ;;  %v11759_v56 = vld [vmem:[%s16656_s21 + $0x1a8] sm:$0x3] }
 0xd06   :  { %13202 = vmatmul.mubr.msk.f32.vlgmr.msra.gmra.mrb[52].mxu0 %vm624_vm4, %v3409_v54 }
 0xd07   :  { %14290 = vmatpush3.bf16.msra.mxu0 %v15537_v60  ;;  %3575 = vmatprep.mubr.f32.mxu0 %v11719_v57 }
 0xd08   :  { %14292 = vmatprep.subr.bf16.mxu0 %v15585_v15 }
 0xd0b   :  { %14294 = vmatpush3.bf16.msra.mxu0 %v15545_v10 }
 0xd0c   :  { %14296 = vmatprep.subr.bf16.mxu0 %v15593_v23 }
 0xd0f   :  { %14298 = vmatpush3.bf16.msra.mxu0 %v15553_v20 }
 0xd10   :  { %14300 = vmatprep.subr.bf16.mxu0 %v15601_v33 }
 0xd13   :  { %14302 = vmatpush3.bf16.msra.mxu0 %v15557_v27 }
 0xd14   :  { %14304 = vmatprep.subr.bf16.mxu0 %v15609_v41 }
 0xd17   :  { %14306 = vmatpush3.bf16.msra.mxu0 %v15561_v36 }
 0xd18   :  { %14308 = vmatprep.subr.bf16.mxu0 %v15617_v50 }
 0xd1b   :  { %14310 = vmatpush3.bf16.msra.mxu0 %v15565_v43 }
 0xd1c   :  { %14312 = vmatprep.subr.bf16.mxu0 %v15625_v61 }
 0xd1f   :  { %14314 = vmatpush3.bf16.msra.mxu0 %v15569_v51 }
 0xd20   :  { %14316 = vmatprep.subr.bf16.mxu0 %v15633_v8 }
 0xd23   :  { %14318 = vmatpush3.bf16.msra.mxu0 %v15573_v59 }
 0xd24   :  { %14324 = vmatprep.subr.bf16.mxu0 %v14323_v63 }
 0xd26   :  { %3576 = vmatmul.mubr.f32.vlgmr.msra.gmra.mrb[68].mxu0 %v11718_v2 }
 0xd27   :  { %14326 = vmatpush3.bf16.msra.mxu0 %v14323_v63  ;;  %3580 = vmatprep.mubr.f32.mxu0 %v11722_v3  ;;  %v11762_v3 = vld [vmem:[%s16659_s3 + $0x80] sm:$0xff] }
 0xd28   :  { %14360 = vmatprep.subr.bf16.mxu0 %v15645_v24 }
 0xd2a   :  { %3581 = vmatmul.mubr.f32.gmra.mrb[70].mxu0 %v11721_v5  ;;  %v11763_v5 = vld [vmem:[%s16659_s3 + $0x88] sm:$0xff] }
 0xdf9   :  { %v12426_v19 = vpop.f32.mrb[68].mxu0 }
 0xdfa   :  { %v12427_v21 = vpop.f32.mrb[69].mxu0 }
 0xdfb   :  { %v12428_v22 = vadd.f32 %v12427_v21, %v12426_v19 }
 0xdfd   :  { %v3653_v25 = vadd.f32 %v12428_v22, %v3652_v11  ;;  %v12429_v26 = vpop.f32.mrb[70].mxu0  ;;  %v14443_v11 = vpack.c.bf16 %v11763_v5, %v11762_v3 }
 0xdfe   :  { %v12430_v30 = vpop.f32.mrb[71].mxu0 }
 0xdff   :  { %v12431_v32 = vadd.f32 %v12430_v30, %v12429_v26  ;;  %13217 = vmatprep.mubr.msk.f32.mxu0 %vm624_vm4, %v3653_v25  ;;  %v4503_v25 = vld [vmem:[%s16661_s14] sm:$0x3f]  ;;  %v4582_v30 = vld [vmem:[%s16662_s19 + $0x8] sm:$0xff] }
 0xe00   :  { %v4581_v26 = vld [vmem:[%s16662_s19] sm:$0xff] }
 0xe01   :  { %v3658_v34 = vadd.f32 %v13212_v7, %v12431_v32  ;;  %v11769_v32 = vld [vmem:[%s16661_s14 + $0x8] sm:$0x3f] }
 0xe03   :  { %13218 = vmatmul.mubr.msk.f32.vlgmr.msra.gmra.mrb[52].mxu0 %vm624_vm4, %v3658_v34  ;;  %v14459_v34 = vpack.c.bf16 %v4582_v30, %v4581_v26 }
 0xe04   :  { %14362 = vmatpush3.bf16.msra.mxu0 %v15645_v24  ;;  %13226 = vmatprep.mubr.msk.f32.mxu0 %vm2264_vm14, %v11732_v35  ;;  %v11772_v35 = vld [vmem:[%s16662_s19 + $0x10] sm:$0xff] }
 0xe05   :  { %13224 = vmatprep.subr.mxu0 %v15650_v31  ;;  %v14456_v37 = vpack.c.bf16 %v11773_v53, %v11772_v35 }
 0xe08   :  { %13225 = vmatpush3.msra.mxu0 %v15650_v31 }
 0xe09   :  { %13227 = vmatmul.mubr.msk.f32.vlgmr.msra.gmra.mrb[72].mxu0 %vm2264_vm14, %v11735_v39  ;;  %14364 = vmatprep.subr.bf16.mxu0 %v14363_v38 }
 0xe0a   :  { %14366 = vmatpush3.bf16.msra.mxu0 %v14363_v38 }
 0xe0b   :  { %14368 = vmatprep.subr.bf16.mxu0 %v15577_v6  ;;  %v13244_v6 = vpop.f32.mrb[100].mxu1 }
 0xedc   :  { %v13228_v40 = vpop.f32.mrb[72].mxu0 }
 0xedd   :  { %v3907_v42 = vadd.f32 %v13228_v40, %v12478_v18  ;;  %v3901_v44 = vpop.f32.mrb[73].mxu0 }
 0xede   :  { %v3902_v45 = vadd.f32 %v12475_v14, %v3901_v44  ;;  %v11766_v14 = vld [vmem:[%s16660_s8] ss:$0 sm:$0xff]  ;;  %v11776_v44 = vld [vmem:[%s16661_s14 + $0x10] sm:$0x3f] }
 0xee0   :  { %13233 = vmatprep.mubr.msk.f32.mxu0 %vm624_vm4, %v3902_v45  ;;  %v11782_v45 = vld [vmem:[%s16661_s14 + $0x18] sm:$0x3f] }
 0xee1   :  { %13234 = vmatmul.mubr.msk.f32.vlgmr.msra.gmra.mrb[52].mxu0 %vm624_vm4, %v3907_v42 }
 0xee2   :  { %14370 = vmatpush3.bf16.msra.mxu0 %v15537_v60  ;;  %4073 = vmatprep.mubr.f32.mxu0 %v11743_v46  ;;  %v11750_v60 = vld [vmem:[%s16659_s3 + $0x70] sm:$0xff]  ;;  %v11788_v46 = vld [vmem:[%s16661_s14 + $0x20] sm:$0x3f] }
 0xee3   :  { %14372 = vmatprep.subr.bf16.mxu0 %v15585_v15  ;;  %v11755_v15 = vld [vmem:[%s16656_s21 + $0x188] sm:$0xff] }
 0xee4   :  { %4322 = vmatprep.mubr.f32.mxu1 %v11755_v15 }
 0xee6   :  { %14374 = vmatpush3.bf16.msra.mxu0 %v15545_v10  ;;  %v11751_v10 = vld [vmem:[%s16659_s3 + $0x78] sm:$0xff] }
 0xee7   :  { %14376 = vmatprep.subr.bf16.mxu0 %v15593_v23  ;;  %v11754_v23 = vld [vmem:[%s16656_s21 + $0x180] sm:$0xff] }
 0xee8   :  { %4323 = vmatmul.mubr.f32.vlgmr.msra.gmra.mrb[102].mxu1 %v11754_v23  ;;  %v11785_v23 = vld [vmem:[%s16662_s19 + $0x30] sm:$0xff] }
 0xee9   :  { %14457 = vmatpush3.bf16.msra.mxu1 %v14456_v37 }
 0xeea   :  { %14378 = vmatpush3.bf16.msra.mxu0 %v15553_v20  ;;  %v14403_v20 = vpack.c.bf16 %v11751_v10, %v11750_v60  ;;  %14461 = vmatprep.subr.bf16.mxu1 %v14893_v0  ;;  %v11794_v60 = vld [vmem:[%s16661_s14 + $0x28] sm:$0x3f]  ;;  %v11800_v10 = vld [vmem:[%s16661_s14 + $0x30] sm:$0x3f] }
 0xeeb   :  { %14380 = vmatprep.subr.bf16.mxu0 %v15601_v33  ;;  %v11757_v33 = vld [vmem:[%s16656_s21 + $0x198] sm:$0x3] }
 0xeee   :  { %14382 = vmatpush3.bf16.msra.mxu0 %v15557_v27  ;;  %v11742_v27 = vld [vmem:[%s16656_s21 + $0x150] sm:$0xff] }
 0xeef   :  { %14384 = vmatprep.subr.bf16.mxu0 %v15609_v41 }
 0xef2   :  { %14386 = vmatpush3.bf16.msra.mxu0 %v15561_v36  ;;  %v11746_v36 = vld [vmem:[%s16656_s21 + $0x170] sm:$0x3] }
 0xef3   :  { %14388 = vmatprep.subr.bf16.mxu0 %v15617_v50 }
 0xef6   :  { %14390 = vmatpush3.bf16.msra.mxu0 %v15565_v43  ;;  %v11745_v43 = vld [vmem:[%s16656_s21 + $0x168] sm:$0x3] }
 0xef7   :  { %14392 = vmatprep.subr.bf16.mxu0 %v15625_v61 }
 0xefa   :  { %14394 = vmatpush3.bf16.msra.mxu0 %v15569_v51  ;;  %v4150_v51 = vpop.f32.mrb[101].mxu1 }
 0xefb   :  { %14396 = vmatprep.subr.bf16.mxu0 %v15633_v8 }
 0xefe   :  { %14398 = vmatpush3.bf16.msra.mxu0 %v15573_v59  ;;  %v11758_v59 = vld [vmem:[%s16656_s21 + $0x1a0] sm:$0x3] }
 0xeff   :  { %14404 = vmatprep.subr.bf16.mxu0 %v14403_v20  ;;  %4327 = vmatprep.mubr.f32.mxu1 %v11758_v59  ;;  %v11786_v59 = vld [vmem:[%s16662_s19 + $0x38] sm:$0xff] }
 0xf00   :  { %4328 = vmatmul.mubr.f32.gmra.mrb[104].mxu1 %v11757_v33 }
 0xf01   :  { %4074 = vmatmul.mubr.f32.vlgmr.msra.gmra.mrb[74].mxu0 %v11742_v27  ;;  %13286 = vmatprep.mubr.msk.f32.mxu1 %vm14894_vm0, %v14895_v1  ;;  %v11812_v27 = vld [vmem:[%s16661_s14 + $0x40] sm:$0x3f] }
 0xf02   :  { %14406 = vmatpush3.bf16.msra.mxu0 %v14403_v20  ;;  %4078 = vmatprep.mubr.f32.mxu0 %v11746_v36  ;;  %v11806_v20 = vld [vmem:[%s16661_s14 + $0x38] sm:$0x3f]  ;;  %v11779_v36 = vld [vmem:[%s16662_s19 + $0x20] sm:$0xff] }
 0xf03   :  { %14440 = vmatprep.subr.bf16.mxu0 %v15645_v24 }
 0xf05   :  { %4079 = vmatmul.mubr.f32.gmra.mrb[76].mxu0 %v11745_v43  ;;  %v11780_v43 = vld [vmem:[%s16662_s19 + $0x28] sm:$0xff] }
 0xfbb   :  { %v12567_v57 = vpop.f32.mrb[102].mxu1 }
 0xfbc   :  { %v12568_v58 = vpop.f32.mrb[103].mxu1 }
 0xfbd   :  { %v12569_v62 = vadd.f32 %v12568_v58, %v12567_v57 }
 0xfd3   :  { %v12570_v63 = vpop.f32.mrb[104].mxu1 }
 0xfd4   :  { %v12520_v41 = vpop.f32.mrb[74].mxu0  ;;  %v12571_v2 = vpop.f32.mrb[105].mxu1 }
 0xfd5   :  { %v12521_v50 = vpop.f32.mrb[75].mxu0  ;;  %v12572_v7 = vadd.f32 %v12571_v2, %v12570_v63  ;;  %v11803_v63 = vld [vmem:[%s16662_s19 + $0x60] sm:$0xff]  ;;  %v11804_v2 = vld [vmem:[%s16662_s19 + $0x68] sm:$0xff] }
 0xfd6   :  { %v12522_v61 = vadd.f32 %v12521_v50, %v12520_v41 }
 0xfd8   :  { %v4151_v8 = vadd.f32 %v12522_v61, %v4150_v51  ;;  %v12523_v47 = vpop.f32.mrb[76].mxu0  ;;  %v14473_v61 = vpack.c.bf16 %v11786_v59, %v11785_v23  ;;  %v11824_v23 = vld [vmem:[%s16666_s30 + $0x10] sm:$0xff] }
 0xfd9   :  { %v12524_v48 = vpop.f32.mrb[77].mxu0 }
 0xfda   :  { %v12525_v52 = vadd.f32 %v12524_v48, %v12523_v47  ;;  %13249 = vmatprep.mubr.msk.f32.mxu0 %vm624_vm4, %v4151_v8  ;;  %v11791_v8 = vld [vmem:[%s16662_s19 + $0x40] sm:$0xff]  ;;  %v11792_v47 = vld [vmem:[%s16662_s19 + $0x48] sm:$0xff] }
 0xfdc   :  { %v4156_v54 = vadd.f32 %v13244_v6, %v12525_v52  ;;  %v14466_v6 = vpack.c.bf16 %v11780_v43, %v11779_v36 }
 0xfde   :  { %13250 = vmatmul.mubr.msk.f32.vlgmr.msra.gmra.mrb[52].mxu0 %vm624_vm4, %v4156_v54  ;;  %v14480_v54 = vpack.c.bf16 %v11792_v47, %v11791_v8  ;;  %v5880_v8 = vld [vmem:[%s16667_s12] sm:$0xf]  ;;  %v11821_v47 = vld [vmem:[%s16667_s12 + $0x4] sm:$0xf] }
 0xfdf   :  { %14442 = vmatpush3.bf16.msra.mxu0 %v15645_v24  ;;  %13258 = vmatprep.mubr.msk.f32.mxu0 %vm2264_vm14, %v11756_v55  ;;  %v11797_v55 = vld [vmem:[%s16662_s19 + $0x50] sm:$0xff] }
 0xfe0   :  { %13256 = vmatprep.subr.mxu0 %v15650_v31 }
 0xfe3   :  { %13257 = vmatpush3.msra.mxu0 %v15650_v31 }
 0xfe4   :  { %13259 = vmatmul.mubr.msk.f32.vlgmr.msra.gmra.mrb[78].mxu0 %vm2264_vm14, %v11759_v56  ;;  %14444 = vmatprep.subr.bf16.mxu0 %v14443_v11  ;;  %v11798_v56 = vld [vmem:[%s16662_s19 + $0x58] sm:$0xff] }
 0xfe5   :  { %14446 = vmatpush3.bf16.msra.mxu0 %v14443_v11  ;;  %v11809_v11 = vld [vmem:[%s16662_s19 + $0x70] sm:$0xff] }
 0xfe6   :  { %14447 = vmatprep.subr.bf16.mxu0 %v14893_v0 }
0x10b7   :  { %v13260_v24 = vpop.f32.mrb[78].mxu0 }
0x10b8   :  { %v4405_v12 = vadd.f32 %v13260_v24, %v12572_v7  ;;  %v4399_v31 = vpop.f32.mrb[79].mxu0  ;;  %v14494_v7 = vpack.c.bf16 %v11804_v2, %v11803_v63  ;;  %v11810_v24 = vld [vmem:[%s16662_s19 + $0x78] sm:$0xff]  ;;  %v11840_v63 = vld [vmem:[%s16667_s12 + $0x10] sm:$0xf]  ;;  %v11846_v2 = vld [vmem:[%s16667_s12 + $0x14] sm:$0xf] }
0x10b9   :  { %v4400_v13 = vadd.f32 %v12569_v62, %v4399_v31  ;;  %v14487_v62 = vpack.c.bf16 %v11798_v56, %v11797_v55 }
0x10bb   :  { %13265 = vmatprep.mubr.msk.f32.mxu0 %vm624_vm4, %v4400_v13  ;;  %v14501_v13 = vpack.c.bf16 %v11810_v24, %v11809_v11  ;;  %v11831_v11 = vld [vmem:[%s16666_s30 + $0x20] sm:$0xff]  ;;  %v11832_v24 = vld [vmem:[%s16666_s30 + $0x28] sm:$0xff] }
0x10bc   :  { %13266 = vmatmul.mubr.msk.f32.vlgmr.msra.gmra.mrb[52].mxu0 %vm624_vm4, %v4405_v12 }
0x10bd   :  { %13272 = vmatprep.mubr.msk.f32.mxu0 %vm14894_vm0, %v14895_v1 }
0x118f   :  { %v13267_v16 = vpop.f32.mrb[52].mxu0 }
0x1190   :  { %v4502_v17 = vadd.f32 %v13267_v16, %v11766_v14  ;;  %v4483_v18 = vpop.f32.mrb[53].mxu0  ;;  %v11816_v16 = vld [vmem:[%s16662_s19 + $0x88] sm:$0xff] }
0x1191   :  { %v4501_v19 = vadd.f32 %v11766_v14, %v4483_v18  ;;  %v11815_v14 = vld [vmem:[%s16662_s19 + $0x80] sm:$0xff] }
0x1193   :  { %v14448_v22 = vpack.c.bf16 %v4502_v17, %v4501_v19  ;;  %v14508_v19 = vpack.c.bf16 %v11816_v16, %v11815_v14 }
0x1195   :  { %14450 = vmatpush3.bf16.msk.msra.mxu0 %vm15909_vm15, %v14448_v22 }
0x1196   :  { %14451 = vmatprep.subr.bf16.mxu0 %v14893_v0 }
0x1198   :  { %13273 = vmatmul.mubr.msk.f32.vlgmr.msra.gmra.mrb[80].mxu0 %vm4504_vm1, %v4503_v25 }
0x1199   :  { %14454 = vmatpush3.bf16.msk.msra.mxu0 %vm15909_vm15, %v14448_v22  ;;  %13279 = vmatprep.mubr.msk.f32.mxu0 %vm14894_vm0, %v14895_v1 }
0x119a   :  { %14458 = vmatprep.subr.bf16.mxu0 %v14893_v0 }
0x119c   :  { %13280 = vmatmul.mubr.msk.f32.vlgmr.msra.gmra.mrb[82].mxu0 %vm4504_vm1, %v11769_v32 }
0x119d   :  { %14460 = vmatpush3.bf16.msra.mxu0 %v14459_v34  ;;  %13293 = vmatprep.mubr.msk.f32.mxu0 %vm14894_vm0, %v14895_v1 }
0x119e   :  { %14465 = vmatprep.subr.bf16.mxu0 %v14893_v0 }
0x126b   :  { %v4577_v38 = vpop.f32.mrb[80].mxu0 }
0x126c   :  { %v13274_v39 = vpop.f32.mrb[81].mxu0  ;;  %13294 = vmatmul.mubr.msk.f32.vlgmr.msra.gmra.mrb[84].mxu0 %vm624_vm4, %v4577_v38 }
0x126d   :  { %13307 = vmatprep.mubr.msk.f32.mxu0 %vm14894_vm0, %v14895_v1  ;;  %14467 = vmatpush3.bf16.msra.mxu0 %v14466_v6  ;;  %v11818_v6 = vld [vmem:[%s16665_s24] ss:$0 sm:$0xff] }
0x126e   :  { %14472 = vmatprep.subr.bf16.mxu0 %v14893_v0 }
0x126f   :  { %v4654_v40 = vpop.f32.mrb[82].mxu0 }
0x1270   :  { %v13281_v42 = vpop.f32.mrb[83].mxu0  ;;  %13287 = vmatmul.mubr.msk.f32.vlgmr.msra.gmra.mrb[106].mxu1 %vm624_vm4, %v4654_v40 }
0x1271   :  { %14464 = vmatpush3.bf16.msk.msra.mxu1 %vm15909_vm15, %v14448_v22  ;;  %13300 = vmatprep.mubr.msk.f32.mxu1 %vm14894_vm0, %v14895_v1 }
0x1272   :  { %14468 = vmatprep.subr.bf16.mxu1 %v14893_v0 }
0x1274   :  { %13301 = vmatmul.mubr.msk.f32.vlgmr.msra.gmra.mrb[108].mxu1 %vm4504_vm1, %v11776_v44 }
0x1275   :  { %14471 = vmatpush3.bf16.msk.msra.mxu1 %vm15909_vm15, %v14448_v22  ;;  %13314 = vmatprep.mubr.msk.f32.mxu1 %vm14894_vm0, %v14895_v1 }
0x1276   :  { %14475 = vmatprep.subr.bf16.mxu1 %v14893_v0 }
0x1278   :  { %13315 = vmatmul.mubr.msk.f32.vlgmr.msra.gmra.mrb[110].mxu1 %vm4504_vm1, %v11782_v45 }
0x1279   :  { %14478 = vmatpush3.bf16.msk.msra.mxu1 %vm15909_vm15, %v14448_v22  ;;  %13328 = vmatprep.mubr.msk.f32.mxu1 %vm14894_vm0, %v14895_v1 }
0x127a   :  { %14482 = vmatprep.subr.bf16.mxu1 %v14893_v0 }
0x127c   :  { %13329 = vmatmul.mubr.msk.f32.vlgmr.msra.gmra.mrb[112].mxu1 %vm4504_vm1, %v11788_v46 }
0x127d   :  { %14485 = vmatpush3.bf16.msk.msra.mxu1 %vm15909_vm15, %v14448_v22  ;;  %13342 = vmatprep.mubr.msk.f32.mxu1 %vm14894_vm0, %v14895_v1 }
0x127e   :  { %14489 = vmatprep.subr.bf16.mxu1 %v14893_v0 }
0x1280   :  { %13343 = vmatmul.mubr.msk.f32.vlgmr.msra.gmra.mrb[114].mxu1 %vm4504_vm1, %v11794_v60 }
0x1281   :  { %14492 = vmatpush3.bf16.msk.msra.mxu1 %vm15909_vm15, %v14448_v22  ;;  %13356 = vmatprep.mubr.msk.f32.mxu1 %vm14894_vm0, %v14895_v1 }
0x1282   :  { %14496 = vmatprep.subr.bf16.mxu1 %v14893_v0 }
0x1284   :  { %13357 = vmatmul.mubr.msk.f32.vlgmr.msra.gmra.mrb[116].mxu1 %vm4504_vm1, %v11800_v10 }
0x1285   :  { %14499 = vmatpush3.bf16.msk.msra.mxu1 %vm15909_vm15, %v14448_v22  ;;  %13370 = vmatprep.mubr.msk.f32.mxu1 %vm14894_vm0, %v14895_v1 }
0x1286   :  { %14503 = vmatprep.subr.bf16.mxu1 %v14893_v0 }
0x1288   :  { %13371 = vmatmul.mubr.msk.f32.vlgmr.msra.gmra.mrb[118].mxu1 %vm4504_vm1, %v11806_v20 }
0x1289   :  { %14506 = vmatpush3.bf16.msk.msra.mxu1 %vm15909_vm15, %v14448_v22  ;;  %13384 = vmatprep.mubr.msk.f32.mxu1 %vm14894_vm0, %v14895_v1 }
0x128a   :  { %13394 = vmatprep.subr.mxu1 %v14895_v1 }
0x128c   :  { %13385 = vmatmul.mubr.msk.f32.vlgmr.msra.gmra.mrb[120].mxu1 %vm4504_vm1, %v11812_v27 }
0x128d   :  { %13396 = vmatprep.mubr.msk.f32.mxu1 %vm14894_vm0, %v14895_v1 }
0x133f   :  { %v4803_v51 = vpop.f32.mrb[84].mxu0 }
0x1340   :  { %v13295_v15 = vpop.f32.mrb[85].mxu0 }
0x1343   :  { %v4730_v33 = vpop.f32.mrb[106].mxu1 }
0x1344   :  { %v4804_v41 = vadd.f32 %v4803_v51, %v4730_v33  ;;  %v13288_v50 = vpop.f32.mrb[107].mxu1  ;;  %v11825_v33 = vld [vmem:[%s16666_s30 + $0x18] sm:$0xff] }
0x1345   :  { %v5958_v50 = vld [vmem:[%s16666_s30 + $0x8] sm:$0xff] }
0x1347   :  { %v4878_v48 = vpop.f32.mrb[108].mxu1 }
0x1348   :  { %v13302_v52 = vpop.f32.mrb[109].mxu1  ;;  %13308 = vmatmul.mubr.msk.f32.vlgmr.msra.gmra.mrb[86].mxu0 %vm624_vm4, %v4878_v48  ;;  %v14511_v48 = vpack.c.bf16 %v11825_v33, %v11824_v23 }
0x1349   :  { %14474 = vmatpush3.bf16.msra.mxu0 %v14473_v61  ;;  %13321 = vmatprep.mubr.msk.f32.mxu0 %vm14894_vm0, %v14895_v1 }
0x134a   :  { %14479 = vmatprep.subr.bf16.mxu0 %v14893_v0 }
0x134b   :  { %v5030_v57 = vpop.f32.mrb[110].mxu1 }
0x134c   :  { %v13316_v58 = vpop.f32.mrb[111].mxu1  ;;  %13322 = vmatmul.mubr.msk.f32.vlgmr.msra.gmra.mrb[88].mxu0 %vm624_vm4, %v5030_v57 }
0x134d   :  { %14481 = vmatpush3.bf16.msra.mxu0 %v14480_v54  ;;  %13335 = vmatprep.mubr.msk.f32.mxu0 %vm14894_vm0, %v14895_v1  ;;  %v11828_v58 = vld [vmem:[%s16667_s12 + $0x8] sm:$0xf] }
0x134e   :  { %14486 = vmatprep.subr.bf16.mxu0 %v14893_v0 }
0x134f   :  { %v5182_v3 = vpop.f32.mrb[112].mxu1 }
0x1350   :  { %v13330_v5 = vpop.f32.mrb[113].mxu1  ;;  %13336 = vmatmul.mubr.msk.f32.vlgmr.msra.gmra.mrb[90].mxu0 %vm624_vm4, %v5182_v3  ;;  %v11852_v3 = vld [vmem:[%s16667_s12 + $0x18] sm:$0xf] }
0x1351   :  { %14488 = vmatpush3.bf16.msra.mxu0 %v14487_v62  ;;  %13349 = vmatprep.mubr.msk.f32.mxu0 %vm14894_vm0, %v14895_v1  ;;  %v11834_v62 = vld [vmem:[%s16667_s12 + $0xc] sm:$0xf]  ;;  %v11858_v5 = vld [vmem:[%s16667_s12 + $0x1c] sm:$0xf] }
0x1352   :  { %14493 = vmatprep.subr.bf16.mxu0 %v14893_v0 }
0x1353   :  { %v5334_v12 = vpop.f32.mrb[114].mxu1 }
0x1354   :  { %v13344_v31 = vpop.f32.mrb[115].mxu1  ;;  %13350 = vmatmul.mubr.msk.f32.vlgmr.msra.gmra.mrb[92].mxu0 %vm624_vm4, %v5334_v12  ;;  %v14517_v12 = vpack.c.bf16 %v11832_v24, %v11831_v11 }
0x1355   :  { %14495 = vmatpush3.bf16.msra.mxu0 %v14494_v7  ;;  %13363 = vmatprep.mubr.msk.f32.mxu0 %vm14894_vm0, %v14895_v1  ;;  %v11864_v7 = vld [vmem:[%s16667_s12 + $0x20] sm:$0xf]  ;;  %v11837_v31 = vld [vmem:[%s16666_s30 + $0x30] sm:$0xff] }
0x1356   :  { %14500 = vmatprep.subr.bf16.mxu0 %v14893_v0 }
0x1357   :  { %v5486_v17 = vpop.f32.mrb[116].mxu1 }
0x1358   :  { %v13358_v18 = vpop.f32.mrb[117].mxu1  ;;  %13364 = vmatmul.mubr.msk.f32.vlgmr.msra.gmra.mrb[94].mxu0 %vm624_vm4, %v5486_v17 }
0x1359   :  { %14502 = vmatpush3.bf16.msra.mxu0 %v14501_v13  ;;  %13377 = vmatprep.mubr.msk.f32.mxu0 %vm14894_vm0, %v14895_v1  ;;  %v11838_v13 = vld [vmem:[%s16666_s30 + $0x38] sm:$0xff] }
0x135a   :  { %14507 = vmatprep.subr.bf16.mxu0 %v14893_v0 }
0x135b   :  { %v5638_v21 = vpop.f32.mrb[118].mxu1 }
0x135c   :  { %v13372_v22 = vpop.f32.mrb[119].mxu1  ;;  %13378 = vmatmul.mubr.msk.f32.vlgmr.msra.gmra.mrb[96].mxu0 %vm624_vm4, %v5638_v21  ;;  %v14520_v21 = vpack.c.bf16 %v11838_v13, %v11837_v31  ;;  %v11876_v31 = vld [vmem:[%s16669_s27 + $0x10] sm:$0xff] }
0x135d   :  { %14509 = vmatpush3.bf16.msra.mxu0 %v14508_v19  ;;  %13391 = vmatprep.mubr.msk.f32.mxu0 %vm14894_vm0, %v14895_v1  ;;  %v11843_v22 = vld [vmem:[%s16666_s30 + $0x40] sm:$0xff] }
0x135e   :  { %13399 = vmatprep.subr.mxu0 %v14895_v1 }
0x135f   :  { %v5790_v25 = vpop.f32.mrb[120].mxu1 }
0x1360   :  { %v13386_v26 = vpop.f32.mrb[121].mxu1  ;;  %13392 = vmatmul.mubr.msk.f32.vlgmr.msra.gmra.mrb[98].mxu0 %vm624_vm4, %v5790_v25  ;;  %v11844_v25 = vld [vmem:[%s16666_s30 + $0x48] sm:$0xff] }
0x1361   :  { %13401 = vmatprep.mubr.msk.f32.mxu0 %vm14894_vm0, %v14895_v1 }
0x141b   :  { %v4954_v30 = vpop.f32.mrb[86].mxu0 }
0x141c   :  { %v4958_v32 = vadd.f32 %v4954_v30, %v4804_v41  ;;  %v13309_v34 = vpop.f32.mrb[87].mxu0  ;;  %v5957_v41 = vld [vmem:[%s16666_s30] sm:$0xff] }
0x141d   :  { %v14514_v52 = vpack.c.bf16 %v5958_v50, %v5957_v41  ;;  %v11849_v34 = vld [vmem:[%s16666_s30 + $0x50] sm:$0xff] }
0x141f   :  { %v5106_v35 = vpop.f32.mrb[88].mxu0 }
0x1420   :  { %v5110_v53 = vadd.f32 %v5106_v35, %v4958_v32  ;;  %v13323_v37 = vpop.f32.mrb[89].mxu0  ;;  %v14523_v32 = vpack.c.bf16 %v11844_v25, %v11843_v22  ;;  %v11850_v35 = vld [vmem:[%s16666_s30 + $0x58] sm:$0xff]  ;;  %v11873_v22 = vld [vmem:[%s16670_s28 + $0x2] sm:$0x3] }
0x1423   :  { %v5258_v38 = vpop.f32.mrb[90].mxu0 }
0x1424   :  { %v5262_v39 = vadd.f32 %v5258_v38, %v5110_v53  ;;  %v13337_v40 = vpop.f32.mrb[91].mxu0  ;;  %v14526_v38 = vpack.c.bf16 %v11850_v35, %v11849_v34 }
0x1425   :  { %v11856_v40 = vld [vmem:[%s16666_s30 + $0x68] sm:$0xff] }
0x1427   :  { %v5410_v42 = vpop.f32.mrb[92].mxu0 }
0x1428   :  { %v5414_v44 = vadd.f32 %v5410_v42, %v5262_v39  ;;  %v13351_v45 = vpop.f32.mrb[93].mxu0  ;;  %v11855_v39 = vld [vmem:[%s16666_s30 + $0x60] sm:$0xff] }
0x1429   :  { %v14529_v45 = vpack.c.bf16 %v11856_v40, %v11855_v39  ;;  %v11898_v39 = vld [vmem:[%s16670_s28 + $0xa] sm:$0x3]  ;;  %v11904_v40 = vld [vmem:[%s16670_s28 + $0xc] sm:$0x3] }
0x142b   :  { %v5562_v46 = vpop.f32.mrb[94].mxu0 }
0x142c   :  { %v5566_v60 = vadd.f32 %v5562_v46, %v5414_v44  ;;  %v13365_v10 = vpop.f32.mrb[95].mxu0  ;;  %v11861_v46 = vld [vmem:[%s16666_s30 + $0x70] sm:$0xff] }
0x142f   :  { %v5714_v20 = vpop.f32.mrb[96].mxu0 }
0x1430   :  { %v5718_v27 = vadd.f32 %v5714_v20, %v5566_v60  ;;  %v13379_v36 = vpop.f32.mrb[97].mxu0  ;;  %v11862_v60 = vld [vmem:[%s16666_s30 + $0x78] sm:$0xff] }
0x1431   :  { %v11867_v36 = vld [vmem:[%s16666_s30 + $0x80] sm:$0xff] }
0x1433   :  { %v5866_v43 = vpop.f32.mrb[98].mxu0 }
0x1434   :  { %v5870_v51 = vadd.f32 %v5866_v43, %v5718_v27  ;;  %v13393_v15 = vpop.f32.mrb[99].mxu0  ;;  %v14532_v27 = vpack.c.bf16 %v11862_v60, %v11861_v46  ;;  %v11868_v43 = vld [vmem:[%s16666_s30 + $0x88] sm:$0xff] }
0x1435   :  { %v14535_v15 = vpack.c.bf16 %v11868_v43, %v11867_v36  ;;  %v11884_v46 = vld [vmem:[%s16669_s27 + $0x28] sm:$0xff] }
0x1436   :  { %v5878_v59 = vadd.f32 %v11818_v6, %v5870_v51 }
0x1438   :  { %v5879_v61 = vmax.f32 %v5878_v59, 0.0 }
0x143a   :  { %13395 = vmatpush3.msk.msra.mxu1 %vm1045_vm5, %v5879_v61  ;;  %13400 = vmatpush3.msk.msra.mxu0 %vm1045_vm5, %v5879_v61 }
0x143b   :  { %13397 = vmatmul.mubr.msk.f32.vlgmr.msra.gmra.mrb[122].mxu1 %vm1507_vm9, %v5880_v8  ;;  %13402 = vmatmul.mubr.msk.f32.vlgmr.msra.gmra.mrb[100].mxu0 %vm1507_vm9, %v11821_v47 }
0x143c   :  { %14510 = vmatprep.subr.bf16.mxu1 %v14893_v0  ;;  %14513 = vmatprep.subr.bf16.mxu0 %v14893_v0 }
0x143d   :  { %14512 = vmatpush3.bf16.msra.mxu1 %v14511_v48  ;;  %14515 = vmatpush3.bf16.msra.mxu0 %v14514_v52 }
0x143e   :  { %13408 = vmatprep.mubr.msk.f32.mxu1 %vm14894_vm0, %v14895_v1  ;;  %13415 = vmatprep.mubr.msk.f32.mxu0 %vm14894_vm0, %v14895_v1 }
0x143f   :  { %13418 = vmatprep.subr.mxu1 %v14895_v1  ;;  %14516 = vmatprep.subr.bf16.mxu0 %v14893_v0 }
0x150e   :  { %v5953_v54 = vpop.f32.mrb[122].mxu1  ;;  %v6030_v55 = vpop.f32.mrb[100].mxu0 }
0x150f   :  { %v13403_v56 = vpop.f32.mrb[101].mxu0  ;;  %13409 = vmatmul.mubr.msk.f32.vlgmr.msra.gmra.mrb[124].mxu1 %vm624_vm4, %v6030_v55  ;;  %13416 = vmatmul.mubr.msk.f32.vlgmr.msra.gmra.mrb[102].mxu0 %vm624_vm4, %v5953_v54  ;;  %v13398_v57 = vpop.f32.mrb[123].mxu1 }
0x1510   :  { %13419 = vmatpush3.msk.msra.mxu1 %vm1045_vm5, %v5879_v61  ;;  %13420 = vmatprep.mubr.msk.f32.mxu1 %vm14894_vm0, %v14895_v1 }
0x1511   :  { %13430 = vmatprep.subr.mxu1 %v14895_v1  ;;  %13427 = vmatprep.mubr.msk.f32.mxu0 %vm14894_vm0, %v14895_v1 }
0x1512   :  { %14518 = vmatpush3.bf16.msra.mxu0 %v14517_v12  ;;  %v11870_v12 = vld [vmem:[%s16668_s20] ss:$0 sm:$0xff] }
0x1513   :  { %13421 = vmatmul.mubr.msk.f32.vlgmr.msra.gmra.mrb[126].mxu1 %vm1507_vm9, %v11828_v58  ;;  %14519 = vmatprep.subr.bf16.mxu0 %v14893_v0 }
0x1514   :  { %13431 = vmatpush3.msk.msra.mxu1 %vm1045_vm5, %v5879_v61  ;;  %13432 = vmatprep.mubr.msk.f32.mxu1 %vm14894_vm0, %v14895_v1 }
0x1515   :  { %13442 = vmatprep.subr.mxu1 %v14895_v1 }
0x1517   :  { %13433 = vmatmul.mubr.msk.f32.vlgmr.msra.gmra.mrb[128].mxu1 %vm1507_vm9, %v11834_v62 }
0x1518   :  { %13443 = vmatpush3.msk.msra.mxu1 %vm1045_vm5, %v5879_v61  ;;  %13444 = vmatprep.mubr.msk.f32.mxu1 %vm14894_vm0, %v14895_v1 }
0x1519   :  { %13454 = vmatprep.subr.mxu1 %v14895_v1 }
0x151b   :  { %13445 = vmatmul.mubr.msk.f32.vlgmr.msra.gmra.mrb[130].mxu1 %vm1507_vm9, %v11840_v63 }
0x151c   :  { %13455 = vmatpush3.msk.msra.mxu1 %vm1045_vm5, %v5879_v61  ;;  %13456 = vmatprep.mubr.msk.f32.mxu1 %vm14894_vm0, %v14895_v1 }
0x151d   :  { %13466 = vmatprep.subr.mxu1 %v14895_v1 }
0x151f   :  { %13457 = vmatmul.mubr.msk.f32.vlgmr.msra.gmra.mrb[132].mxu1 %vm1507_vm9, %v11846_v2 }
0x1520   :  { %13467 = vmatpush3.msk.msra.mxu1 %vm1045_vm5, %v5879_v61  ;;  %13468 = vmatprep.mubr.msk.f32.mxu1 %vm14894_vm0, %v14895_v1 }
0x1521   :  { %13478 = vmatprep.subr.mxu1 %v14895_v1 }
0x1523   :  { %13469 = vmatmul.mubr.msk.f32.vlgmr.msra.gmra.mrb[134].mxu1 %vm1507_vm9, %v11852_v3 }
0x1524   :  { %13479 = vmatpush3.msk.msra.mxu1 %vm1045_vm5, %v5879_v61  ;;  %13480 = vmatprep.mubr.msk.f32.mxu1 %vm14894_vm0, %v14895_v1 }
0x1525   :  { %13490 = vmatprep.subr.mxu1 %v14895_v1 }
0x1527   :  { %13481 = vmatmul.mubr.msk.f32.vlgmr.msra.gmra.mrb[136].mxu1 %vm1507_vm9, %v11858_v5 }
0x1528   :  { %13491 = vmatpush3.msk.msra.mxu1 %vm1045_vm5, %v5879_v61  ;;  %13492 = vmatprep.mubr.msk.f32.mxu1 %vm14894_vm0, %v14895_v1 }
0x1529   :  { %13502 = vmatprep.subr.mxu1 %v14895_v1 }
0x152b   :  { %13493 = vmatmul.mubr.msk.f32.vlgmr.msra.gmra.mrb[138].mxu1 %vm1507_vm9, %v11864_v7 }
0x152c   :  { %13504 = vmatprep.mubr.msk.f32.mxu1 %vm14894_vm0, %v14895_v1 }
0x15e2   :  { %v6106_v14 = vpop.f32.mrb[124].mxu1  ;;  %v6179_v16 = vpop.f32.mrb[102].mxu0 }
0x15e3   :  { %v6180_v17 = vadd.f32 %v6179_v16, %v6106_v14  ;;  %v13410_v18 = vpop.f32.mrb[125].mxu1  ;;  %v13417_v19 = vpop.f32.mrb[103].mxu0  ;;  %v11877_v16 = vld [vmem:[%s16669_s27 + $0x18] sm:$0xff] }
0x15e4   :  { %v7334_v18 = vld [vmem:[%s16669_s27 + $0x8] sm:$0xff]  ;;  %v14538_v25 = vpack.c.bf16 %v11877_v16, %v11876_v31 }
0x15e6   :  { %v6254_v26 = vpop.f32.mrb[126].mxu1 }
0x15e7   :  { %v13422_v30 = vpop.f32.mrb[127].mxu1  ;;  %13428 = vmatmul.mubr.msk.f32.vlgmr.msra.gmra.mrb[104].mxu0 %vm624_vm4, %v6254_v26 }
0x15e8   :  { %14521 = vmatpush3.bf16.msra.mxu0 %v14520_v21  ;;  %13439 = vmatprep.mubr.msk.f32.mxu0 %vm14894_vm0, %v14895_v1  ;;  %v7255_v21 = vld [vmem:[%s16670_s28] sm:$0x3] }
0x15e9   :  { %14522 = vmatprep.subr.bf16.mxu0 %v14893_v0 }
0x15ea   :  { %v6406_v53 = vpop.f32.mrb[128].mxu1 }
0x15eb   :  { %v13434_v37 = vpop.f32.mrb[129].mxu1  ;;  %13440 = vmatmul.mubr.msk.f32.vlgmr.msra.gmra.mrb[106].mxu0 %vm624_vm4, %v6406_v53  ;;  %v11880_v53 = vld [vmem:[%s16670_s28 + $0x4] sm:$0x3] }
0x15ec   :  { %14524 = vmatpush3.bf16.msra.mxu0 %v14523_v32  ;;  %13451 = vmatprep.mubr.msk.f32.mxu0 %vm14894_vm0, %v14895_v1  ;;  %v11886_v37 = vld [vmem:[%s16670_s28 + $0x6] sm:$0x3] }
0x15ed   :  { %14525 = vmatprep.subr.bf16.mxu0 %v14893_v0 }
0x15ee   :  { %v6558_v42 = vpop.f32.mrb[130].mxu1 }
0x15ef   :  { %v13446_v44 = vpop.f32.mrb[131].mxu1  ;;  %13452 = vmatmul.mubr.msk.f32.vlgmr.msra.gmra.mrb[108].mxu0 %vm624_vm4, %v6558_v42  ;;  %v11910_v42 = vld [vmem:[%s16670_s28 + $0xe] sm:$0x3] }
0x15f0   :  { %14527 = vmatpush3.bf16.msra.mxu0 %v14526_v38  ;;  %13463 = vmatprep.mubr.msk.f32.mxu0 %vm14894_vm0, %v14895_v1  ;;  %v11892_v38 = vld [vmem:[%s16670_s28 + $0x8] sm:$0x3]  ;;  %v11916_v44 = vld [vmem:[%s16670_s28 + $0x10] sm:$0x3] }
0x15f1   :  { %14528 = vmatprep.subr.bf16.mxu0 %v14893_v0 }
0x15f2   :  { %v6710_v10 = vpop.f32.mrb[132].mxu1 }
0x15f3   :  { %v13458_v20 = vpop.f32.mrb[133].mxu1  ;;  %13464 = vmatmul.mubr.msk.f32.vlgmr.msra.gmra.mrb[110].mxu0 %vm624_vm4, %v6710_v10  ;;  %v11889_v10 = vld [vmem:[%s16669_s27 + $0x30] sm:$0xff] }
0x15f4   :  { %14530 = vmatpush3.bf16.msra.mxu0 %v14529_v45  ;;  %13475 = vmatprep.mubr.msk.f32.mxu0 %vm14894_vm0, %v14895_v1  ;;  %v11883_v45 = vld [vmem:[%s16669_s27 + $0x20] sm:$0xff]  ;;  %v11890_v20 = vld [vmem:[%s16669_s27 + $0x38] sm:$0xff] }
0x15f5   :  { %14531 = vmatprep.subr.bf16.mxu0 %v14893_v0  ;;  %v14544_v60 = vpack.c.bf16 %v11884_v46, %v11883_v45 }
0x15f6   :  { %v6862_v6 = vpop.f32.mrb[134].mxu1 }
0x15f7   :  { %v13470_v51 = vpop.f32.mrb[135].mxu1  ;;  %13476 = vmatmul.mubr.msk.f32.vlgmr.msra.gmra.mrb[112].mxu0 %vm624_vm4, %v6862_v6 }
0x15f8   :  { %14533 = vmatpush3.bf16.msra.mxu0 %v14532_v27  ;;  %13487 = vmatprep.mubr.msk.f32.mxu0 %vm14894_vm0, %v14895_v1 }
0x15f9   :  { %14534 = vmatprep.subr.bf16.mxu0 %v14893_v0 }
0x15fa   :  { %v7014_v23 = vpop.f32.mrb[136].mxu1 }
0x15fb   :  { %v13482_v59 = vpop.f32.mrb[137].mxu1  ;;  %13488 = vmatmul.mubr.msk.f32.vlgmr.msra.gmra.mrb[114].mxu0 %vm624_vm4, %v7014_v23  ;;  %v11895_v23 = vld [vmem:[%s16669_s27 + $0x40] sm:$0xff] }
0x15fc   :  { %14536 = vmatpush3.bf16.msra.mxu0 %v14535_v15  ;;  %13499 = vmatprep.mubr.msk.f32.mxu0 %vm14894_vm0, %v14895_v1  ;;  %v14547_v15 = vpack.c.bf16 %v11890_v20, %v11889_v10  ;;  %v11896_v59 = vld [vmem:[%s16669_s27 + $0x48] sm:$0xff] }
0x15fd   :  { %13507 = vmatprep.subr.mxu0 %v14895_v1 }
0x15fe   :  { %v7166_v33 = vpop.f32.mrb[138].mxu1 }
0x15ff   :  { %v13494_v41 = vpop.f32.mrb[139].mxu1  ;;  %13500 = vmatmul.mubr.msk.f32.vlgmr.msra.gmra.mrb[116].mxu0 %vm624_vm4, %v7166_v33 }
0x1600   :  { %13509 = vmatprep.mubr.msk.f32.mxu0 %vm14894_vm0, %v14895_v1 }
0x16ba   :  { %v6330_v50 = vpop.f32.mrb[104].mxu0 }
0x16bb   :  { %v6334_v61 = vadd.f32 %v6330_v50, %v6180_v17  ;;  %v13429_v8 = vpop.f32.mrb[105].mxu0  ;;  %v7333_v17 = vld [vmem:[%s16669_s27] sm:$0xff]  ;;  %v14550_v50 = vpack.c.bf16 %v11896_v59, %v11895_v23 }
0x16bc   :  { %v14541_v26 = vpack.c.bf16 %v7334_v18, %v7333_v17  ;;  %v11902_v8 = vld [vmem:[%s16669_s27 + $0x58] sm:$0xff]  ;;  %v8632_v18 = vld [vmem:[%s16671_s1] sm:$0xff] }
0x16be   :  { %v6482_v47 = vpop.f32.mrb[106].mxu0 }
0x16bf   :  { %v6486_v48 = vadd.f32 %v6482_v47, %v6334_v61  ;;  %v13441_v52 = vpop.f32.mrb[107].mxu0  ;;  %v11901_v61 = vld [vmem:[%s16669_s27 + $0x50] sm:$0xff] }
0x16c0   :  { %v14553_v52 = vpack.c.bf16 %v11902_v8, %v11901_v61  ;;  %v11922_v61 = vld [vmem:[%s16674_s10] ss:$0 sm:$0xff] }
0x16c2   :  { %v6634_v54 = vpop.f32.mrb[108].mxu0 }
0x16c3   :  { %v6638_v55 = vadd.f32 %v6634_v54, %v6486_v48  ;;  %v13453_v56 = vpop.f32.mrb[109].mxu0  ;;  %v11907_v54 = vld [vmem:[%s16669_s27 + $0x60] sm:$0xff] }
0x16c6   :  { %v6786_v57 = vpop.f32.mrb[110].mxu0 }
0x16c7   :  { %v6790_v58 = vadd.f32 %v6786_v57, %v6638_v55  ;;  %v13465_v62 = vpop.f32.mrb[111].mxu0  ;;  %v11908_v55 = vld [vmem:[%s16669_s27 + $0x68] sm:$0xff] }
0x16c8   :  { %v11913_v62 = vld [vmem:[%s16669_s27 + $0x70] sm:$0xff] }
0x16ca   :  { %v6938_v63 = vpop.f32.mrb[112].mxu0 }
0x16cb   :  { %v6942_v2 = vadd.f32 %v6938_v63, %v6790_v58  ;;  %v13477_v3 = vpop.f32.mrb[113].mxu0  ;;  %v14556_v58 = vpack.c.bf16 %v11908_v55, %v11907_v54  ;;  %v11914_v63 = vld [vmem:[%s16669_s27 + $0x78] sm:$0xff]  ;;  %v1690_v54 = vmul.f32 %v15528_v49, %v1505_v29  ;;  %v8800_v29 = vld [vmem:[%s16675_s11 + $0x10] sm:$0x3]  ;;  %v8985_v49 = vld [vmem:[%s16676_s15] sm:$0xff] }
0x16ce   :  { %v7090_v5 = vpop.f32.mrb[114].mxu0 }
0x16cf   :  { %v7094_v7 = vadd.f32 %v7090_v5, %v6942_v2  ;;  %v13489_v11 = vpop.f32.mrb[115].mxu0  ;;  %v14559_v5 = vpack.c.bf16 %v11914_v63, %v11913_v62  ;;  %v8893_v63 = vld [vmem:[%s16678_s18] sm:$0xff] }
0x16d0   :  { %v11920_v11 = vld [vmem:[%s16669_s27 + $0x88] sm:$0xff] }
0x16d2   :  { %v7242_v24 = vpop.f32.mrb[116].mxu0 }
0x16d3   :  { %v7246_v13 = vadd.f32 %v7242_v24, %v7094_v7  ;;  %v13501_v14 = vpop.f32.mrb[117].mxu0  ;;  %v11919_v7 = vld [vmem:[%s16669_s27 + $0x80] sm:$0xff] }
0x16d4   :  { %v14562_v31 = vpack.c.bf16 %v11920_v11, %v11919_v7  ;;  %v8987_v7 = vld [vmem:[%s16676_s15 + $0x10] sm:$0x3] }
0x16d5   :  { %v7254_v19 = vadd.f32 %v11870_v12, %v7246_v13 }
0x16d7   :  { %13503 = vmatpush3.msk.msra.mxu1 %vm428_vm3, %v7254_v19  ;;  %13508 = vmatpush3.msk.msra.mxu0 %vm428_vm3, %v7254_v19 }
0x16d8   :  { %13505 = vmatmul.mubr.msk.f32.vlgmr.msra.gmra.mrb[140].mxu1 %vm7256_vm2, %v7255_v21  ;;  %13510 = vmatmul.mubr.msk.f32.vlgmr.msra.gmra.mrb[118].mxu0 %vm7256_vm2, %v11873_v22  ;;  %v8714_v22 = vld [vmem:[%s16672_s2] sm:$0xff] }
0x16d9   :  { %14537 = vmatprep.subr.bf16.mxu1 %v14893_v0  ;;  %14540 = vmatprep.subr.bf16.mxu0 %v14893_v0 }
0x16da   :  { %14539 = vmatpush3.bf16.msra.mxu1 %v14538_v25  ;;  %14542 = vmatpush3.bf16.msra.mxu0 %v14541_v26  ;;  %v8715_v25 = vld [vmem:[%s16672_s2 + $0x8] sm:$0xff] }
0x16db   :  { %13516 = vmatprep.mubr.msk.f32.mxu1 %vm14894_vm0, %v14895_v1  ;;  %13523 = vmatprep.mubr.msk.f32.mxu0 %vm14894_vm0, %v14895_v1  ;;  %v14568_v26 = vpack.c.bf16 %v8715_v25, %v8714_v22 }
0x16dc   :  { %13526 = vmatprep.subr.mxu1 %v14895_v1  ;;  %14543 = vmatprep.subr.bf16.mxu0 %v14893_v0 }
0x17ab   :  { %v7329_v30 = vpop.f32.mrb[140].mxu1  ;;  %v7406_v32 = vpop.f32.mrb[118].mxu0 }
0x17ac   :  { %v13511_v34 = vpop.f32.mrb[119].mxu0  ;;  %13517 = vmatmul.mubr.msk.f32.vlgmr.msra.gmra.mrb[142].mxu1 %vm624_vm4, %v7406_v32  ;;  %13524 = vmatmul.mubr.msk.f32.vlgmr.msra.gmra.mrb[120].mxu0 %vm624_vm4, %v7329_v30  ;;  %v13506_v35 = vpop.f32.mrb[141].mxu1 }
0x17ad   :  { %13527 = vmatpush3.msk.msra.mxu1 %vm428_vm3, %v7254_v19  ;;  %13528 = vmatprep.mubr.msk.f32.mxu1 %vm14894_vm0, %v14895_v1  ;;  %v1793_v30 = vpop.xlane.xlu0 %1792  ;;  %v11629_v35 = vld [vmem:[%s16673_s7] ss:$0 sm:$0xff] }
0x17ae   :  { %13538 = vmatprep.subr.mxu1 %v14895_v1  ;;  %13535 = vmatprep.mubr.msk.f32.mxu0 %vm14894_vm0, %v14895_v1  ;;  %v1794_v32 = vmax.f32 %v1793_v30, 0.0 }
0x17af   :  { %14545 = vmatpush3.bf16.msra.mxu0 %v14544_v60 }
0x17b0   :  { %13529 = vmatmul.mubr.msk.f32.vlgmr.msra.gmra.mrb[144].mxu1 %vm7256_vm2, %v11880_v53  ;;  %14546 = vmatprep.subr.bf16.mxu0 %v14893_v0  ;;  %v1795_v34 = vsub.f32 0.0, %v1794_v32 }
0x17b1   :  { %13539 = vmatpush3.msk.msra.mxu1 %vm428_vm3, %v7254_v19  ;;  %13540 = vmatprep.mubr.msk.f32.mxu1 %vm14894_vm0, %v14895_v1 }
0x17b2   :  { %13550 = vmatprep.subr.mxu1 %v14895_v1  ;;  %v1803_v53 = vmul.f32 %v11629_v35, %v1795_v34 }
0x17b4   :  { %13541 = vmatmul.mubr.msk.f32.vlgmr.msra.gmra.mrb[146].mxu1 %vm7256_vm2, %v11886_v37  ;;  %v1804_v37 = vmul.f32 1.442695, %v1803_v53 }
0x17b5   :  { %13551 = vmatpush3.msk.msra.mxu1 %vm428_vm3, %v7254_v19  ;;  %13552 = vmatprep.mubr.msk.f32.mxu1 %vm14894_vm0, %v14895_v1 }
0x17b6   :  { %13562 = vmatprep.subr.mxu1 %v14895_v1  ;;  %14758 = vpow2.f32 %v1804_v37 }
0x17b8   :  { %13553 = vmatmul.mubr.msk.f32.vlgmr.msra.gmra.mrb[148].mxu1 %vm7256_vm2, %v11892_v38 }
0x17b9   :  { %13563 = vmatpush3.msk.msra.mxu1 %vm428_vm3, %v7254_v19  ;;  %13564 = vmatprep.mubr.msk.f32.mxu1 %vm14894_vm0, %v14895_v1 }
0x17ba   :  { %13574 = vmatprep.subr.mxu1 %v14895_v1 }
0x17bc   :  { %13565 = vmatmul.mubr.msk.f32.vlgmr.msra.gmra.mrb[150].mxu1 %vm7256_vm2, %v11898_v39 }
0x17bd   :  { %13575 = vmatpush3.msk.msra.mxu1 %vm428_vm3, %v7254_v19  ;;  %13576 = vmatprep.mubr.msk.f32.mxu1 %vm14894_vm0, %v14895_v1 }
0x17be   :  { %13586 = vmatprep.subr.mxu1 %v14895_v1 }
0x17c0   :  { %13577 = vmatmul.mubr.msk.f32.vlgmr.msra.gmra.mrb[152].mxu1 %vm7256_vm2, %v11904_v40 }
0x17c1   :  { %13587 = vmatpush3.msk.msra.mxu1 %vm428_vm3, %v7254_v19  ;;  %13588 = vmatprep.mubr.msk.f32.mxu1 %vm14894_vm0, %v14895_v1 }
0x17c2   :  { %13598 = vmatprep.subr.mxu1 %v14895_v1 }
0x17c4   :  { %13589 = vmatmul.mubr.msk.f32.vlgmr.msra.gmra.mrb[154].mxu1 %vm7256_vm2, %v11910_v42 }
0x17c5   :  { %13599 = vmatpush3.msk.msra.mxu1 %vm428_vm3, %v7254_v19  ;;  %13600 = vmatprep.mubr.msk.f32.mxu1 %vm14894_vm0, %v14895_v1  ;;  %v8633_v19 = vld [vmem:[%s16671_s1 + $0x8] sm:$0xff]  ;;  %vm9201_vm3 = vcmask 146432  }
0x17c6   :  { %14564 = vmatprep.subr.bf16.mxu1 %v14893_v0  ;;  %v14565_v21 = vpack.c.bf16 %v8633_v19, %v8632_v18  ;;  %v11925_v18 = vld [vmem:[%s16679_s0] ss:$0 sm:$0xff] }
0x17c8   :  { %13601 = vmatmul.mubr.msk.f32.vlgmr.msra.gmra.mrb[156].mxu1 %vm7256_vm2, %v11916_v44 }
0x17c9   :  { %13614 = vmatprep.mubr.msk.f32.mxu1 %vm14894_vm0, %v14895_v1  ;;  %14566 = vmatpush3.bf16.msra.mxu1 %v14565_v21 }
0x17ca   :  { %13624 = vmatprep.subr.mxu1 %v14895_v1 }
0x187f   :  { %v7482_v27 = vpop.f32.mrb[142].mxu1  ;;  %v7555_v36 = vpop.f32.mrb[120].mxu0 }
0x1880   :  { %v16211_v43 = vadd.f32 %v7555_v36, %v7482_v27  ;;  %v13518_v6 = vpop.f32.mrb[143].mxu1  ;;  %v13525_v51 = vpop.f32.mrb[121].mxu0 }
0x1881   :  { %v14759_v6 = vpop.eup %14758 }
0x1883   :  { %v7630_v33 = vpop.f32.mrb[144].mxu1 }
0x1884   :  { %v13530_v41 = vpop.f32.mrb[145].mxu1  ;;  %13536 = vmatmul.mubr.msk.f32.vlgmr.msra.gmra.mrb[122].mxu0 %vm624_vm4, %v7630_v33 }
0x1885   :  { %14548 = vmatpush3.bf16.msra.mxu0 %v14547_v15  ;;  %13547 = vmatprep.mubr.msk.f32.mxu0 %vm14894_vm0, %v14895_v1  ;;  %v1806_v15 = vadd.f32 1.0, %v14759_v6 }
0x1886   :  { %14549 = vmatprep.subr.bf16.mxu0 %v14893_v0 }
0x1887   :  { %v7782_v47 = vpop.f32.mrb[146].mxu1  ;;  %14760 = vrcp.f32 %v1806_v15 }
0x1888   :  { %v13542_v48 = vpop.f32.mrb[147].mxu1  ;;  %13548 = vmatmul.mubr.msk.f32.vlgmr.msra.gmra.mrb[124].mxu0 %vm624_vm4, %v7782_v47 }
0x1889   :  { %14551 = vmatpush3.bf16.msra.mxu0 %v14550_v50  ;;  %13559 = vmatprep.mubr.msk.f32.mxu0 %vm14894_vm0, %v14895_v1 }
0x188a   :  { %14552 = vmatprep.subr.bf16.mxu0 %v14893_v0 }
0x188b   :  { %v7934_v56 = vpop.f32.mrb[148].mxu1 }
0x188c   :  { %v13554_v57 = vpop.f32.mrb[149].mxu1  ;;  %13560 = vmatmul.mubr.msk.f32.vlgmr.msra.gmra.mrb[126].mxu0 %vm624_vm4, %v7934_v56  ;;  %v8798_v56 = vld [vmem:[%s16675_s11] sm:$0xff] }
0x188d   :  { %14554 = vmatpush3.bf16.msra.mxu0 %v14553_v52  ;;  %13571 = vmatprep.mubr.msk.f32.mxu0 %vm14894_vm0, %v14895_v1 }
0x188e   :  { %14555 = vmatprep.subr.bf16.mxu0 %v14893_v0 }
0x188f   :  { %v8086_v2 = vpop.f32.mrb[150].mxu1 }
0x1890   :  { %v13566_v3 = vpop.f32.mrb[151].mxu1  ;;  %13572 = vmatmul.mubr.msk.f32.vlgmr.msra.gmra.mrb[128].mxu0 %vm624_vm4, %v8086_v2  ;;  %v8894_v2 = vld [vmem:[%s16678_s18 + $0x8] sm:$0xff] }
0x1891   :  { %14557 = vmatpush3.bf16.msra.mxu0 %v14556_v58  ;;  %13583 = vmatprep.mubr.msk.f32.mxu0 %vm14894_vm0, %v14895_v1  ;;  %v14761_v55 = vpop.eup %14760  ;;  %v8986_v3 = vld [vmem:[%s16676_s15 + $0x8] sm:$0xff] }
0x1892   :  { %14558 = vmatprep.subr.bf16.mxu0 %v14893_v0  ;;  %v1809_v57 = vmul.f32 %v14761_v55, %v1782_v9 }
0x1893   :  { %v8238_v24 = vpop.f32.mrb[152].mxu1 }
0x1894   :  { %v13578_v12 = vpop.f32.mrb[153].mxu1  ;;  %13584 = vmatmul.mubr.msk.f32.vlgmr.msra.gmra.mrb[130].mxu0 %vm624_vm4, %v8238_v24 }
0x1895   :  { %14560 = vmatpush3.bf16.msra.mxu0 %v14559_v5  ;;  %13595 = vmatprep.mubr.msk.f32.mxu0 %vm14894_vm0, %v14895_v1  ;;  %v8895_v5 = vld [vmem:[%s16678_s18 + $0x10] sm:$0x3] }
0x1896   :  { %14561 = vmatprep.subr.bf16.mxu0 %v14893_v0 }
0x1897   :  { %v8390_v13 = vpop.f32.mrb[154].mxu1 }
0x1898   :  { %v13590_v14 = vpop.f32.mrb[155].mxu1  ;;  %13596 = vmatmul.mubr.msk.f32.vlgmr.msra.gmra.mrb[132].mxu0 %vm624_vm4, %v8390_v13 }
0x1899   :  { %14563 = vmatpush3.bf16.msra.mxu0 %v14562_v31  ;;  %13607 = vmatprep.mubr.msk.f32.mxu0 %vm14894_vm0, %v14895_v1 }
0x189a   :  { %14567 = vmatprep.subr.bf16.mxu0 %v14893_v0 }
0x189b   :  { %v8542_v16 = vpop.f32.mrb[156].mxu1 }
0x189c   :  { %v13602_v17 = vpop.f32.mrb[157].mxu1  ;;  %13608 = vmatmul.mubr.msk.f32.vlgmr.msra.gmra.mrb[134].mxu0 %vm624_vm4, %v8542_v16 }
0x189d   :  { %13621 = vmatprep.mubr.msk.f32.mxu0 %vm14894_vm0, %v14895_v1  ;;  %14569 = vmatpush3.bf16.msra.mxu0 %v14568_v26 }
0x189e   :  { %13635 = vmatprep.subr.mxu0 %v14895_v1 }
0x1957   :  { %v7706_v38 = vpop.f32.mrb[122].mxu0 }
0x1958   :  { %v7710_v39 = vadd.f32 %v7706_v38, %v16211_v43  ;;  %v13537_v40 = vpop.f32.mrb[123].mxu0 }
0x195b   :  { %v7858_v42 = vpop.f32.mrb[124].mxu0 }
0x195c   :  { %v7862_v44 = vadd.f32 %v7858_v42, %v7710_v39  ;;  %v13549_v45 = vpop.f32.mrb[125].mxu0 }
0x195f   :  { %v8010_v46 = vpop.f32.mrb[126].mxu0 }
0x1960   :  { %v8014_v60 = vadd.f32 %v8010_v46, %v7862_v44  ;;  %v13561_v10 = vpop.f32.mrb[127].mxu0 }
0x1963   :  { %v8162_v20 = vpop.f32.mrb[128].mxu0 }
0x1964   :  { %v8166_v27 = vadd.f32 %v8162_v20, %v8014_v60  ;;  %v13573_v36 = vpop.f32.mrb[129].mxu0 }
0x1967   :  { %v8314_v51 = vpop.f32.mrb[130].mxu0 }
0x1968   :  { %v8318_v23 = vadd.f32 %v8314_v51, %v8166_v27  ;;  %v13585_v59 = vpop.f32.mrb[131].mxu0 }
0x196b   :  { %v8466_v33 = vpop.f32.mrb[132].mxu0 }
0x196c   :  { %v8470_v43 = vadd.f32 %v8466_v33, %v8318_v23  ;;  %v13597_v41 = vpop.f32.mrb[133].mxu0 }
0x196f   :  { %v8618_v50 = vpop.f32.mrb[134].mxu0 }
0x1970   :  { %v8622_v8 = vadd.f32 %v8618_v50, %v8470_v43  ;;  %v13609_v47 = vpop.f32.mrb[135].mxu0 }
0x1972   :  { %v8630_v48 = vadd.f32 %v11922_v61, %v8622_v8 }
0x1974   :  { %v8631_v52 = vmax.f32 %v8630_v48, 0.0 }
0x1976   :  { %13615 = vmatmul.mubr.msk.f32.vlgmr.msra.gmra.mrb[158].mxu1 %vm624_vm4, %v8631_v52 }
0x1977   :  { %13625 = vmatpush3.msk.msra.mxu1 %vm1045_vm5, %v1690_v54  ;;  %13626 = vmatprep.mubr.msk.f32.mxu1 %vm14894_vm0, %v14895_v1 }
0x1978   :  { %13646 = vmatprep.subr.mxu1 %v14895_v1 }
0x197a   :  { %13627 = vmatmul.mubr.msk.f32.vlgmr.msra.gmra.mrb[160].mxu1 %vm1507_vm9, %v8798_v56 }
0x197b   :  { %13647 = vmatpush3.msk.msra.mxu1 %vm1616_vm11, %v1809_v57  ;;  %13629 = vmatprep.mubr.msk.f32.mxu1 %vm14894_vm0, %v14895_v1 }
0x197c   :  { %14570 = vmatprep.subr.bf16.mxu1 %v14893_v0 }
0x197e   :  { %13630 = vmatmul.mubr.msk.f32.gmra.mrb[162].mxu1 %vm1507_vm9, %v8799_v28 }
0x197f   :  { %13632 = vmatprep.mubr.msk.f32.mxu1 %vm14894_vm0, %v14895_v1 }
0x1982   :  { %13633 = vmatmul.mubr.msk.f32.gmra.mrb[164].mxu1 %vm1507_vm9, %v8800_v29 }
0x1983   :  { %13648 = vmatprep.mubr.msk.f32.mxu1 %vm14894_vm0, %v14895_v1 }
0x1986   :  { %13649 = vmatmul.mubr.msk.f32.vlgmr.msra.gmra.mrb[166].mxu1 %vm1612_vm12, %v8985_v49 }
0x1987   :  { %13651 = vmatprep.mubr.msk.f32.mxu1 %vm14894_vm0, %v14895_v1 }
0x198a   :  { %13652 = vmatmul.mubr.msk.f32.gmra.mrb[168].mxu1 %vm1612_vm12, %v8986_v3 }
0x198b   :  { %13654 = vmatprep.mubr.msk.f32.mxu1 %vm14894_vm0, %v14895_v1 }
0x198e   :  { %13655 = vmatmul.mubr.msk.f32.gmra.mrb[170].mxu1 %vm1612_vm12, %v8987_v7 }
0x198f   :  { %13674 = vmatprep.mubr.msk.f32.mxu1 %vm14894_vm0, %v14895_v1 }
0x1a49   :  { %v8710_v9 = vpop.f32.mrb[158].mxu1 }
0x1a4a   :  { %v8711_v58 = vadd.f32 %v11923_v4, %v8710_v9  ;;  %v13616_v62 = vpop.f32.mrb[159].mxu1 }
0x1a4c   :  { %13622 = vmatmul.mubr.msk.f32.vlgmr.msra.gmra.mrb[136].mxu0 %vm624_vm4, %v8711_v58  ;;  %v8796_v21 = vmul.f32 0.5, %v8711_v58 }
0x1a4d   :  { %13636 = vmatpush3.msk.msra.mxu0 %vm1045_vm5, %v1690_v54  ;;  %13637 = vmatprep.mubr.msk.f32.mxu0 %vm14894_vm0, %v14895_v1  ;;  %v16313_v11 = vpop.f32.mrb[160].mxu1 }
0x1a4e   :  { %13657 = vmatprep.subr.mxu0 %v14895_v1  ;;  %v13628_v24 = vpop.f32.mrb[161].mxu1 }
0x1a50   :  { %13638 = vmatmul.mubr.msk.f32.vlgmr.msra.gmra.mrb[138].mxu0 %vm1507_vm9, %v8893_v63 }
0x1a51   :  { %13640 = vmatprep.mubr.msk.f32.mxu0 %vm14894_vm0, %v14895_v1  ;;  %v16315_v12 = vpop.f32.mrb[162].mxu1 }
0x1a52   :  { %v13631_v31 = vpop.f32.mrb[163].mxu1 }
0x1a54   :  { %13641 = vmatmul.mubr.msk.f32.gmra.mrb[140].mxu0 %vm1507_vm9, %v8894_v2 }
0x1a55   :  { %13643 = vmatprep.mubr.msk.f32.mxu0 %vm14894_vm0, %v14895_v1  ;;  %v16317_v13 = vpop.f32.mrb[164].mxu1 }
0x1a56   :  { %v13634_v14 = vpop.f32.mrb[165].mxu1 }
0x1a58   :  { %13644 = vmatmul.mubr.msk.f32.gmra.mrb[142].mxu0 %vm1507_vm9, %v8895_v5 }
0x1a59   :  { %13659 = vmatprep.mubr.msk.f32.mxu0 %vm14894_vm0, %v14895_v1  ;;  %v16319_v16 = vpop.f32.mrb[166].mxu1 }
0x1a5a   :  { %v13650_v17 = vpop.f32.mrb[167].mxu1  ;;  %v9166_v30 = vmul.f32 %v16319_v16, %v16319_v16 }
0x1a5b   :  { %v9198_v17 = vld [vmem:[%s16680_s22] sm:$0xff] }
0x1a5d   :  { %v16337_v40 = vpop.f32.mrb[168].mxu1 }
0x1a5e   :  { %v9167_v42 = vmul.f32 %v16337_v40, %v16337_v40  ;;  %v13653_v44 = vpop.f32.mrb[169].mxu1 }
0x1a61   :  { %v16341_v60 = vpop.f32.mrb[170].mxu1 }
0x1a62   :  { %v9168_v20 = vmul.f32 %v16341_v60, %v16341_v60  ;;  %v13656_v36 = vpop.f32.mrb[171].mxu1 }
0x1b1f   :  { %v8792_v19 = vpop.f32.mrb[136].mxu0 }
0x1b20   :  { %v8793_v22 = vadd.f32 %v11925_v18, %v8792_v19  ;;  %v13623_v25 = vpop.f32.mrb[137].mxu0  ;;  %v9199_v19 = vld [vmem:[%s16680_s22 + $0x8] sm:$0xff] }
0x1b21   :  { %v11948_v25 = vld [vmem:[%s16681_s23 + $0x18] sm:$0xff] }
0x1b22   :  { %v8797_v26 = vmul.f32 %v8796_v21, %v8793_v22  ;;  %v9200_v21 = vld [vmem:[%s16680_s22 + $0x10] sm:$0x3] }
0x1b23   :  { %v8971_v32 = vpop.f32.mrb[138].mxu0  ;;  %v11947_v22 = vld [vmem:[%s16681_s23 + $0x10] sm:$0xff] }
0x1b24   :  { %13658 = vmatpush3.msk.msra.mxu0 %vm1616_vm11, %v8797_v26  ;;  %v9163_v34 = vmul.f32 %v8971_v32, %v16313_v11  ;;  %v13639_v35 = vpop.f32.mrb[139].mxu0  ;;  %v11954_v26 = vld [vmem:[%s16681_s23 + $0x30] sm:$0xff]  ;;  %v11955_v32 = vld [vmem:[%s16681_s23 + $0x38] sm:$0xff] }
0x1b25   :  { %13660 = vmatmul.mubr.msk.f32.vlgmr.msra.gmra.mrb[144].mxu0 %vm1612_vm12, %v8985_v49  ;;  %14573 = vmatprep.subr.bf16.mxu0 %v14893_v0 }
0x1b26   :  { %13662 = vmatprep.mubr.msk.f32.mxu0 %vm14894_vm0, %v14895_v1  ;;  %v9169_v53 = vadd.f32 %v9166_v30, %v9163_v34  ;;  %v14574_v30 = vpack.c.bf16 %v11948_v25, %v11947_v22  ;;  %v14583_v34 = vpack.c.bf16 %v11955_v32, %v11954_v26  ;;  %v11975_v22 = vld [vmem:[%s16681_s23 + $0xa0] sm:$0xff]  ;;  %v11990_v32 = vld [vmem:[%s16681_s23 + $0xf0] sm:$0xff] }
0x1b27   :  { %v8976_v37 = vpop.f32.mrb[140].mxu0 }
0x1b28   :  { %v9164_v38 = vmul.f32 %v8976_v37, %v16315_v12  ;;  %v13642_v39 = vpop.f32.mrb[141].mxu0  ;;  %14575 = vmatpush3.bf16.msra.mxu0 %v14574_v30  ;;  %v11976_v30 = vld [vmem:[%s16681_s23 + $0xa8] sm:$0xff] }
0x1b29   :  { %13663 = vmatmul.mubr.msk.f32.gmra.mrb[146].mxu0 %vm1612_vm12, %v8986_v3  ;;  %14576 = vmatprep.subr.bf16.mxu0 %v14893_v0 }
0x1b2a   :  { %13665 = vmatprep.mubr.msk.f32.mxu0 %vm14894_vm0, %v14895_v1  ;;  %v9170_v45 = vadd.f32 %v9167_v42, %v9164_v38 }
0x1b2b   :  { %v8981_v46 = vpop.f32.mrb[142].mxu0 }
0x1b2c   :  { %v9165_v10 = vmul.f32 %v8981_v46, %v16317_v13  ;;  %v13645_v27 = vpop.f32.mrb[143].mxu0 }
0x1b2d   :  { %13666 = vmatmul.mubr.msk.f32.gmra.mrb[148].mxu0 %vm1612_vm12, %v8987_v7  ;;  %v11961_v27 = vld [vmem:[%s16681_s23 + $0x58] sm:$0xff] }
0x1b2e   :  { %13687 = vmatprep.mubr.msk.f32.mxu0 %vm14894_vm0, %v14895_v1  ;;  %v9171_v6 = vadd.f32 %v9168_v20, %v9165_v10  ;;  %v9310_v10 = vld [vmem:[%s16681_s23 + $0x8] sm:$0xff]  ;;  %v11960_v20 = vld [vmem:[%s16681_s23 + $0x50] sm:$0xff] }
0x1bf8   :  { %v16346_v51 = vpop.f32.mrb[144].mxu0 }
0x1bf9   :  { %v9172_v15 = vmul.f32 %v16346_v51, %v16346_v51  ;;  %v13661_v23 = vpop.f32.mrb[145].mxu0 }
0x1bfb   :  { %v9175_v59 = vadd.f32 %v9172_v15, %v9169_v53 }
0x1bfc   :  { %v16350_v33 = vpop.f32.mrb[146].mxu0 }
0x1bfd   :  { %v9173_v43 = vmul.f32 %v16350_v33, %v16350_v33  ;;  %v13664_v41 = vpop.f32.mrb[147].mxu0  ;;  %v9178_v8 = vsel %vm624_vm4, %v9175_v59, -inf }
0x1bfe   :  { %v11951_v41 = vld [vmem:[%s16681_s23 + $0x20] sm:$0xff] }
0x1bff   :  { %v9176_v50 = vadd.f32 %v9173_v43, %v9170_v45  ;;  %v9309_v45 = vld [vmem:[%s16681_s23] sm:$0xff]  ;;  %v14589_v43 = vpack.c.bf16 %v11961_v27, %v11960_v20  ;;  %v11988_v27 = vld [vmem:[%s16681_s23 + $0xe8] sm:$0xff] }
0x1c00   :  { %v16354_v61 = vpop.f32.mrb[148].mxu0 }
0x1c01   :  { %v9179_v47 = vsel %vm624_vm4, %v9176_v50, -inf  ;;  %v9174_v48 = vmul.f32 %v16354_v61, %v16354_v61  ;;  %v13667_v52 = vpop.f32.mrb[149].mxu0 }
0x1c02   :  { %v9181_v54 = vmax.f32 %v9178_v8, %v9179_v47  ;;  %v11966_v52 = vld [vmem:[%s16681_s23 + $0x70] sm:$0xff] }
0x1c03   :  { %v9177_v55 = vadd.f32 %v9174_v48, %v9171_v6  ;;  %v11952_v48 = vld [vmem:[%s16681_s23 + $0x28] sm:$0xff] }
0x1c05   :  { %v9180_v56 = vsel %vm1592_vm10, %v9177_v55, -inf }
0x1c06   :  { %v9182_v57 = vmax.f32 %v9181_v54, %v9180_v56  ;;  %v11967_v54 = vld [vmem:[%s16681_s23 + $0x78] sm:$0xff]  ;;  %v14580_v56 = vpack.c.bf16 %v11952_v48, %v11951_v41  ;;  %v11993_v41 = vld [vmem:[%s16681_s23 + $0x100] sm:$0xff] }
0x1c07   :  { %v12009_v48 = vld [vmem:[%s16681_s23 + $0x158] sm:$0xff] }
0x1c08   :  { %v9183_v28 = vrot.slane %v9182_v57, 4 }
0x1c0a   :  { %v9184_v29 = vmax.f32 %v9182_v57, %v9183_v28  ;;  %v14595_v57 = vpack.c.bf16 %v11967_v54, %v11966_v52  ;;  %v11957_v28 = vld [vmem:[%s16681_s23 + $0x40] sm:$0xff] }
0x1c0c   :  { %v9185_v49 = vrot.slane %v9184_v29, 2 }
0x1c0e   :  { %v9186_v4 = vmax.f32 %v9184_v29, %v9185_v49  ;;  %v11958_v29 = vld [vmem:[%s16681_s23 + $0x48] sm:$0xff]  ;;  %v11972_v49 = vld [vmem:[%s16681_s23 + $0x90] sm:$0xff] }
0x1c10   :  { %v9187_v9 = vrot.slane %v9186_v4, 1 }
0x1c12   :  { %v9188_v58 = vmax.f32 %v9186_v4, %v9187_v9 }
0x1c14   :  { %v9189_v62 = vsub.f32 %v9175_v59, %v9188_v58  ;;  %v9190_v63 = vsub.f32 %v9176_v50, %v9188_v58  ;;  %v9191_v2 = vsub.f32 %v9177_v55, %v9188_v58  ;;  %v14577_v59 = vpack.c.bf16 %v9310_v10, %v9309_v45 }
0x1c15   :  { %v14586_v58 = vpack.c.bf16 %v11958_v29, %v11957_v28  ;;  %v12015_v28 = vld [vmem:[%s16681_s23 + $0x178] sm:$0xff]  ;;  %v12005_v29 = vld [vmem:[%s16681_s23 + $0x140] sm:$0xff] }
0x1c16   :  { %v9192_v3 = vmul.f32 1.442695, %v9189_v62  ;;  %v9194_v5 = vmul.f32 1.442695, %v9190_v63  ;;  %v9196_v7 = vmul.f32 1.442695, %v9191_v2 }
0x1c17   :  { %v11963_v63 = vld [vmem:[%s16681_s23 + $0x60] sm:$0xff] }
0x1c18   :  { %14762 = vpow2.f32 %v9192_v3 }
0x1c19   :  { %14764 = vpow2.f32 %v9194_v5  ;;  %v11978_v5 = vld [vmem:[%s16681_s23 + $0xb0] sm:$0xff] }
0x1c1a   :  { %14766 = vpow2.f32 %v9196_v7  ;;  %v11979_v7 = vld [vmem:[%s16681_s23 + $0xb8] sm:$0xff] }
0x1c22   :  { %v14763_v24 = vpop.eup %14762 }
0x1c23   :  { %v14765_v31 = vpop.eup %14764 }
0x1c24   :  { %v14571_v14 = vpack.c.bf16 %v14765_v31, %v14763_v24  ;;  %v14767_v18 = vpop.eup %14766 }
0x1c26   :  { %14572 = vmatpush3.bf16.msra.mxu1 %v14571_v14  ;;  %v11970_v14 = vld [vmem:[%s16681_s23 + $0x88] sm:$0xff] }
0x1c27   :  { %13672 = vmatprep.subr.mxu1 %v14895_v1 }
0x1c2a   :  { %13673 = vmatpush3.msk.msra.mxu1 %vm1616_vm11, %v14767_v18 }
0x1c2b   :  { %13675 = vmatmul.mubr.msk.f32.vlgmr.msra.gmra.mrb[172].mxu1 %vm9201_vm3, %v9198_v17  ;;  %14582 = vmatprep.subr.bf16.mxu1 %v14893_v0  ;;  %v11984_v17 = vld [vmem:[%s16681_s23 + $0xd0] sm:$0xff] }
0x1c2c   :  { %13677 = vmatprep.mubr.msk.f32.mxu1 %vm14894_vm0, %v14895_v1  ;;  %14584 = vmatpush3.bf16.msra.mxu1 %v14583_v34  ;;  %v11991_v34 = vld [vmem:[%s16681_s23 + $0xf8] sm:$0xff] }
0x1c2d   :  { %14588 = vmatprep.subr.bf16.mxu1 %v14893_v0 }
0x1c2f   :  { %13678 = vmatmul.mubr.msk.f32.gmra.mrb[174].mxu1 %vm9201_vm3, %v9199_v19 }
0x1c30   :  { %13680 = vmatprep.mubr.msk.f32.mxu1 %vm14894_vm0, %v14895_v1 }
0x1c33   :  { %13681 = vmatmul.mubr.msk.f32.gmra.mrb[176].mxu1 %vm9201_vm3, %v9200_v21 }
0x1c34   :  { %13708 = vmatprep.mubr.msk.f32.mxu1 %vm14894_vm0, %v14895_v1 }
0x1cfe   :  { %v9280_v35 = vpop.f32.mrb[172].mxu1 }
0x1cff   :  { %14768 = vrcp.f32 %v9280_v35  ;;  %v13676_v53 = vpop.f32.mrb[173].mxu1  ;;  %v14604_v35 = vpack.c.bf16 %v11976_v30, %v11975_v22 }
0x1d00   :  { %v14619_v53 = vpack.c.bf16 %v11991_v34, %v11990_v32  ;;  %v11400_v32 = vld [vmem:[%s15121_s6 + $0x30] sm:$0xff]  ;;  %v11401_v34 = vld [vmem:[%s15121_s6 + $0x38] sm:$0xff] }
0x1d02   :  { %v9285_v37 = vpop.f32.mrb[174].mxu1 }
0x1d03   :  { %14770 = vrcp.f32 %v9285_v37  ;;  %v13679_v38 = vpop.f32.mrb[175].mxu1  ;;  %v11981_v37 = vld [vmem:[%s16681_s23 + $0xc0] sm:$0xff] }
0x1d04   :  { %v11982_v38 = vld [vmem:[%s16681_s23 + $0xc8] sm:$0xff] }
0x1d06   :  { %v9290_v39 = vpop.f32.mrb[176].mxu1 }
0x1d07   :  { %14772 = vrcp.f32 %v9290_v39  ;;  %v13682_v42 = vpop.f32.mrb[177].mxu1  ;;  %v11996_v39 = vld [vmem:[%s16681_s23 + $0x110] sm:$0xff] }
0x1d08   :  { %v11997_v42 = vld [vmem:[%s16681_s23 + $0x118] sm:$0xff] }
0x1d09   :  { %v14769_v44 = vpop.eup %14768  ;;  %v14625_v45 = vpack.c.bf16 %v11997_v42, %v11996_v39  ;;  %v11404_v39 = vld [vmem:[%s15121_s6 + $0x50] sm:$0xff]  ;;  %v11405_v42 = vld [vmem:[%s15121_s6 + $0x58] sm:$0xff] }
0x1d0a   :  { %v9295_v46 = vmul.f32 %v14769_v44, %v14763_v24  ;;  %v14607_v24 = vpack.c.bf16 %v11979_v7, %v11978_v5  ;;  %v14610_v44 = vpack.c.bf16 %v11982_v38, %v11981_v37  ;;  %v11403_v37 = vld [vmem:[%s15121_s6 + $0x48] sm:$0xff] }
0x1d0c   :  { %v9300_v36 = vmul.f32 %v9295_v46, %v16313_v11  ;;  %v16385_v6 = vmul.f32 %v9295_v46, %v16346_v51  ;;  %v16388_v15 = vmul.f32 %v9295_v46, %v16319_v16  ;;  %v11987_v46 = vld [vmem:[%s16681_s23 + $0xe0] sm:$0xff] }
0x1d0d   :  { %v14771_v23 = vpop.eup %14770 }
0x1d0e   :  { %v9297_v50 = vmul.f32 %v14771_v23, %v14765_v31  ;;  %v9315_v8 = vrot.slane %v9300_v36, 2  ;;  %v9540_v47 = vrot.slane %v9300_v36, 6  ;;  %v9463_v3 = vrot.slane %v9300_v36, 4  ;;  %v11969_v31 = vld [vmem:[%s16681_s23 + $0x80] sm:$0xff]  ;;  %v12003_v23 = vld [vmem:[%s16681_s23 + $0x138] sm:$0xff] }
0x1d0f   :  { %v14598_v19 = vpack.c.bf16 %v11970_v14, %v11969_v31  ;;  %v10156_v26 = vrot.slane %v16388_v15, 4  ;;  %v10079_v10 = vrot.slane %v16388_v15, 2  ;;  %v10849_v5 = vrot.slane %v16385_v6, 4  ;;  %v12024_v14 = vld [vmem:[%s16681_s23 + $0x1a8] sm:$0xff] }
0x1d10   :  { %v16395_v11 = vmul.f32 %v9297_v50, %v16315_v12  ;;  %v16398_v51 = vmul.f32 %v9297_v50, %v16350_v33  ;;  %13688 = vmatmul.mubr.msk.f32.vlgmr.msra.gmra.mrb[150].mxu0 %vm624_vm4, %v9315_v8  ;;  %13709 = vmatmul.mubr.msk.f32.vlgmr.msra.gmra.mrb[178].mxu1 %vm624_vm4, %v9540_v47  ;;  %v16403_v16 = vmul.f32 %v9297_v50, %v16337_v40  ;;  %v11973_v40 = vld [vmem:[%s16681_s23 + $0x98] sm:$0xff]  ;;  %v10233_v50 = vrot.slane %v16388_v15, 6  ;;  %v11994_v8 = vld [vmem:[%s16681_s23 + $0x108] sm:$0xff]  ;;  %v12008_v47 = vld [vmem:[%s16681_s23 + $0x150] sm:$0xff] }
0x1d11   :  { %v14773_v55 = vpop.eup %14772  ;;  %14578 = vmatpush3.bf16.msra.mxu0 %v14577_v59  ;;  %14590 = vmatpush3.bf16.msra.mxu1 %v14589_v43  ;;  %v14601_v62 = vpack.c.bf16 %v11973_v40, %v11972_v49  ;;  %v14616_v59 = vpack.c.bf16 %v11988_v27, %v11987_v46  ;;  %v14622_v52 = vpack.c.bf16 %v11994_v8, %v11993_v41  ;;  %v10926_v40 = vrot.slane %v16385_v6, 6  ;;  %v11407_v46 = vld [vmem:[%s15121_s6 + $0x68] sm:$0xff]  ;;  %v11409_v27 = vld [vmem:[%s15121_s6 + $0x78] sm:$0xff] }
0x1d12   :  { %v9299_v12 = vmul.f32 %v14773_v55, %v14767_v18  ;;  %13694 = vmatprep.mubr.msk.f32.mxu0 %vm14894_vm0, %v14895_v1  ;;  %13722 = vmatprep.mubr.msk.f32.mxu1 %vm14894_vm0, %v14895_v1  ;;  %v9694_v33 = vrot.slane %v16395_v11, 2  ;;  %v11985_v18 = vld [vmem:[%s16681_s23 + $0xd8] sm:$0xff]  ;;  %v9771_v25 = vrot.slane %v16395_v11, 4  ;;  %v10464_v20 = vrot.slane %v16403_v16, 4 }
0x1d13   :  { %14579 = vmatprep.subr.bf16.mxu0 %v14893_v0  ;;  %14594 = vmatprep.subr.bf16.mxu1 %v14893_v0  ;;  %v14613_v21 = vpack.c.bf16 %v11985_v18, %v11984_v17  ;;  %v14637_v54 = vpack.c.bf16 %v12009_v48, %v12008_v47  ;;  %v10772_v55 = vrot.slane %v16385_v6, 2  ;;  %v10541_v49 = vrot.slane %v16403_v16, 6 }
0x1d14   :  { %13695 = vmatmul.mubr.msk.f32.vlgmr.msra.gmra.mrb[152].mxu0 %vm624_vm4, %v9300_v36  ;;  %13723 = vmatmul.mubr.msk.f32.vlgmr.msra.gmra.mrb[180].mxu1 %vm624_vm4, %v9694_v33  ;;  %v9302_v4 = vmul.f32 %v9299_v12, %v16317_v13  ;;  %v16420_v9 = vmul.f32 %v9299_v12, %v16341_v60  ;;  %v16424_v2 = vmul.f32 %v9299_v12, %v16354_v61  ;;  %v9848_v13 = vrot.slane %v16395_v11, 6  ;;  %v11964_v60 = vld [vmem:[%s16681_s23 + $0x68] sm:$0xff]  ;;  %v12002_v36 = vld [vmem:[%s16681_s23 + $0x130] sm:$0xff] }
0x1d15   :  { %14581 = vmatpush3.bf16.msra.mxu0 %v14580_v56  ;;  %14596 = vmatpush3.bf16.msra.mxu1 %v14595_v57  ;;  %v14592_v61 = vpack.c.bf16 %v11964_v60, %v11963_v63  ;;  %v14631_v43 = vpack.c.bf16 %v12003_v23, %v12002_v36  ;;  %v12000_v56 = vld [vmem:[%s16681_s23 + $0x128] sm:$0xff]  ;;  %v12014_v57 = vld [vmem:[%s16681_s23 + $0x170] sm:$0xff]  ;;  %v11234_v7 = vrot.slane %v16398_v51, 6  ;;  %v11157_v18 = vrot.slane %v16398_v51, 4 }
0x1d16   :  { %13701 = vmatprep.mubr.msk.f32.mxu0 %vm14894_vm0, %v14895_v1  ;;  %13736 = vmatprep.mubr.msk.f32.mxu1 %vm14894_vm0, %v14895_v1  ;;  %v14643_v33 = vpack.c.bf16 %v12015_v28, %v12014_v57 }
0x1d17   :  { %14585 = vmatprep.subr.bf16.mxu0 %v14893_v0  ;;  %14600 = vmatprep.subr.bf16.mxu1 %v14893_v0 }
0x1d18   :  { %13702 = vmatmul.mubr.msk.f32.vlgmr.msra.gmra.mrb[154].mxu0 %vm624_vm4, %v9463_v3  ;;  %13737 = vmatmul.mubr.msk.f32.vlgmr.msra.gmra.mrb[182].mxu1 %vm624_vm4, %v9848_v13  ;;  %v12011_v3 = vld [vmem:[%s16681_s23 + $0x160] sm:$0xff]  ;;  %v12012_v13 = vld [vmem:[%s16681_s23 + $0x168] sm:$0xff] }
0x1d19   :  { %14587 = vmatpush3.bf16.msra.mxu0 %v14586_v58  ;;  %14602 = vmatpush3.bf16.msra.mxu1 %v14601_v62  ;;  %v12021_v58 = vld [vmem:[%s16681_s23 + $0x198] sm:$0xff]  ;;  %v14640_v60 = vpack.c.bf16 %v12012_v13, %v12011_v3 }
0x1d1a   :  { %13715 = vmatprep.mubr.msk.f32.mxu0 %vm14894_vm0, %v14895_v1  ;;  %13750 = vmatprep.mubr.msk.f32.mxu1 %vm14894_vm0, %v14895_v1 }
0x1d1b   :  { %14591 = vmatprep.subr.bf16.mxu0 %v14893_v0  ;;  %14606 = vmatprep.subr.bf16.mxu1 %v14893_v0 }
0x1d1c   :  { %13716 = vmatmul.mubr.msk.f32.vlgmr.msra.gmra.mrb[156].mxu0 %vm624_vm4, %v16395_v11  ;;  %13751 = vmatmul.mubr.msk.f32.vlgmr.msra.gmra.mrb[184].mxu1 %vm624_vm4, %v16388_v15  ;;  %v11999_v15 = vld [vmem:[%s16681_s23 + $0x120] sm:$0xff]  ;;  %v10387_v11 = vrot.slane %v16403_v16, 2 }
0x1d1d   :  { %14593 = vmatpush3.bf16.msra.mxu0 %v14592_v61  ;;  %14608 = vmatpush3.bf16.msra.mxu1 %v14607_v24  ;;  %v14628_v12 = vpack.c.bf16 %v12000_v56, %v11999_v15  ;;  %v12017_v61 = vld [vmem:[%s16681_s23 + $0x180] sm:$0xff]  ;;  %v12018_v24 = vld [vmem:[%s16681_s23 + $0x188] sm:$0xff] }
0x1d1e   :  { %13729 = vmatprep.mubr.msk.f32.mxu0 %vm14894_vm0, %v14895_v1  ;;  %13764 = vmatprep.mubr.msk.f32.mxu1 %vm14894_vm0, %v14895_v1  ;;  %v14646_v31 = vpack.c.bf16 %v12018_v24, %v12017_v61 }
0x1d1f   :  { %14597 = vmatprep.subr.bf16.mxu0 %v14893_v0  ;;  %14612 = vmatprep.subr.bf16.mxu1 %v14893_v0 }
0x1d20   :  { %13730 = vmatmul.mubr.msk.f32.vlgmr.msra.gmra.mrb[158].mxu0 %vm624_vm4, %v9771_v25  ;;  %13765 = vmatmul.mubr.msk.f32.vlgmr.msra.gmra.mrb[186].mxu1 %vm624_vm4, %v10156_v26  ;;  %v11397_v25 = vld [vmem:[%s15121_s6 + $0x18] sm:$0xff] }
0x1d21   :  { %14599 = vmatpush3.bf16.msra.mxu0 %v14598_v19  ;;  %14614 = vmatpush3.bf16.msra.mxu1 %v14613_v21  ;;  %v11394_v19 = vld [vmem:[%s15121_s6] sm:$0xff]  ;;  %v11395_v21 = vld [vmem:[%s15121_s6 + $0x8] sm:$0xff] }
0x1d22   :  { %13743 = vmatprep.mubr.msk.f32.mxu0 %vm14894_vm0, %v14895_v1  ;;  %13778 = vmatprep.mubr.msk.f32.mxu1 %vm14894_vm0, %v14895_v1  ;;  %v14655_v22 = vpack.c.bf16 %v11395_v21, %v11394_v19 }
0x1d23   :  { %14603 = vmatprep.subr.bf16.mxu0 %v14893_v0  ;;  %14618 = vmatprep.subr.bf16.mxu1 %v14893_v0 }
0x1d24   :  { %13744 = vmatmul.mubr.msk.f32.vlgmr.msra.gmra.mrb[160].mxu0 %vm624_vm4, %v9302_v4  ;;  %13779 = vmatmul.mubr.msk.f32.vlgmr.msra.gmra.mrb[188].mxu1 %vm624_vm4, %v16403_v16  ;;  %v12006_v4 = vld [vmem:[%s16681_s23 + $0x148] sm:$0xff]  ;;  %v11080_v16 = vrot.slane %v16398_v51, 2 }
0x1d25   :  { %14605 = vmatpush3.bf16.msra.mxu0 %v14604_v35  ;;  %14620 = vmatpush3.bf16.msra.mxu1 %v14619_v53  ;;  %v14634_v62 = vpack.c.bf16 %v12006_v4, %v12005_v29  ;;  %v14664_v35 = vpack.c.bf16 %v11401_v34, %v11400_v32  ;;  %v11402_v53 = vld [vmem:[%s15121_s6 + $0x40] sm:$0xff] }
0x1d26   :  { %13757 = vmatprep.mubr.msk.f32.mxu0 %vm14894_vm0, %v14895_v1  ;;  %13792 = vmatprep.mubr.msk.f32.mxu1 %vm14894_vm0, %v14895_v1  ;;  %v14667_v38 = vpack.c.bf16 %v11403_v37, %v11402_v53 }
0x1d27   :  { %14609 = vmatprep.subr.bf16.mxu0 %v14893_v0  ;;  %14624 = vmatprep.subr.bf16.mxu1 %v14893_v0 }
0x1d28   :  { %13758 = vmatmul.mubr.msk.f32.vlgmr.msra.gmra.mrb[162].mxu0 %vm624_vm4, %v10079_v10  ;;  %13793 = vmatmul.mubr.msk.f32.vlgmr.msra.gmra.mrb[190].mxu1 %vm624_vm4, %v10464_v20  ;;  %v11408_v20 = vld [vmem:[%s15121_s6 + $0x70] sm:$0xff] }
0x1d29   :  { %14611 = vmatpush3.bf16.msra.mxu0 %v14610_v44  ;;  %14626 = vmatpush3.bf16.msra.mxu1 %v14625_v45  ;;  %v14670_v44 = vpack.c.bf16 %v11405_v42, %v11404_v39  ;;  %v11406_v45 = vld [vmem:[%s15121_s6 + $0x60] sm:$0xff]  ;;  %v14676_v36 = vpack.c.bf16 %v11409_v27, %v11408_v20 }
0x1d2a   :  { %13771 = vmatprep.mubr.msk.f32.mxu0 %vm14894_vm0, %v14895_v1  ;;  %13806 = vmatprep.mubr.msk.f32.mxu1 %vm14894_vm0, %v14895_v1  ;;  %v14673_v10 = vpack.c.bf16 %v11407_v46, %v11406_v45 }
0x1d2b   :  { %14615 = vmatprep.subr.bf16.mxu0 %v14893_v0  ;;  %14630 = vmatprep.subr.bf16.mxu1 %v14893_v0 }
0x1d2c   :  { %13772 = vmatmul.mubr.msk.f32.vlgmr.msra.gmra.mrb[164].mxu0 %vm624_vm4, %v10233_v50  ;;  %13807 = vmatmul.mubr.msk.f32.vlgmr.msra.gmra.mrb[192].mxu1 %vm624_vm4, %v16420_v9  ;;  %v12020_v9 = vld [vmem:[%s16681_s23 + $0x190] sm:$0xff] }
0x1d2d   :  { %14617 = vmatpush3.bf16.msra.mxu0 %v14616_v59  ;;  %14632 = vmatpush3.bf16.msra.mxu1 %v14631_v43  ;;  %v14649_v63 = vpack.c.bf16 %v12021_v58, %v12020_v9 }
0x1d2e   :  { %13785 = vmatprep.mubr.msk.f32.mxu0 %vm14894_vm0, %v14895_v1  ;;  %13820 = vmatprep.mubr.msk.f32.mxu1 %vm14894_vm0, %v14895_v1 }
0x1d2f   :  { %14621 = vmatprep.subr.bf16.mxu0 %v14893_v0  ;;  %14636 = vmatprep.subr.bf16.mxu1 %v14893_v0 }
0x1d30   :  { %13786 = vmatmul.mubr.msk.f32.vlgmr.msra.gmra.mrb[166].mxu0 %vm624_vm4, %v10387_v11  ;;  %13821 = vmatmul.mubr.msk.f32.vlgmr.msra.gmra.mrb[194].mxu1 %vm624_vm4, %v10772_v55 }
0x1d31   :  { %14623 = vmatpush3.bf16.msra.mxu0 %v14622_v52  ;;  %14638 = vmatpush3.bf16.msra.mxu1 %v14637_v54 }
0x1d32   :  { %13799 = vmatprep.mubr.msk.f32.mxu0 %vm14894_vm0, %v14895_v1  ;;  %13834 = vmatprep.mubr.msk.f32.mxu1 %vm14894_vm0, %v14895_v1 }
0x1d33   :  { %14627 = vmatprep.subr.bf16.mxu0 %v14893_v0  ;;  %14642 = vmatprep.subr.bf16.mxu1 %v14893_v0 }
0x1d34   :  { %13800 = vmatmul.mubr.msk.f32.vlgmr.msra.gmra.mrb[168].mxu0 %vm624_vm4, %v10541_v49  ;;  %13835 = vmatmul.mubr.msk.f32.vlgmr.msra.gmra.mrb[196].mxu1 %vm624_vm4, %v10926_v40 }
0x1d35   :  { %14629 = vmatpush3.bf16.msra.mxu0 %v14628_v12  ;;  %14644 = vmatpush3.bf16.msra.mxu1 %v14643_v33 }
0x1d36   :  { %13813 = vmatprep.mubr.msk.f32.mxu0 %vm14894_vm0, %v14895_v1  ;;  %13848 = vmatprep.mubr.msk.f32.mxu1 %vm14894_vm0, %v14895_v1 }
0x1d37   :  { %14633 = vmatprep.subr.bf16.mxu0 %v14893_v0  ;;  %14648 = vmatprep.subr.bf16.mxu1 %v14893_v0 }
0x1d38   :  { %13814 = vmatmul.mubr.msk.f32.vlgmr.msra.gmra.mrb[170].mxu0 %vm624_vm4, %v16385_v6  ;;  %13849 = vmatmul.mubr.msk.f32.vlgmr.msra.gmra.mrb[198].mxu1 %vm624_vm4, %v11080_v16  ;;  %v12023_v6 = vld [vmem:[%s16681_s23 + $0x1a0] sm:$0xff] }
0x1d39   :  { %14635 = vmatpush3.bf16.msra.mxu0 %v14634_v62  ;;  %14650 = vmatpush3.bf16.msra.mxu1 %v14649_v63  ;;  %v14652_v17 = vpack.c.bf16 %v12024_v14, %v12023_v6 }
0x1d3a   :  { %13827 = vmatprep.mubr.msk.f32.mxu0 %vm14894_vm0, %v14895_v1  ;;  %13862 = vmatprep.mubr.msk.f32.mxu1 %vm14894_vm0, %v14895_v1 }
0x1d3b   :  { %14639 = vmatprep.subr.bf16.mxu0 %v14893_v0  ;;  %14654 = vmatprep.subr.bf16.mxu1 %v14893_v0 }
0x1d3c   :  { %13828 = vmatmul.mubr.msk.f32.vlgmr.msra.gmra.mrb[172].mxu0 %vm624_vm4, %v10849_v5  ;;  %13863 = vmatmul.mubr.msk.f32.vlgmr.msra.gmra.mrb[200].mxu1 %vm624_vm4, %v11234_v7 }
0x1d3d   :  { %14641 = vmatpush3.bf16.msra.mxu0 %v14640_v60  ;;  %13841 = vmatprep.mubr.msk.f32.mxu0 %vm14894_vm0, %v14895_v1 }
0x1d3e   :  { %14645 = vmatprep.subr.bf16.mxu0 %v14893_v0  ;;  %13904 = vmatprep.mubr.msk.f32.mxu1 %vm14894_vm0, %v14895_v1 }
0x1d3f   :  { %14656 = vmatpush3.bf16.msra.mxu1 %v14655_v22 }
0x1d40   :  { %13842 = vmatmul.mubr.msk.f32.vlgmr.msra.gmra.mrb[174].mxu0 %vm624_vm4, %v16398_v51  ;;  %14657 = vmatprep.subr.bf16.mxu1 %v14893_v0  ;;  %v11396_v51 = vld [vmem:[%s15121_s6 + $0x10] sm:$0xff] }
0x1d41   :  { %14647 = vmatpush3.bf16.msra.mxu0 %v14646_v31  ;;  %13855 = vmatprep.mubr.msk.f32.mxu0 %vm14894_vm0, %v14895_v1  ;;  %v14658_v26 = vpack.c.bf16 %v11397_v25, %v11396_v51 }
0x1d42   :  { %14651 = vmatprep.subr.bf16.mxu0 %v14893_v0 }
0x1d43   :  { %14659 = vmatpush3.bf16.msra.mxu1 %v14658_v26 }
0x1d44   :  { %13856 = vmatmul.mubr.msk.f32.vlgmr.msra.gmra.mrb[176].mxu0 %vm624_vm4, %v11157_v18  ;;  %14660 = vmatprep.subr.bf16.mxu1 %v14893_v0 }
0x1d45   :  { %14653 = vmatpush3.bf16.msra.mxu0 %v14652_v17  ;;  %13869 = vmatprep.mubr.msk.f32.mxu0 %vm14894_vm0, %v14895_v1  ;;  %v11398_v1 = vld [vmem:[%s15121_s6 + $0x20] sm:$0xff]  ;;  %vm11487_vm0 = vcmask 25600  }
0x1d48   :  { %13870 = vmatmul.mubr.msk.f32.vlgmr.msra.gmra.mrb[178].mxu0 %vm624_vm4, %v16424_v2  ;;  %v11399_v2 = vld [vmem:[%s15121_s6 + $0x28] sm:$0xff]  ;;  %s14897_s6 = smov [#allocation7]  }
0x1d49   :  { %v14661_v30 = vpack.c.bf16 %v11399_v2, %v11398_v1  ;;  %s11495_s26 = sshll.u32 %s14897_s6, 4  ;;  %s11496_s26 = int_to_ptr.vmem [resolvable:$true] %s11495_s26 }
0x1d4a   :  { %s14818_s5 = scalar_lea.vmem %s11496_s26, 32  ;;  %p14823_p3 = scmp.lt.s32.totalorder %s11496_s26, %s11496_s26 }
0x1d4b   :  { %14662 = vmatpush3.bf16.msra.mxu1 %v14661_v30  ;;  %p14819_p2 = scmp.ne.s32.totalorder %s11496_s26, %s14818_s5  ;;  %p14824_p4 = scmp.lt.s32.totalorder %s14818_s5, %s14818_s5 }
0x1d4c   :  { %14663 = vmatprep.subr.bf16.mxu1 %v14893_v0 }
0x1d4d   :  { %p14825_p5 = por %p14824_p4, %p14823_p3 }
0x1d4f   :  { %14665 = vmatpush3.bf16.msra.mxu1 %v14664_v35  ;;  %p14826_p6 = pnand %p14825_p5, %p14819_p2 }
0x1d50   :  { %14666 = vmatprep.subr.bf16.mxu1 %v14893_v0 }
0x1d53   :  { %14668 = vmatpush3.bf16.msra.mxu1 %v14667_v38 }
0x1d54   :  { %14669 = vmatprep.subr.bf16.mxu1 %v14893_v0 }
0x1d57   :  { %14671 = vmatpush3.bf16.msra.mxu1 %v14670_v44 }
0x1d58   :  { %14672 = vmatprep.subr.bf16.mxu1 %v14893_v0 }
0x1d5b   :  { %14674 = vmatpush3.bf16.msra.mxu1 %v14673_v10 }
0x1d5c   :  { %14675 = vmatprep.subr.bf16.mxu1 %v14893_v0 }
0x1d5f   :  { %14677 = vmatpush3.bf16.msra.mxu1 %v14676_v36 }
0x1de3   :  { %v9384_v23 = vpop.f32.mrb[150].mxu0  ;;  %v9609_v59 = vpop.f32.mrb[178].mxu1 }
0x1de4   :  { %v13689_v43 = vpop.f32.mrb[151].mxu0  ;;  %v13710_v41 = vpop.f32.mrb[179].mxu1 }
0x1de7   :  { %v9456_v50 = vpop.f32.mrb[152].mxu0  ;;  %v9763_v8 = vpop.f32.mrb[180].mxu1 }
0x1de8   :  { %v9457_v47 = vadd.f32 %v9456_v50, %v9384_v23  ;;  %v13696_v48 = vpop.f32.mrb[153].mxu0  ;;  %v13724_v52 = vpop.f32.mrb[181].mxu1 }
0x1deb   :  { %v9532_v54 = vpop.f32.mrb[154].mxu0  ;;  %v9917_v15 = vpop.f32.mrb[182].mxu1 }
0x1dec   :  { %v9536_v11 = vadd.f32 %v9532_v54, %v9457_v47  ;;  %v13703_v55 = vpop.f32.mrb[155].mxu0  ;;  %v13738_v56 = vpop.f32.mrb[183].mxu1 }
0x1dee   :  { %v9613_v57 = vadd.f32 %v9609_v59, %v9536_v11 }
0x1def   :  { %v9686_v0 = vpop.f32.mrb[156].mxu0  ;;  %v10071_v28 = vpop.f32.mrb[184].mxu1 }
0x1df0   :  { %v9690_v12 = vadd.f32 %v9686_v0, %v9613_v57  ;;  %v13717_v33 = vpop.f32.mrb[157].mxu0  ;;  %v13752_v29 = vpop.f32.mrb[185].mxu1  ;;  %v12026_v57 = vld [vmem:[#allocation2] ss:$0 sm:$0xff] }
0x1df1   :  { %v12027_v29 = vld [vmem:[#allocation5] ss:$0 sm:$0xff] }
0x1df2   :  { %v9767_v49 = vadd.f32 %v9763_v8, %v9690_v12 }
0x1df3   :  { %v9840_v40 = vpop.f32.mrb[158].mxu0  ;;  %v10225_v4 = vpop.f32.mrb[186].mxu1 }
0x1df4   :  { %v9844_v9 = vadd.f32 %v9840_v40, %v9767_v49  ;;  %v13731_v58 = vpop.f32.mrb[159].mxu0  ;;  %v13766_v62 = vpop.f32.mrb[187].mxu1 }
0x1df6   :  { %v9921_v63 = vadd.f32 %v9917_v15, %v9844_v9 }
0x1df7   :  { %v9994_v16 = vpop.f32.mrb[160].mxu0  ;;  %v10379_v3 = vpop.f32.mrb[188].mxu1 }
0x1df8   :  { %v9998_v13 = vadd.f32 %v9994_v16, %v9921_v63  ;;  %v13745_v60 = vpop.f32.mrb[161].mxu0  ;;  %v13780_v5 = vpop.f32.mrb[189].mxu1 }
0x1dfa   :  { %v10075_v7 = vadd.f32 %v10071_v28, %v9998_v13 }
0x1dfb   :  { %v10148_v61 = vpop.f32.mrb[162].mxu0  ;;  %v10533_v24 = vpop.f32.mrb[190].mxu1 }
0x1dfc   :  { %v10152_v31 = vadd.f32 %v10148_v61, %v10075_v7  ;;  %v13759_v6 = vpop.f32.mrb[163].mxu0  ;;  %v13794_v14 = vpop.f32.mrb[191].mxu1 }
0x1dfe   :  { %v10229_v17 = vadd.f32 %v10225_v4, %v10152_v31 }
0x1dff   :  { %v10302_v18 = vpop.f32.mrb[164].mxu0  ;;  %v10687_v19 = vpop.f32.mrb[192].mxu1 }
0x1e00   :  { %v10306_v21 = vadd.f32 %v10302_v18, %v10229_v17  ;;  %v13773_v22 = vpop.f32.mrb[165].mxu0  ;;  %v13808_v51 = vpop.f32.mrb[193].mxu1 }
0x1e02   :  { %v10383_v25 = vadd.f32 %v10379_v3, %v10306_v21 }
0x1e03   :  { %v10456_v26 = vpop.f32.mrb[166].mxu0  ;;  %v10841_v1 = vpop.f32.mrb[194].mxu1 }
0x1e04   :  { %v10460_v2 = vadd.f32 %v10456_v26, %v10383_v25  ;;  %v13787_v30 = vpop.f32.mrb[167].mxu0  ;;  %v13822_v32 = vpop.f32.mrb[195].mxu1 }
0x1e06   :  { %v10537_v34 = vadd.f32 %v10533_v24, %v10460_v2 }
0x1e07   :  { %v10610_v35 = vpop.f32.mrb[168].mxu0  ;;  %v10995_v53 = vpop.f32.mrb[196].mxu1 }
0x1e08   :  { %v10614_v37 = vadd.f32 %v10610_v35, %v10537_v34  ;;  %v13801_v38 = vpop.f32.mrb[169].mxu0  ;;  %v13836_v39 = vpop.f32.mrb[197].mxu1 }
0x1e0a   :  { %v10691_v42 = vadd.f32 %v10687_v19, %v10614_v37 }
0x1e0b   :  { %v10764_v44 = vpop.f32.mrb[170].mxu0  ;;  %v11149_v45 = vpop.f32.mrb[198].mxu1 }
0x1e0c   :  { %v10768_v46 = vadd.f32 %v10764_v44, %v10691_v42  ;;  %v13815_v10 = vpop.f32.mrb[171].mxu0  ;;  %v13850_v20 = vpop.f32.mrb[199].mxu1 }
0x1e0e   :  { %v10845_v27 = vadd.f32 %v10841_v1, %v10768_v46 }
0x1e0f   :  { %v10918_v36 = vpop.f32.mrb[172].mxu0  ;;  %v11303_v23 = vpop.f32.mrb[200].mxu1 }
0x1e10   :  { %v10922_v59 = vadd.f32 %v10918_v36, %v10845_v27  ;;  %v13829_v43 = vpop.f32.mrb[173].mxu0  ;;  %v13864_v41 = vpop.f32.mrb[201].mxu1 }
0x1e12   :  { %v10999_v50 = vadd.f32 %v10995_v53, %v10922_v59 }
0x1e13   :  { %v11072_v8 = vpop.f32.mrb[174].mxu0 }
0x1e14   :  { %v11076_v47 = vadd.f32 %v11072_v8, %v10999_v50  ;;  %v13843_v48 = vpop.f32.mrb[175].mxu0 }
0x1e16   :  { %v11153_v52 = vadd.f32 %v11149_v45, %v11076_v47 }
0x1e17   :  { %v11226_v54 = vpop.f32.mrb[176].mxu0 }
0x1e18   :  { %v11230_v15 = vadd.f32 %v11226_v54, %v11153_v52  ;;  %v13857_v11 = vpop.f32.mrb[177].mxu0 }
0x1e1a   :  { %v11307_v55 = vadd.f32 %v11303_v23, %v11230_v15 }
0x1e1b   :  { %v11380_v56 = vpop.f32.mrb[178].mxu0 }
0x1e1c   :  { %v11384_v0 = vadd.f32 %v11380_v56, %v11307_v55  ;;  %v13871_v28 = vpop.f32.mrb[179].mxu0 }
0x1e1e   :  { %v11392_v12 = vadd.f32 %v12026_v57, %v11384_v0 }
0x1e20   :  { %v11393_v33 = vmax.f32 %v11392_v12, 0.0 }
0x1e22   :  { %13905 = vmatmul.mubr.f32.vlgmr.msra.gmra.mrb[202].mxu1 %v11393_v33 }
0x1ef5   :  { %v11483_v49 = vpop.f32.mrb[202].mxu1 }
0x1ef6   :  { %v11484_v40 = vadd.f32 %v12027_v29, %v11483_v49  ;;  %v13906_v4 = vpop.f32.mrb[203].mxu1 }
0x1ef8   :  { %11488 = vst.msk [vmem:[#allocation7] sm:$0x3] %vm11487_vm0, %v11484_v40 }
0x1ef9   :  { %14829 = shalt.err (!%p14826_p6)
}
0x1efa   :  { %s14830_s9 = scalar_lea.hbm %s15131_s4, 32 }
0x1efb   :  { %p14831_p7 = scmp.ne.s32.totalorder %s15131_s4, %s14830_s9  ;;  %p14834_p8 = scmp.lt.u32.totalorder %s14830_s9, %s15131_s4 }
0x1efd   :  { %p14836_p9 = pnand %p14834_p8, %p14831_p7 }
0x1eff   :  { %14839 = shalt.err (!%p14836_p9)
}
0x1f00   :  { %11498 = dma.vmem_to_hbm [thread:$0]  %s11496_s26, 32, %s15131_s4, [#allocation4]  }
0x1f01   :  { %14844 = dma.done.wait [#allocation4], 32  }
0x1f02   :  { %14845 = vsyncadd [#allocation4], 4294967264 }
0x1f03   :  { %11502 = vsyncpa [#allocation3], 1 }
0x1f04   :  { %11503 = vsyncpa [#allocation6], 1 }
0x1f05   :  { %11504 = vsyncpa [#allocation4], 1 }

</bundles_post_ra>
